<compile_context>
chip_gen: v5e
topology: v5e:2x2
jax: 0.10.0
libtpu: 0.0.40
codegen_flags: <defaults>
</compile_context>

<pallas_src>
import math

import jax
import jax.numpy as jnp
from jax.experimental import pallas as pl
from jax.experimental.pallas import tpu as pltpu

# ---------------- scaled-down config (mirrors Config / parse_sizes_by_name) ----------------
MEL_BINS = 16            # cfg.input_size[0]   (80 in the real model)
UNIT_FRAMES = 32         # cfg.input_size[1]   (608 in the real model)
PATCH = (8, 8)           # cfg.patch_size      (16x16 in the real model)
EMBED_DIM = 64           # 768 in the real model
DEPTH = 2                # 12
NUM_HEADS = 4            # 12
MLP_RATIO = 4
HEAD_DIM = EMBED_DIM // NUM_HEADS
MLP_HIDDEN = EMBED_DIM * MLP_RATIO
FBINS = MEL_BINS // PATCH[0]               # backbone.grid_size()[0]
TGRID_FULL = UNIT_FRAMES // PATCH[1]
N_PATCHES_FULL = FBINS * TGRID_FULL
NORM_MEAN, NORM_STD = -7.1, 4.2            # norm_stats (default)
LN_EPS = 1e-6
FEATURE_D = EMBED_DIM * FBINS              # cfg.feature_d (flat_features=False) -> 128 (lane-dense)

_PAR = pltpu.CompilerParams(dimension_semantics=("parallel",))


# ---------------------------------- fused encoder kernel -----------------------------------
def _layer_norm(x, w, b):
    mu = jnp.mean(x, axis=-1, keepdims=True)
    var = jnp.mean((x - mu) ** 2, axis=-1, keepdims=True)
    return (x - mu) * jax.lax.rsqrt(var + LN_EPS) * w + b


def _gelu_tanh(x):
    # tanh-approx GELU (EUP); tiny delta vs exact erf GELU of the reference.
    c = math.sqrt(2.0 / math.pi)
    return 0.5 * x * (1.0 + jnp.tanh(c * (x + 0.044715 * x * x * x)))


def encoder_kernel(p_ref, cls_ref, pos_ref, pw_ref, pb_ref,
                   ln1w_ref, ln1b_ref, wqkv_ref, bqkv_ref, wo_ref, bo_ref,
                   ln2w_ref, ln2b_ref, w1_ref, b1_ref, w2_ref, b2_ref,
                   nw_ref, nb_ref,
                   emb_ref, sum_ref):
    """One whole LocalViT.forward_encoder pass for one batch element (one chunk)."""
    N = p_ref.shape[1]                       # number of patches in this chunk
    tg = N // FBINS                          # time-grid for this chunk
    D = EMBED_DIM
    scale = 1.0 / math.sqrt(HEAD_DIM)

    # --- PatchEmbed (Conv2d k=stride=patch as matmul, normalization folded into weights)
    #     fused with the positional-embedding add and CLS concat ---
    patches = p_ref[0].astype(jnp.bfloat16)                                  # (N, P)
    tok = jnp.dot(patches, pw_ref[...], preferred_element_type=jnp.float32)  # (N, D)
    tok = tok + pb_ref[...] + pos_ref[0]
    x = jnp.concatenate([cls_ref[0], tok], axis=0)                           # (S, D), S=N+1

    # --- DEPTH pre-LN transformer blocks; x stays resident, weights stacked (DEPTH, ...) ---
    # DEPTH is tiny, so statically unroll (for large DEPTH: lax.fori_loop over the refs).
    for d in range(DEPTH):
        # multi-head self attention with fused QKV and fused output projection
        xn = _layer_norm(x, ln1w_ref[d], ln1b_ref[d])
        qkv = jnp.dot(xn.astype(jnp.bfloat16), wqkv_ref[d],
                      preferred_element_type=jnp.float32) + bqkv_ref[d]      # (S, 3D)
        heads = []
        for h in range(NUM_HEADS):                                           # static unroll
            q = qkv[:, h * HEAD_DIM:(h + 1) * HEAD_DIM] * scale
            k = qkv[:, D + h * HEAD_DIM:D + (h + 1) * HEAD_DIM]
            v = qkv[:, 2 * D + h * HEAD_DIM:2 * D + (h + 1) * HEAD_DIM]
            s = jax.lax.dot_general(q.astype(jnp.bfloat16), k.astype(jnp.bfloat16),
                                    (((1,), (1,)), ((), ())),
                                    preferred_element_type=jnp.float32)      # (S, S)
            s = s - jnp.max(s, axis=-1, keepdims=True)
            p = jnp.exp(s)
            p = p * pl.reciprocal(jnp.sum(p, axis=-1, keepdims=True), approx=True)
            heads.append(jnp.dot(p.astype(jnp.bfloat16), v.astype(jnp.bfloat16),
                                 preferred_element_type=jnp.float32))        # (S, dh)
        attn = jnp.concatenate(heads, axis=-1)                               # (S, D)
        attn = jnp.dot(attn.astype(jnp.bfloat16), wo_ref[d],
                       preferred_element_type=jnp.float32) + bo_ref[d]
        x = x + attn

        # MLP
        xn2 = _layer_norm(x, ln2w_ref[d], ln2b_ref[d])
        h1 = jnp.dot(xn2.astype(jnp.bfloat16), w1_ref[d],
                     preferred_element_type=jnp.float32) + b1_ref[d]
        h1 = _gelu_tanh(h1)
        h2 = jnp.dot(h1.astype(jnp.bfloat16), w2_ref[d],
                     preferred_element_type=jnp.float32) + b2_ref[d]
        x = x + h2

    # --- final LayerNorm, drop CLS, rearrange 'b (f t) d -> b t (f d)' (lane-dense out) ---
    x = _layer_norm(x, nw_ref[...], nb_ref[...])
    xe = x[1:, :]                                                            # (N, D), drop CLS
    emb = jnp.concatenate([xe[f * tg:(f + 1) * tg, :] for f in range(FBINS)],
                          axis=-1)                                           # (tg, FBINS*D=128)
    emb_ref[0] = emb
    sum_ref[0] = jnp.sum(emb, axis=0, keepdims=True)                         # partial mean-pool


# ---------------------------------- pallas_call wrapper ------------------------------------
def _bcast(a):
    nd = a.ndim
    return pl.BlockSpec(tuple(a.shape), lambda b, _nd=nd: (0,) * _nd)


def fused_encoder(kp, chunk):
    """LocalViT.forward_encoder (+ rearrange + time-sum) on one log-mel chunk (B,1,F,Tc)."""
    B, _, F, Tc = chunk.shape
    pf, pt = PATCH
    fg, tg = F // pf, Tc // pt
    n = fg * tg
    D = EMBED_DIM

    # im2col for the stride=kernel conv (pure layout plumbing; patch index = f*tg + t,
    # matching Conv2d(...).flatten(2).transpose(1, 2) ordering).
    patches = chunk.reshape(B, 1, fg, pf, tg, pt)
    patches = patches.transpose(0, 2, 4, 1, 3, 5).reshape(B, n, pf * pt)

    # positional embedding (CLS slot excluded; slice time patches when the chunk is short)
    pos = kp["pos"]
    if n < pos.shape[1]:
        pos = pos.reshape(1, FBINS, TGRID_FULL, D)[:, :, :tg, :].reshape(1, n, D)

    args = [patches, kp["cls"], pos, kp["pw"], kp["pb"],
            kp["ln1_w"], kp["ln1_b"], kp["wqkv"], kp["bqkv"], kp["wo"], kp["bo"],
            kp["ln2_w"], kp["ln2_b"], kp["w1"], kp["b1"], kp["w2"], kp["b2"],
            kp["norm_w"], kp["norm_b"]]
    in_specs = [pl.BlockSpec((1, n, pf * pt), lambda b: (b, 0, 0))] \
        + [_bcast(a) for a in args[1:]]

    emb, esum = pl.pallas_call(
        encoder_kernel,
        out_shape=(jax.ShapeDtypeStruct((B, tg, FEATURE_D), jnp.float32),
                   jax.ShapeDtypeStruct((B, 1, FEATURE_D), jnp.float32)),
        grid=(B,),
        in_specs=in_specs,
        out_specs=(pl.BlockSpec((1, tg, FEATURE_D), lambda b: (b, 0, 0)),
                   pl.BlockSpec((1, 1, FEATURE_D), lambda b: (b, 0, 0))),
        compiler_params=_PAR,
    )(*args)
    return emb, esum


# ---------------------------------- model glue (plain JAX) ---------------------------------
def init_params(key):
    """Deterministic synthetic parameters with the shapes implied by LocalViT/PatchEmbed."""
    D, DHID = EMBED_DIM, MLP_HIDDEN
    P = PATCH[0] * PATCH[1]  # in_chans=1
    ks = jax.random.split(key, 7)

    def nrm(k, shape, s=0.02):
        return s * jax.random.normal(k, shape, jnp.float32)

    return dict(
        patch_w=nrm(ks[0], (P, D)),            # Conv2d(1,D,k=patch,s=patch) weight, flattened+transposed
        patch_b=jnp.zeros((1, D), jnp.float32),
        pos_embed=nrm(ks[1], (1, N_PATCHES_FULL + 1, D)),
        cls_token=nrm(ks[2], (1, 1, D)),
        norm_w=jnp.ones((1, D), jnp.float32),
        norm_b=jnp.zeros((1, D), jnp.float32),
        # per-block weights stacked along DEPTH
        ln1_w=jnp.ones((DEPTH, 1, D), jnp.float32),
        ln1_b=jnp.zeros((DEPTH, 1, D), jnp.float32),
        wqkv=nrm(ks[3], (DEPTH, D, 3 * D)),
        bqkv=jnp.zeros((DEPTH, 1, 3 * D), jnp.float32),
        wo=nrm(ks[4], (DEPTH, D, D)),
        bo=jnp.zeros((DEPTH, 1, D), jnp.float32),
        ln2_w=jnp.ones((DEPTH, 1, D), jnp.float32),
        ln2_b=jnp.zeros((DEPTH, 1, D), jnp.float32),
        w1=nrm(ks[5], (DEPTH, D, DHID)),
        b1=jnp.zeros((DEPTH, 1, DHID), jnp.float32),
        w2=nrm(ks[6], (DEPTH, DHID, D)),
        b2=jnp.zeros((DEPTH, 1, D), jnp.float32),
    )


def prepare_params(params, mean=NORM_MEAN, std=NORM_STD):
    """Fold normalize_batch into the patch-embed affine, pre-add pos to CLS, cast MXU weights to bf16."""
    inv_std = 1.0 / std
    pw_eff = params["patch_w"] * inv_std
    pb_eff = params["patch_b"] - (mean * inv_std) * jnp.sum(params["patch_w"], axis=0, keepdims=True)
    return dict(
        pw=pw_eff.astype(jnp.bfloat16),
        pb=pb_eff,
        pos=params["pos_embed"][:, 1:, :],
        cls=params["cls_token"] + params["pos_embed"][:, :1, :],
        ln1_w=params["ln1_w"], ln1_b=params["ln1_b"],
        wqkv=params["wqkv"].astype(jnp.bfloat16), bqkv=params["bqkv"],
        wo=params["wo"].astype(jnp.bfloat16), bo=params["bo"],
        ln2_w=params["ln2_w"], ln2_b=params["ln2_b"],
        w1=params["w1"].astype(jnp.bfloat16), b1=params["b1"],
        w2=params["w2"].astype(jnp.bfloat16), b2=params["b2"],
        norm_w=params["norm_w"], norm_b=params["norm_b"],
    )


def mduo_forward(params, x_lms, pooled=True):
    """MDuo.forward starting from the log-mel spectrogram x_lms = to_log_mel_spec(audio)."""
    kp = prepare_params(params)

    unit_frames = UNIT_FRAMES
    patch_frames = PATCH[1]
    n_chunk = (x_lms.shape[-1] + unit_frames - 1) // unit_frames
    pad_frames = (patch_frames - x_lms.shape[-1] % unit_frames % patch_frames) % patch_frames
    if pad_frames > 0:
        # reference pads zeros AFTER normalization; with normalization folded into the
        # patch weights, padding with `mean` in raw space is exactly equivalent.
        x_lms = jnp.pad(x_lms, ((0, 0), (0, 0), (0, 0), (0, pad_frames)),
                        constant_values=NORM_MEAN)

    embs, sums, total_t = [], [], 0
    for i in range(n_chunk):
        chunk = x_lms[..., i * unit_frames:(i + 1) * unit_frames]
        emb, esum = fused_encoder(kp, chunk)          # one fused Pallas call per chunk
        embs.append(emb)
        sums.append(esum[:, 0, :])
        total_t += emb.shape[1]

    if pooled:
        # x.mean(dim=1) over concatenated chunks == (sum of per-chunk time-sums) / T_total
        return sum(sums) / float(total_t)
    return jnp.concatenate(embs, axis=-2)             # (B, T_patches_total, feature_d)


# -------------------------------------- demo ------------------------------------------------
if __name__ == "__main__":
    B = 2
    T_TOTAL = 48   # -> 2 chunks: one full (32 frames) and one short (16 frames; exercises pos slicing)

    key = jax.random.PRNGKey(0)
    k_x, k_p = jax.random.split(key)
    # synthetic "log-mel" input with roughly log-mel-like statistics (NCHW: B, 1, n_mels, frames)
    x_lms = NORM_MEAN + NORM_STD * jax.random.normal(k_x, (B, 1, MEL_BINS, T_TOTAL), jnp.float32)

    params = init_params(k_p)
    fwd = jax.jit(lambda p, x: mduo_forward(p, x, pooled=True))
    out = jax.block_until_ready(fwd(params, x_lms))

    assert out.shape == (B, FEATURE_D), out.shape
    assert out.dtype == jnp.float32
    print("KERNEL_OK")
</pallas_src>

<mosaic_0001>
module attributes {stable_mosaic.version = 11 : i64} {
  func.func @encoder_kernel(%arg0: i32, %arg1: memref<1x8x64xf32, #tpu.memory_space<vmem>>, %arg2: memref<1x1x64xf32, #tpu.memory_space<vmem>>, %arg3: memref<1x8x64xf32, #tpu.memory_space<vmem>>, %arg4: memref<64x64xbf16, #tpu.memory_space<vmem>>, %arg5: memref<1x64xf32, #tpu.memory_space<vmem>>, %arg6: memref<2x1x64xf32, #tpu.memory_space<vmem>>, %arg7: memref<2x1x64xf32, #tpu.memory_space<vmem>>, %arg8: memref<2x64x192xbf16, #tpu.memory_space<vmem>>, %arg9: memref<2x1x192xf32, #tpu.memory_space<vmem>>, %arg10: memref<2x64x64xbf16, #tpu.memory_space<vmem>>, %arg11: memref<2x1x64xf32, #tpu.memory_space<vmem>>, %arg12: memref<2x1x64xf32, #tpu.memory_space<vmem>>, %arg13: memref<2x1x64xf32, #tpu.memory_space<vmem>>, %arg14: memref<2x64x256xbf16, #tpu.memory_space<vmem>>, %arg15: memref<2x1x256xf32, #tpu.memory_space<vmem>>, %arg16: memref<2x256x64xbf16, #tpu.memory_space<vmem>>, %arg17: memref<2x1x64xf32, #tpu.memory_space<vmem>>, %arg18: memref<1x64xf32, #tpu.memory_space<vmem>>, %arg19: memref<1x64xf32, #tpu.memory_space<vmem>>, %arg20: memref<1x4x128xf32, #tpu.memory_space<vmem>>, %arg21: memref<1x1x128xf32, #tpu.memory_space<vmem>>) attributes {dimension_semantics = [#tpu.dimension_semantics<parallel>], iteration_bounds = array<i64: 2>, scalar_prefetch = 0 : i64, scratch_operands = 0 : i64, tpu.core_type = #tpu.core_type<tc>, window_params = [{transform_indices = @transform_0, window_bounds = array<i64: 1, 8, 64>}, {pipeline_mode = #tpu.pipeline_mode<synchronous>, transform_indices = @transform_1, window_bounds = array<i64: 1, 1, 64>}, {pipeline_mode = #tpu.pipeline_mode<synchronous>, transform_indices = @transform_2, window_bounds = array<i64: 1, 8, 64>}, {pipeline_mode = #tpu.pipeline_mode<synchronous>, transform_indices = @transform_3, window_bounds = array<i64: 64, 64>}, {pipeline_mode = #tpu.pipeline_mode<synchronous>, transform_indices = @transform_4, window_bounds = array<i64: 1, 64>}, {pipeline_mode = #tpu.pipeline_mode<synchronous>, transform_indices = @transform_5, window_bounds = array<i64: 2, 1, 64>}, {pipeline_mode = #tpu.pipeline_mode<synchronous>, transform_indices = @transform_6, window_bounds = array<i64: 2, 1, 64>}, {pipeline_mode = #tpu.pipeline_mode<synchronous>, transform_indices = @transform_7, window_bounds = array<i64: 2, 64, 192>}, {pipeline_mode = #tpu.pipeline_mode<synchronous>, transform_indices = @transform_8, window_bounds = array<i64: 2, 1, 192>}, {pipeline_mode = #tpu.pipeline_mode<synchronous>, transform_indices = @transform_9, window_bounds = array<i64: 2, 64, 64>}, {pipeline_mode = #tpu.pipeline_mode<synchronous>, transform_indices = @transform_10, window_bounds = array<i64: 2, 1, 64>}, {pipeline_mode = #tpu.pipeline_mode<synchronous>, transform_indices = @transform_11, window_bounds = array<i64: 2, 1, 64>}, {pipeline_mode = #tpu.pipeline_mode<synchronous>, transform_indices = @transform_12, window_bounds = array<i64: 2, 1, 64>}, {pipeline_mode = #tpu.pipeline_mode<synchronous>, transform_indices = @transform_13, window_bounds = array<i64: 2, 64, 256>}, {pipeline_mode = #tpu.pipeline_mode<synchronous>, transform_indices = @transform_14, window_bounds = array<i64: 2, 1, 256>}, {pipeline_mode = #tpu.pipeline_mode<synchronous>, transform_indices = @transform_15, window_bounds = array<i64: 2, 256, 64>}, {pipeline_mode = #tpu.pipeline_mode<synchronous>, transform_indices = @transform_16, window_bounds = array<i64: 2, 1, 64>}, {pipeline_mode = #tpu.pipeline_mode<synchronous>, transform_indices = @transform_17, window_bounds = array<i64: 1, 64>}, {pipeline_mode = #tpu.pipeline_mode<synchronous>, transform_indices = @transform_18, window_bounds = array<i64: 1, 64>}, {transform_indices = @transform_19, window_bounds = array<i64: 1, 4, 128>}, {transform_indices = @transform_20, window_bounds = array<i64: 1, 1, 128>}]} {
    %c0 = arith.constant 0 : index
    %c0_0 = arith.constant 0 : index
    %c0_1 = arith.constant 0 : index
    %0 = vector.load %arg1[%c0, %c0_0, %c0_1] : memref<1x8x64xf32, #tpu.memory_space<vmem>>, vector<1x8x64xf32>
    %1 = vector.shape_cast %0 : vector<1x8x64xf32> to vector<8x64xf32>
    %2 = arith.truncf %1 : vector<8x64xf32> to vector<8x64xbf16>
    %c0_2 = arith.constant 0 : index
    %c0_3 = arith.constant 0 : index
    %3 = vector.load %arg4[%c0_2, %c0_3] : memref<64x64xbf16, #tpu.memory_space<vmem>>, vector<64x64xbf16>
    %cst = arith.constant dense<0.000000e+00> : vector<8x64xf32>
    %4 = tpu.matmul %2, %3, %cst {dimension_numbers = #tpu.dot_dimension_numbers<[1], [0], [0], [1], [0, 0, 1, 1], [], []>} : vector<8x64xbf16>, vector<64x64xbf16>, vector<8x64xf32> -> vector<8x64xf32>
    %c0_4 = arith.constant 0 : index
    %c0_5 = arith.constant 0 : index
    %5 = vector.load %arg5[%c0_4, %c0_5] : memref<1x64xf32, #tpu.memory_space<vmem>>, vector<1x64xf32>
    %6 = vector.broadcast %5 : vector<1x64xf32> to vector<8x64xf32>
    %7 = arith.addf %4, %6 : vector<8x64xf32>
    %c0_6 = arith.constant 0 : index
    %c0_7 = arith.constant 0 : index
    %c0_8 = arith.constant 0 : index
    %8 = vector.load %arg3[%c0_6, %c0_7, %c0_8] : memref<1x8x64xf32, #tpu.memory_space<vmem>>, vector<1x8x64xf32>
    %9 = vector.shape_cast %8 : vector<1x8x64xf32> to vector<8x64xf32>
    %10 = arith.addf %7, %9 : vector<8x64xf32>
    %c0_9 = arith.constant 0 : index
    %c0_10 = arith.constant 0 : index
    %c0_11 = arith.constant 0 : index
    %11 = vector.load %arg2[%c0_9, %c0_10, %c0_11] : memref<1x1x64xf32, #tpu.memory_space<vmem>>, vector<1x1x64xf32>
    %12 = vector.shape_cast %11 : vector<1x1x64xf32> to vector<1x64xf32>
    %13 = tpu.concatenate %12, %10 in 0 : vector<1x64xf32>, vector<8x64xf32> -> vector<9x64xf32>
    %c0_12 = arith.constant 0 : index
    %c0_13 = arith.constant 0 : index
    %c0_14 = arith.constant 0 : index
    %14 = vector.load %arg6[%c0_12, %c0_13, %c0_14] : memref<2x1x64xf32, #tpu.memory_space<vmem>>, vector<1x1x64xf32>
    %15 = vector.shape_cast %14 : vector<1x1x64xf32> to vector<1x64xf32>
    %c0_15 = arith.constant 0 : index
    %c0_16 = arith.constant 0 : index
    %c0_17 = arith.constant 0 : index
    %16 = vector.load %arg7[%c0_15, %c0_16, %c0_17] : memref<2x1x64xf32, #tpu.memory_space<vmem>>, vector<1x1x64xf32>
    %17 = vector.shape_cast %16 : vector<1x1x64xf32> to vector<1x64xf32>
    %cst_18 = arith.constant dense<0.000000e+00> : vector<9xf32>
    %18 = vector.multi_reduction <add>, %13, %cst_18 [1] : vector<9x64xf32> to vector<9xf32>
    %19 = vector.shape_cast %18 : vector<9xf32> to vector<9x1xf32>
    %cst_19 = arith.constant 6.400000e+01 : f32
    %20 = vector.broadcast %cst_19 : f32 to vector<9x1xf32>
    %21 = arith.divf %19, %20 : vector<9x1xf32>
    %22 = vector.broadcast %21 : vector<9x1xf32> to vector<9x64xf32>
    %23 = arith.subf %13, %22 : vector<9x64xf32>
    %24 = arith.mulf %23, %23 : vector<9x64xf32>
    %cst_20 = arith.constant dense<0.000000e+00> : vector<9xf32>
    %25 = vector.multi_reduction <add>, %24, %cst_20 [1] : vector<9x64xf32> to vector<9xf32>
    %26 = vector.shape_cast %25 : vector<9xf32> to vector<9x1xf32>
    %cst_21 = arith.constant 6.400000e+01 : f32
    %27 = vector.broadcast %cst_21 : f32 to vector<9x1xf32>
    %28 = arith.divf %26, %27 : vector<9x1xf32>
    %29 = vector.broadcast %21 : vector<9x1xf32> to vector<9x64xf32>
    %30 = arith.subf %13, %29 : vector<9x64xf32>
    %cst_22 = arith.constant 9.99999997E-7 : f32
    %31 = vector.broadcast %cst_22 : f32 to vector<9x1xf32>
    %32 = arith.addf %28, %31 : vector<9x1xf32>
    %33 = math.rsqrt %32 : vector<9x1xf32>
    %34 = vector.broadcast %33 : vector<9x1xf32> to vector<9x64xf32>
    %35 = arith.mulf %30, %34 : vector<9x64xf32>
    %36 = vector.broadcast %15 : vector<1x64xf32> to vector<9x64xf32>
    %37 = arith.mulf %35, %36 : vector<9x64xf32>
    %38 = vector.broadcast %17 : vector<1x64xf32> to vector<9x64xf32>
    %39 = arith.addf %37, %38 : vector<9x64xf32>
    %40 = arith.truncf %39 : vector<9x64xf32> to vector<9x64xbf16>
    %c0_23 = arith.constant 0 : index
    %c0_24 = arith.constant 0 : index
    %c0_25 = arith.constant 0 : index
    %41 = vector.load %arg8[%c0_23, %c0_24, %c0_25] : memref<2x64x192xbf16, #tpu.memory_space<vmem>>, vector<1x64x192xbf16>
    %42 = vector.shape_cast %41 : vector<1x64x192xbf16> to vector<64x192xbf16>
    %cst_26 = arith.constant dense<0.000000e+00> : vector<9x192xf32>
    %43 = tpu.matmul %40, %42, %cst_26 {dimension_numbers = #tpu.dot_dimension_numbers<[1], [0], [0], [1], [0, 0, 1, 1], [], []>} : vector<9x64xbf16>, vector<64x192xbf16>, vector<9x192xf32> -> vector<9x192xf32>
    %c0_27 = arith.constant 0 : index
    %c0_28 = arith.constant 0 : index
    %c0_29 = arith.constant 0 : index
    %44 = vector.load %arg9[%c0_27, %c0_28, %c0_29] : memref<2x1x192xf32, #tpu.memory_space<vmem>>, vector<1x1x192xf32>
    %45 = vector.shape_cast %44 : vector<1x1x192xf32> to vector<1x192xf32>
    %46 = vector.broadcast %45 : vector<1x192xf32> to vector<9x192xf32>
    %47 = arith.addf %43, %46 : vector<9x192xf32>
    %48 = vector.extract_strided_slice %47 {offsets = [0, 0], sizes = [9, 16], strides = [1, 1]} : vector<9x192xf32> to vector<9x16xf32>
    %cst_30 = arith.constant 2.500000e-01 : f32
    %49 = vector.broadcast %cst_30 : f32 to vector<9x16xf32>
    %50 = arith.mulf %48, %49 : vector<9x16xf32>
    %51 = vector.extract_strided_slice %47 {offsets = [0, 64], sizes = [9, 16], strides = [1, 1]} : vector<9x192xf32> to vector<9x16xf32>
    %52 = vector.extract_strided_slice %47 {offsets = [0, 128], sizes = [9, 16], strides = [1, 1]} : vector<9x192xf32> to vector<9x16xf32>
    %53 = arith.truncf %50 : vector<9x16xf32> to vector<9x16xbf16>
    %54 = arith.truncf %51 : vector<9x16xf32> to vector<9x16xbf16>
    %cst_31 = arith.constant dense<0.000000e+00> : vector<9x9xf32>
    %55 = tpu.matmul %53, %54, %cst_31 {dimension_numbers = #tpu.dot_dimension_numbers<[1], [1], [0], [0], [0, 0, 1, 0], [], []>} : vector<9x16xbf16>, vector<9x16xbf16>, vector<9x9xf32> -> vector<9x9xf32>
    %cst_32 = arith.constant dense<0xFF800000> : vector<9xf32>
    %56 = vector.multi_reduction <maximumf>, %55, %cst_32 [1] : vector<9x9xf32> to vector<9xf32>
    %57 = vector.shape_cast %56 : vector<9xf32> to vector<9x1xf32>
    %58 = vector.broadcast %57 : vector<9x1xf32> to vector<9x9xf32>
    %59 = arith.subf %55, %58 : vector<9x9xf32>
    %60 = math.exp %59 : vector<9x9xf32>
    %cst_33 = arith.constant dense<0.000000e+00> : vector<9xf32>
    %61 = vector.multi_reduction <add>, %60, %cst_33 [1] : vector<9x9xf32> to vector<9xf32>
    %62 = vector.shape_cast %61 : vector<9xf32> to vector<9x1xf32>
    %63 = tpu.reciprocal %62 {approx = true} : vector<9x1xf32> -> vector<9x1xf32>
    %64 = vector.broadcast %63 : vector<9x1xf32> to vector<9x9xf32>
    %65 = arith.mulf %60, %64 : vector<9x9xf32>
    %66 = arith.truncf %65 : vector<9x9xf32> to vector<9x9xbf16>
    %67 = arith.truncf %52 : vector<9x16xf32> to vector<9x16xbf16>
    %cst_34 = arith.constant dense<0.000000e+00> : vector<9x16xf32>
    %68 = tpu.matmul %66, %67, %cst_34 {dimension_numbers = #tpu.dot_dimension_numbers<[1], [0], [0], [1], [0, 0, 1, 1], [], []>} : vector<9x9xbf16>, vector<9x16xbf16>, vector<9x16xf32> -> vector<9x16xf32>
    %69 = vector.extract_strided_slice %47 {offsets = [0, 16], sizes = [9, 16], strides = [1, 1]} : vector<9x192xf32> to vector<9x16xf32>
    %cst_35 = arith.constant 2.500000e-01 : f32
    %70 = vector.broadcast %cst_35 : f32 to vector<9x16xf32>
    %71 = arith.mulf %69, %70 : vector<9x16xf32>
    %72 = vector.extract_strided_slice %47 {offsets = [0, 80], sizes = [9, 16], strides = [1, 1]} : vector<9x192xf32> to vector<9x16xf32>
    %73 = vector.extract_strided_slice %47 {offsets = [0, 144], sizes = [9, 16], strides = [1, 1]} : vector<9x192xf32> to vector<9x16xf32>
    %74 = arith.truncf %71 : vector<9x16xf32> to vector<9x16xbf16>
    %75 = arith.truncf %72 : vector<9x16xf32> to vector<9x16xbf16>
    %cst_36 = arith.constant dense<0.000000e+00> : vector<9x9xf32>
    %76 = tpu.matmul %74, %75, %cst_36 {dimension_numbers = #tpu.dot_dimension_numbers<[1], [1], [0], [0], [0, 0, 1, 0], [], []>} : vector<9x16xbf16>, vector<9x16xbf16>, vector<9x9xf32> -> vector<9x9xf32>
    %cst_37 = arith.constant dense<0xFF800000> : vector<9xf32>
    %77 = vector.multi_reduction <maximumf>, %76, %cst_37 [1] : vector<9x9xf32> to vector<9xf32>
    %78 = vector.shape_cast %77 : vector<9xf32> to vector<9x1xf32>
    %79 = vector.broadcast %78 : vector<9x1xf32> to vector<9x9xf32>
    %80 = arith.subf %76, %79 : vector<9x9xf32>
    %81 = math.exp %80 : vector<9x9xf32>
    %cst_38 = arith.constant dense<0.000000e+00> : vector<9xf32>
    %82 = vector.multi_reduction <add>, %81, %cst_38 [1] : vector<9x9xf32> to vector<9xf32>
    %83 = vector.shape_cast %82 : vector<9xf32> to vector<9x1xf32>
    %84 = tpu.reciprocal %83 {approx = true} : vector<9x1xf32> -> vector<9x1xf32>
    %85 = vector.broadcast %84 : vector<9x1xf32> to vector<9x9xf32>
    %86 = arith.mulf %81, %85 : vector<9x9xf32>
    %87 = arith.truncf %86 : vector<9x9xf32> to vector<9x9xbf16>
    %88 = arith.truncf %73 : vector<9x16xf32> to vector<9x16xbf16>
    %cst_39 = arith.constant dense<0.000000e+00> : vector<9x16xf32>
    %89 = tpu.matmul %87, %88, %cst_39 {dimension_numbers = #tpu.dot_dimension_numbers<[1], [0], [0], [1], [0, 0, 1, 1], [], []>} : vector<9x9xbf16>, vector<9x16xbf16>, vector<9x16xf32> -> vector<9x16xf32>
    %90 = vector.extract_strided_slice %47 {offsets = [0, 32], sizes = [9, 16], strides = [1, 1]} : vector<9x192xf32> to vector<9x16xf32>
    %cst_40 = arith.constant 2.500000e-01 : f32
    %91 = vector.broadcast %cst_40 : f32 to vector<9x16xf32>
    %92 = arith.mulf %90, %91 : vector<9x16xf32>
    %93 = vector.extract_strided_slice %47 {offsets = [0, 96], sizes = [9, 16], strides = [1, 1]} : vector<9x192xf32> to vector<9x16xf32>
    %94 = vector.extract_strided_slice %47 {offsets = [0, 160], sizes = [9, 16], strides = [1, 1]} : vector<9x192xf32> to vector<9x16xf32>
    %95 = arith.truncf %92 : vector<9x16xf32> to vector<9x16xbf16>
    %96 = arith.truncf %93 : vector<9x16xf32> to vector<9x16xbf16>
    %cst_41 = arith.constant dense<0.000000e+00> : vector<9x9xf32>
    %97 = tpu.matmul %95, %96, %cst_41 {dimension_numbers = #tpu.dot_dimension_numbers<[1], [1], [0], [0], [0, 0, 1, 0], [], []>} : vector<9x16xbf16>, vector<9x16xbf16>, vector<9x9xf32> -> vector<9x9xf32>
    %cst_42 = arith.constant dense<0xFF800000> : vector<9xf32>
    %98 = vector.multi_reduction <maximumf>, %97, %cst_42 [1] : vector<9x9xf32> to vector<9xf32>
    %99 = vector.shape_cast %98 : vector<9xf32> to vector<9x1xf32>
    %100 = vector.broadcast %99 : vector<9x1xf32> to vector<9x9xf32>
    %101 = arith.subf %97, %100 : vector<9x9xf32>
    %102 = math.exp %101 : vector<9x9xf32>
    %cst_43 = arith.constant dense<0.000000e+00> : vector<9xf32>
    %103 = vector.multi_reduction <add>, %102, %cst_43 [1] : vector<9x9xf32> to vector<9xf32>
    %104 = vector.shape_cast %103 : vector<9xf32> to vector<9x1xf32>
    %105 = tpu.reciprocal %104 {approx = true} : vector<9x1xf32> -> vector<9x1xf32>
    %106 = vector.broadcast %105 : vector<9x1xf32> to vector<9x9xf32>
    %107 = arith.mulf %102, %106 : vector<9x9xf32>
    %108 = arith.truncf %107 : vector<9x9xf32> to vector<9x9xbf16>
    %109 = arith.truncf %94 : vector<9x16xf32> to vector<9x16xbf16>
    %cst_44 = arith.constant dense<0.000000e+00> : vector<9x16xf32>
    %110 = tpu.matmul %108, %109, %cst_44 {dimension_numbers = #tpu.dot_dimension_numbers<[1], [0], [0], [1], [0, 0, 1, 1], [], []>} : vector<9x9xbf16>, vector<9x16xbf16>, vector<9x16xf32> -> vector<9x16xf32>
    %111 = vector.extract_strided_slice %47 {offsets = [0, 48], sizes = [9, 16], strides = [1, 1]} : vector<9x192xf32> to vector<9x16xf32>
    %cst_45 = arith.constant 2.500000e-01 : f32
    %112 = vector.broadcast %cst_45 : f32 to vector<9x16xf32>
    %113 = arith.mulf %111, %112 : vector<9x16xf32>
    %114 = vector.extract_strided_slice %47 {offsets = [0, 112], sizes = [9, 16], strides = [1, 1]} : vector<9x192xf32> to vector<9x16xf32>
    %115 = vector.extract_strided_slice %47 {offsets = [0, 176], sizes = [9, 16], strides = [1, 1]} : vector<9x192xf32> to vector<9x16xf32>
    %116 = arith.truncf %113 : vector<9x16xf32> to vector<9x16xbf16>
    %117 = arith.truncf %114 : vector<9x16xf32> to vector<9x16xbf16>
    %cst_46 = arith.constant dense<0.000000e+00> : vector<9x9xf32>
    %118 = tpu.matmul %116, %117, %cst_46 {dimension_numbers = #tpu.dot_dimension_numbers<[1], [1], [0], [0], [0, 0, 1, 0], [], []>} : vector<9x16xbf16>, vector<9x16xbf16>, vector<9x9xf32> -> vector<9x9xf32>
    %cst_47 = arith.constant dense<0xFF800000> : vector<9xf32>
    %119 = vector.multi_reduction <maximumf>, %118, %cst_47 [1] : vector<9x9xf32> to vector<9xf32>
    %120 = vector.shape_cast %119 : vector<9xf32> to vector<9x1xf32>
    %121 = vector.broadcast %120 : vector<9x1xf32> to vector<9x9xf32>
    %122 = arith.subf %118, %121 : vector<9x9xf32>
    %123 = math.exp %122 : vector<9x9xf32>
    %cst_48 = arith.constant dense<0.000000e+00> : vector<9xf32>
    %124 = vector.multi_reduction <add>, %123, %cst_48 [1] : vector<9x9xf32> to vector<9xf32>
    %125 = vector.shape_cast %124 : vector<9xf32> to vector<9x1xf32>
    %126 = tpu.reciprocal %125 {approx = true} : vector<9x1xf32> -> vector<9x1xf32>
    %127 = vector.broadcast %126 : vector<9x1xf32> to vector<9x9xf32>
    %128 = arith.mulf %123, %127 : vector<9x9xf32>
    %129 = arith.truncf %128 : vector<9x9xf32> to vector<9x9xbf16>
    %130 = arith.truncf %115 : vector<9x16xf32> to vector<9x16xbf16>
    %cst_49 = arith.constant dense<0.000000e+00> : vector<9x16xf32>
    %131 = tpu.matmul %129, %130, %cst_49 {dimension_numbers = #tpu.dot_dimension_numbers<[1], [0], [0], [1], [0, 0, 1, 1], [], []>} : vector<9x9xbf16>, vector<9x16xbf16>, vector<9x16xf32> -> vector<9x16xf32>
    %132 = tpu.concatenate %68, %89, %110, %131 in 1 : vector<9x16xf32>, vector<9x16xf32>, vector<9x16xf32>, vector<9x16xf32> -> vector<9x64xf32>
    %133 = arith.truncf %132 : vector<9x64xf32> to vector<9x64xbf16>
    %c0_50 = arith.constant 0 : index
    %c0_51 = arith.constant 0 : index
    %c0_52 = arith.constant 0 : index
    %134 = vector.load %arg10[%c0_50, %c0_51, %c0_52] : memref<2x64x64xbf16, #tpu.memory_space<vmem>>, vector<1x64x64xbf16>
    %135 = vector.shape_cast %134 : vector<1x64x64xbf16> to vector<64x64xbf16>
    %cst_53 = arith.constant dense<0.000000e+00> : vector<9x64xf32>
    %136 = tpu.matmul %133, %135, %cst_53 {dimension_numbers = #tpu.dot_dimension_numbers<[1], [0], [0], [1], [0, 0, 1, 1], [], []>} : vector<9x64xbf16>, vector<64x64xbf16>, vector<9x64xf32> -> vector<9x64xf32>
    %c0_54 = arith.constant 0 : index
    %c0_55 = arith.constant 0 : index
    %c0_56 = arith.constant 0 : index
    %137 = vector.load %arg11[%c0_54, %c0_55, %c0_56] : memref<2x1x64xf32, #tpu.memory_space<vmem>>, vector<1x1x64xf32>
    %138 = vector.shape_cast %137 : vector<1x1x64xf32> to vector<1x64xf32>
    %139 = vector.broadcast %138 : vector<1x64xf32> to vector<9x64xf32>
    %140 = arith.addf %136, %139 : vector<9x64xf32>
    %141 = arith.addf %13, %140 : vector<9x64xf32>
    %c0_57 = arith.constant 0 : index
    %c0_58 = arith.constant 0 : index
    %c0_59 = arith.constant 0 : index
    %142 = vector.load %arg12[%c0_57, %c0_58, %c0_59] : memref<2x1x64xf32, #tpu.memory_space<vmem>>, vector<1x1x64xf32>
    %143 = vector.shape_cast %142 : vector<1x1x64xf32> to vector<1x64xf32>
    %c0_60 = arith.constant 0 : index
    %c0_61 = arith.constant 0 : index
    %c0_62 = arith.constant 0 : index
    %144 = vector.load %arg13[%c0_60, %c0_61, %c0_62] : memref<2x1x64xf32, #tpu.memory_space<vmem>>, vector<1x1x64xf32>
    %145 = vector.shape_cast %144 : vector<1x1x64xf32> to vector<1x64xf32>
    %cst_63 = arith.constant dense<0.000000e+00> : vector<9xf32>
    %146 = vector.multi_reduction <add>, %141, %cst_63 [1] : vector<9x64xf32> to vector<9xf32>
    %147 = vector.shape_cast %146 : vector<9xf32> to vector<9x1xf32>
    %cst_64 = arith.constant 6.400000e+01 : f32
    %148 = vector.broadcast %cst_64 : f32 to vector<9x1xf32>
    %149 = arith.divf %147, %148 : vector<9x1xf32>
    %150 = vector.broadcast %149 : vector<9x1xf32> to vector<9x64xf32>
    %151 = arith.subf %141, %150 : vector<9x64xf32>
    %152 = arith.mulf %151, %151 : vector<9x64xf32>
    %cst_65 = arith.constant dense<0.000000e+00> : vector<9xf32>
    %153 = vector.multi_reduction <add>, %152, %cst_65 [1] : vector<9x64xf32> to vector<9xf32>
    %154 = vector.shape_cast %153 : vector<9xf32> to vector<9x1xf32>
    %cst_66 = arith.constant 6.400000e+01 : f32
    %155 = vector.broadcast %cst_66 : f32 to vector<9x1xf32>
    %156 = arith.divf %154, %155 : vector<9x1xf32>
    %157 = vector.broadcast %149 : vector<9x1xf32> to vector<9x64xf32>
    %158 = arith.subf %141, %157 : vector<9x64xf32>
    %cst_67 = arith.constant 9.99999997E-7 : f32
    %159 = vector.broadcast %cst_67 : f32 to vector<9x1xf32>
    %160 = arith.addf %156, %159 : vector<9x1xf32>
    %161 = math.rsqrt %160 : vector<9x1xf32>
    %162 = vector.broadcast %161 : vector<9x1xf32> to vector<9x64xf32>
    %163 = arith.mulf %158, %162 : vector<9x64xf32>
    %164 = vector.broadcast %143 : vector<1x64xf32> to vector<9x64xf32>
    %165 = arith.mulf %163, %164 : vector<9x64xf32>
    %166 = vector.broadcast %145 : vector<1x64xf32> to vector<9x64xf32>
    %167 = arith.addf %165, %166 : vector<9x64xf32>
    %168 = arith.truncf %167 : vector<9x64xf32> to vector<9x64xbf16>
    %c0_68 = arith.constant 0 : index
    %c0_69 = arith.constant 0 : index
    %c0_70 = arith.constant 0 : index
    %169 = vector.load %arg14[%c0_68, %c0_69, %c0_70] : memref<2x64x256xbf16, #tpu.memory_space<vmem>>, vector<1x64x256xbf16>
    %170 = vector.shape_cast %169 : vector<1x64x256xbf16> to vector<64x256xbf16>
    %cst_71 = arith.constant dense<0.000000e+00> : vector<9x256xf32>
    %171 = tpu.matmul %168, %170, %cst_71 {dimension_numbers = #tpu.dot_dimension_numbers<[1], [0], [0], [1], [0, 0, 1, 1], [], []>} : vector<9x64xbf16>, vector<64x256xbf16>, vector<9x256xf32> -> vector<9x256xf32>
    %c0_72 = arith.constant 0 : index
    %c0_73 = arith.constant 0 : index
    %c0_74 = arith.constant 0 : index
    %172 = vector.load %arg15[%c0_72, %c0_73, %c0_74] : memref<2x1x256xf32, #tpu.memory_space<vmem>>, vector<1x1x256xf32>
    %173 = vector.shape_cast %172 : vector<1x1x256xf32> to vector<1x256xf32>
    %174 = vector.broadcast %173 : vector<1x256xf32> to vector<9x256xf32>
    %175 = arith.addf %171, %174 : vector<9x256xf32>
    %cst_75 = arith.constant 5.000000e-01 : f32
    %176 = vector.broadcast %cst_75 : f32 to vector<9x256xf32>
    %177 = arith.mulf %176, %175 : vector<9x256xf32>
    %cst_76 = arith.constant 4.471500e-02 : f32
    %178 = vector.broadcast %cst_76 : f32 to vector<9x256xf32>
    %179 = arith.mulf %178, %175 : vector<9x256xf32>
    %180 = arith.mulf %179, %175 : vector<9x256xf32>
    %181 = arith.mulf %180, %175 : vector<9x256xf32>
    %182 = arith.addf %175, %181 : vector<9x256xf32>
    %cst_77 = arith.constant 0.797884583 : f32
    %183 = vector.broadcast %cst_77 : f32 to vector<9x256xf32>
    %184 = arith.mulf %183, %182 : vector<9x256xf32>
    %185 = math.tanh %184 : vector<9x256xf32>
    %cst_78 = arith.constant 1.000000e+00 : f32
    %186 = vector.broadcast %cst_78 : f32 to vector<9x256xf32>
    %187 = arith.addf %186, %185 : vector<9x256xf32>
    %188 = arith.mulf %177, %187 : vector<9x256xf32>
    %189 = arith.truncf %188 : vector<9x256xf32> to vector<9x256xbf16>
    %c0_79 = arith.constant 0 : index
    %c0_80 = arith.constant 0 : index
    %c0_81 = arith.constant 0 : index
    %190 = vector.load %arg16[%c0_79, %c0_80, %c0_81] : memref<2x256x64xbf16, #tpu.memory_space<vmem>>, vector<1x256x64xbf16>
    %191 = vector.shape_cast %190 : vector<1x256x64xbf16> to vector<256x64xbf16>
    %cst_82 = arith.constant dense<0.000000e+00> : vector<9x64xf32>
    %192 = tpu.matmul %189, %191, %cst_82 {dimension_numbers = #tpu.dot_dimension_numbers<[1], [0], [0], [1], [0, 0, 1, 1], [], []>} : vector<9x256xbf16>, vector<256x64xbf16>, vector<9x64xf32> -> vector<9x64xf32>
    %c0_83 = arith.constant 0 : index
    %c0_84 = arith.constant 0 : index
    %c0_85 = arith.constant 0 : index
    %193 = vector.load %arg17[%c0_83, %c0_84, %c0_85] : memref<2x1x64xf32, #tpu.memory_space<vmem>>, vector<1x1x64xf32>
    %194 = vector.shape_cast %193 : vector<1x1x64xf32> to vector<1x64xf32>
    %195 = vector.broadcast %194 : vector<1x64xf32> to vector<9x64xf32>
    %196 = arith.addf %192, %195 : vector<9x64xf32>
    %197 = arith.addf %141, %196 : vector<9x64xf32>
    %c1 = arith.constant 1 : index
    %c0_86 = arith.constant 0 : index
    %c0_87 = arith.constant 0 : index
    %198 = vector.load %arg6[%c1, %c0_86, %c0_87] : memref<2x1x64xf32, #tpu.memory_space<vmem>>, vector<1x1x64xf32>
    %199 = vector.shape_cast %198 : vector<1x1x64xf32> to vector<1x64xf32>
    %c1_88 = arith.constant 1 : index
    %c0_89 = arith.constant 0 : index
    %c0_90 = arith.constant 0 : index
    %200 = vector.load %arg7[%c1_88, %c0_89, %c0_90] : memref<2x1x64xf32, #tpu.memory_space<vmem>>, vector<1x1x64xf32>
    %201 = vector.shape_cast %200 : vector<1x1x64xf32> to vector<1x64xf32>
    %cst_91 = arith.constant dense<0.000000e+00> : vector<9xf32>
    %202 = vector.multi_reduction <add>, %197, %cst_91 [1] : vector<9x64xf32> to vector<9xf32>
    %203 = vector.shape_cast %202 : vector<9xf32> to vector<9x1xf32>
    %cst_92 = arith.constant 6.400000e+01 : f32
    %204 = vector.broadcast %cst_92 : f32 to vector<9x1xf32>
    %205 = arith.divf %203, %204 : vector<9x1xf32>
    %206 = vector.broadcast %205 : vector<9x1xf32> to vector<9x64xf32>
    %207 = arith.subf %197, %206 : vector<9x64xf32>
    %208 = arith.mulf %207, %207 : vector<9x64xf32>
    %cst_93 = arith.constant dense<0.000000e+00> : vector<9xf32>
    %209 = vector.multi_reduction <add>, %208, %cst_93 [1] : vector<9x64xf32> to vector<9xf32>
    %210 = vector.shape_cast %209 : vector<9xf32> to vector<9x1xf32>
    %cst_94 = arith.constant 6.400000e+01 : f32
    %211 = vector.broadcast %cst_94 : f32 to vector<9x1xf32>
    %212 = arith.divf %210, %211 : vector<9x1xf32>
    %213 = vector.broadcast %205 : vector<9x1xf32> to vector<9x64xf32>
    %214 = arith.subf %197, %213 : vector<9x64xf32>
    %cst_95 = arith.constant 9.99999997E-7 : f32
    %215 = vector.broadcast %cst_95 : f32 to vector<9x1xf32>
    %216 = arith.addf %212, %215 : vector<9x1xf32>
    %217 = math.rsqrt %216 : vector<9x1xf32>
    %218 = vector.broadcast %217 : vector<9x1xf32> to vector<9x64xf32>
    %219 = arith.mulf %214, %218 : vector<9x64xf32>
    %220 = vector.broadcast %199 : vector<1x64xf32> to vector<9x64xf32>
    %221 = arith.mulf %219, %220 : vector<9x64xf32>
    %222 = vector.broadcast %201 : vector<1x64xf32> to vector<9x64xf32>
    %223 = arith.addf %221, %222 : vector<9x64xf32>
    %224 = arith.truncf %223 : vector<9x64xf32> to vector<9x64xbf16>
    %c1_96 = arith.constant 1 : index
    %c0_97 = arith.constant 0 : index
    %c0_98 = arith.constant 0 : index
    %225 = vector.load %arg8[%c1_96, %c0_97, %c0_98] : memref<2x64x192xbf16, #tpu.memory_space<vmem>>, vector<1x64x192xbf16>
    %226 = vector.shape_cast %225 : vector<1x64x192xbf16> to vector<64x192xbf16>
    %cst_99 = arith.constant dense<0.000000e+00> : vector<9x192xf32>
    %227 = tpu.matmul %224, %226, %cst_99 {dimension_numbers = #tpu.dot_dimension_numbers<[1], [0], [0], [1], [0, 0, 1, 1], [], []>} : vector<9x64xbf16>, vector<64x192xbf16>, vector<9x192xf32> -> vector<9x192xf32>
    %c1_100 = arith.constant 1 : index
    %c0_101 = arith.constant 0 : index
    %c0_102 = arith.constant 0 : index
    %228 = vector.load %arg9[%c1_100, %c0_101, %c0_102] : memref<2x1x192xf32, #tpu.memory_space<vmem>>, vector<1x1x192xf32>
    %229 = vector.shape_cast %228 : vector<1x1x192xf32> to vector<1x192xf32>
    %230 = vector.broadcast %229 : vector<1x192xf32> to vector<9x192xf32>
    %231 = arith.addf %227, %230 : vector<9x192xf32>
    %232 = vector.extract_strided_slice %231 {offsets = [0, 0], sizes = [9, 16], strides = [1, 1]} : vector<9x192xf32> to vector<9x16xf32>
    %cst_103 = arith.constant 2.500000e-01 : f32
    %233 = vector.broadcast %cst_103 : f32 to vector<9x16xf32>
    %234 = arith.mulf %232, %233 : vector<9x16xf32>
    %235 = vector.extract_strided_slice %231 {offsets = [0, 64], sizes = [9, 16], strides = [1, 1]} : vector<9x192xf32> to vector<9x16xf32>
    %236 = vector.extract_strided_slice %231 {offsets = [0, 128], sizes = [9, 16], strides = [1, 1]} : vector<9x192xf32> to vector<9x16xf32>
    %237 = arith.truncf %234 : vector<9x16xf32> to vector<9x16xbf16>
    %238 = arith.truncf %235 : vector<9x16xf32> to vector<9x16xbf16>
    %cst_104 = arith.constant dense<0.000000e+00> : vector<9x9xf32>
    %239 = tpu.matmul %237, %238, %cst_104 {dimension_numbers = #tpu.dot_dimension_numbers<[1], [1], [0], [0], [0, 0, 1, 0], [], []>} : vector<9x16xbf16>, vector<9x16xbf16>, vector<9x9xf32> -> vector<9x9xf32>
    %cst_105 = arith.constant dense<0xFF800000> : vector<9xf32>
    %240 = vector.multi_reduction <maximumf>, %239, %cst_105 [1] : vector<9x9xf32> to vector<9xf32>
    %241 = vector.shape_cast %240 : vector<9xf32> to vector<9x1xf32>
    %242 = vector.broadcast %241 : vector<9x1xf32> to vector<9x9xf32>
    %243 = arith.subf %239, %242 : vector<9x9xf32>
    %244 = math.exp %243 : vector<9x9xf32>
    %cst_106 = arith.constant dense<0.000000e+00> : vector<9xf32>
    %245 = vector.multi_reduction <add>, %244, %cst_106 [1] : vector<9x9xf32> to vector<9xf32>
    %246 = vector.shape_cast %245 : vector<9xf32> to vector<9x1xf32>
    %247 = tpu.reciprocal %246 {approx = true} : vector<9x1xf32> -> vector<9x1xf32>
    %248 = vector.broadcast %247 : vector<9x1xf32> to vector<9x9xf32>
    %249 = arith.mulf %244, %248 : vector<9x9xf32>
    %250 = arith.truncf %249 : vector<9x9xf32> to vector<9x9xbf16>
    %251 = arith.truncf %236 : vector<9x16xf32> to vector<9x16xbf16>
    %cst_107 = arith.constant dense<0.000000e+00> : vector<9x16xf32>
    %252 = tpu.matmul %250, %251, %cst_107 {dimension_numbers = #tpu.dot_dimension_numbers<[1], [0], [0], [1], [0, 0, 1, 1], [], []>} : vector<9x9xbf16>, vector<9x16xbf16>, vector<9x16xf32> -> vector<9x16xf32>
    %253 = vector.extract_strided_slice %231 {offsets = [0, 16], sizes = [9, 16], strides = [1, 1]} : vector<9x192xf32> to vector<9x16xf32>
    %cst_108 = arith.constant 2.500000e-01 : f32
    %254 = vector.broadcast %cst_108 : f32 to vector<9x16xf32>
    %255 = arith.mulf %253, %254 : vector<9x16xf32>
    %256 = vector.extract_strided_slice %231 {offsets = [0, 80], sizes = [9, 16], strides = [1, 1]} : vector<9x192xf32> to vector<9x16xf32>
    %257 = vector.extract_strided_slice %231 {offsets = [0, 144], sizes = [9, 16], strides = [1, 1]} : vector<9x192xf32> to vector<9x16xf32>
    %258 = arith.truncf %255 : vector<9x16xf32> to vector<9x16xbf16>
    %259 = arith.truncf %256 : vector<9x16xf32> to vector<9x16xbf16>
    %cst_109 = arith.constant dense<0.000000e+00> : vector<9x9xf32>
    %260 = tpu.matmul %258, %259, %cst_109 {dimension_numbers = #tpu.dot_dimension_numbers<[1], [1], [0], [0], [0, 0, 1, 0], [], []>} : vector<9x16xbf16>, vector<9x16xbf16>, vector<9x9xf32> -> vector<9x9xf32>
    %cst_110 = arith.constant dense<0xFF800000> : vector<9xf32>
    %261 = vector.multi_reduction <maximumf>, %260, %cst_110 [1] : vector<9x9xf32> to vector<9xf32>
    %262 = vector.shape_cast %261 : vector<9xf32> to vector<9x1xf32>
    %263 = vector.broadcast %262 : vector<9x1xf32> to vector<9x9xf32>
    %264 = arith.subf %260, %263 : vector<9x9xf32>
    %265 = math.exp %264 : vector<9x9xf32>
    %cst_111 = arith.constant dense<0.000000e+00> : vector<9xf32>
    %266 = vector.multi_reduction <add>, %265, %cst_111 [1] : vector<9x9xf32> to vector<9xf32>
    %267 = vector.shape_cast %266 : vector<9xf32> to vector<9x1xf32>
    %268 = tpu.reciprocal %267 {approx = true} : vector<9x1xf32> -> vector<9x1xf32>
    %269 = vector.broadcast %268 : vector<9x1xf32> to vector<9x9xf32>
    %270 = arith.mulf %265, %269 : vector<9x9xf32>
    %271 = arith.truncf %270 : vector<9x9xf32> to vector<9x9xbf16>
    %272 = arith.truncf %257 : vector<9x16xf32> to vector<9x16xbf16>
    %cst_112 = arith.constant dense<0.000000e+00> : vector<9x16xf32>
    %273 = tpu.matmul %271, %272, %cst_112 {dimension_numbers = #tpu.dot_dimension_numbers<[1], [0], [0], [1], [0, 0, 1, 1], [], []>} : vector<9x9xbf16>, vector<9x16xbf16>, vector<9x16xf32> -> vector<9x16xf32>
    %274 = vector.extract_strided_slice %231 {offsets = [0, 32], sizes = [9, 16], strides = [1, 1]} : vector<9x192xf32> to vector<9x16xf32>
    %cst_113 = arith.constant 2.500000e-01 : f32
    %275 = vector.broadcast %cst_113 : f32 to vector<9x16xf32>
    %276 = arith.mulf %274, %275 : vector<9x16xf32>
    %277 = vector.extract_strided_slice %231 {offsets = [0, 96], sizes = [9, 16], strides = [1, 1]} : vector<9x192xf32> to vector<9x16xf32>
    %278 = vector.extract_strided_slice %231 {offsets = [0, 160], sizes = [9, 16], strides = [1, 1]} : vector<9x192xf32> to vector<9x16xf32>
    %279 = arith.truncf %276 : vector<9x16xf32> to vector<9x16xbf16>
    %280 = arith.truncf %277 : vector<9x16xf32> to vector<9x16xbf16>
    %cst_114 = arith.constant dense<0.000000e+00> : vector<9x9xf32>
    %281 = tpu.matmul %279, %280, %cst_114 {dimension_numbers = #tpu.dot_dimension_numbers<[1], [1], [0], [0], [0, 0, 1, 0], [], []>} : vector<9x16xbf16>, vector<9x16xbf16>, vector<9x9xf32> -> vector<9x9xf32>
    %cst_115 = arith.constant dense<0xFF800000> : vector<9xf32>
    %282 = vector.multi_reduction <maximumf>, %281, %cst_115 [1] : vector<9x9xf32> to vector<9xf32>
    %283 = vector.shape_cast %282 : vector<9xf32> to vector<9x1xf32>
    %284 = vector.broadcast %283 : vector<9x1xf32> to vector<9x9xf32>
    %285 = arith.subf %281, %284 : vector<9x9xf32>
    %286 = math.exp %285 : vector<9x9xf32>
    %cst_116 = arith.constant dense<0.000000e+00> : vector<9xf32>
    %287 = vector.multi_reduction <add>, %286, %cst_116 [1] : vector<9x9xf32> to vector<9xf32>
    %288 = vector.shape_cast %287 : vector<9xf32> to vector<9x1xf32>
    %289 = tpu.reciprocal %288 {approx = true} : vector<9x1xf32> -> vector<9x1xf32>
    %290 = vector.broadcast %289 : vector<9x1xf32> to vector<9x9xf32>
    %291 = arith.mulf %286, %290 : vector<9x9xf32>
    %292 = arith.truncf %291 : vector<9x9xf32> to vector<9x9xbf16>
    %293 = arith.truncf %278 : vector<9x16xf32> to vector<9x16xbf16>
    %cst_117 = arith.constant dense<0.000000e+00> : vector<9x16xf32>
    %294 = tpu.matmul %292, %293, %cst_117 {dimension_numbers = #tpu.dot_dimension_numbers<[1], [0], [0], [1], [0, 0, 1, 1], [], []>} : vector<9x9xbf16>, vector<9x16xbf16>, vector<9x16xf32> -> vector<9x16xf32>
    %295 = vector.extract_strided_slice %231 {offsets = [0, 48], sizes = [9, 16], strides = [1, 1]} : vector<9x192xf32> to vector<9x16xf32>
    %cst_118 = arith.constant 2.500000e-01 : f32
    %296 = vector.broadcast %cst_118 : f32 to vector<9x16xf32>
    %297 = arith.mulf %295, %296 : vector<9x16xf32>
    %298 = vector.extract_strided_slice %231 {offsets = [0, 112], sizes = [9, 16], strides = [1, 1]} : vector<9x192xf32> to vector<9x16xf32>
    %299 = vector.extract_strided_slice %231 {offsets = [0, 176], sizes = [9, 16], strides = [1, 1]} : vector<9x192xf32> to vector<9x16xf32>
    %300 = arith.truncf %297 : vector<9x16xf32> to vector<9x16xbf16>
    %301 = arith.truncf %298 : vector<9x16xf32> to vector<9x16xbf16>
    %cst_119 = arith.constant dense<0.000000e+00> : vector<9x9xf32>
    %302 = tpu.matmul %300, %301, %cst_119 {dimension_numbers = #tpu.dot_dimension_numbers<[1], [1], [0], [0], [0, 0, 1, 0], [], []>} : vector<9x16xbf16>, vector<9x16xbf16>, vector<9x9xf32> -> vector<9x9xf32>
    %cst_120 = arith.constant dense<0xFF800000> : vector<9xf32>
    %303 = vector.multi_reduction <maximumf>, %302, %cst_120 [1] : vector<9x9xf32> to vector<9xf32>
    %304 = vector.shape_cast %303 : vector<9xf32> to vector<9x1xf32>
    %305 = vector.broadcast %304 : vector<9x1xf32> to vector<9x9xf32>
    %306 = arith.subf %302, %305 : vector<9x9xf32>
    %307 = math.exp %306 : vector<9x9xf32>
    %cst_121 = arith.constant dense<0.000000e+00> : vector<9xf32>
    %308 = vector.multi_reduction <add>, %307, %cst_121 [1] : vector<9x9xf32> to vector<9xf32>
    %309 = vector.shape_cast %308 : vector<9xf32> to vector<9x1xf32>
    %310 = tpu.reciprocal %309 {approx = true} : vector<9x1xf32> -> vector<9x1xf32>
    %311 = vector.broadcast %310 : vector<9x1xf32> to vector<9x9xf32>
    %312 = arith.mulf %307, %311 : vector<9x9xf32>
    %313 = arith.truncf %312 : vector<9x9xf32> to vector<9x9xbf16>
    %314 = arith.truncf %299 : vector<9x16xf32> to vector<9x16xbf16>
    %cst_122 = arith.constant dense<0.000000e+00> : vector<9x16xf32>
    %315 = tpu.matmul %313, %314, %cst_122 {dimension_numbers = #tpu.dot_dimension_numbers<[1], [0], [0], [1], [0, 0, 1, 1], [], []>} : vector<9x9xbf16>, vector<9x16xbf16>, vector<9x16xf32> -> vector<9x16xf32>
    %316 = tpu.concatenate %252, %273, %294, %315 in 1 : vector<9x16xf32>, vector<9x16xf32>, vector<9x16xf32>, vector<9x16xf32> -> vector<9x64xf32>
    %317 = arith.truncf %316 : vector<9x64xf32> to vector<9x64xbf16>
    %c1_123 = arith.constant 1 : index
    %c0_124 = arith.constant 0 : index
    %c0_125 = arith.constant 0 : index
    %318 = vector.load %arg10[%c1_123, %c0_124, %c0_125] : memref<2x64x64xbf16, #tpu.memory_space<vmem>>, vector<1x64x64xbf16>
    %319 = vector.shape_cast %318 : vector<1x64x64xbf16> to vector<64x64xbf16>
    %cst_126 = arith.constant dense<0.000000e+00> : vector<9x64xf32>
    %320 = tpu.matmul %317, %319, %cst_126 {dimension_numbers = #tpu.dot_dimension_numbers<[1], [0], [0], [1], [0, 0, 1, 1], [], []>} : vector<9x64xbf16>, vector<64x64xbf16>, vector<9x64xf32> -> vector<9x64xf32>
    %c1_127 = arith.constant 1 : index
    %c0_128 = arith.constant 0 : index
    %c0_129 = arith.constant 0 : index
    %321 = vector.load %arg11[%c1_127, %c0_128, %c0_129] : memref<2x1x64xf32, #tpu.memory_space<vmem>>, vector<1x1x64xf32>
    %322 = vector.shape_cast %321 : vector<1x1x64xf32> to vector<1x64xf32>
    %323 = vector.broadcast %322 : vector<1x64xf32> to vector<9x64xf32>
    %324 = arith.addf %320, %323 : vector<9x64xf32>
    %325 = arith.addf %197, %324 : vector<9x64xf32>
    %c1_130 = arith.constant 1 : index
    %c0_131 = arith.constant 0 : index
    %c0_132 = arith.constant 0 : index
    %326 = vector.load %arg12[%c1_130, %c0_131, %c0_132] : memref<2x1x64xf32, #tpu.memory_space<vmem>>, vector<1x1x64xf32>
    %327 = vector.shape_cast %326 : vector<1x1x64xf32> to vector<1x64xf32>
    %c1_133 = arith.constant 1 : index
    %c0_134 = arith.constant 0 : index
    %c0_135 = arith.constant 0 : index
    %328 = vector.load %arg13[%c1_133, %c0_134, %c0_135] : memref<2x1x64xf32, #tpu.memory_space<vmem>>, vector<1x1x64xf32>
    %329 = vector.shape_cast %328 : vector<1x1x64xf32> to vector<1x64xf32>
    %cst_136 = arith.constant dense<0.000000e+00> : vector<9xf32>
    %330 = vector.multi_reduction <add>, %325, %cst_136 [1] : vector<9x64xf32> to vector<9xf32>
    %331 = vector.shape_cast %330 : vector<9xf32> to vector<9x1xf32>
    %cst_137 = arith.constant 6.400000e+01 : f32
    %332 = vector.broadcast %cst_137 : f32 to vector<9x1xf32>
    %333 = arith.divf %331, %332 : vector<9x1xf32>
    %334 = vector.broadcast %333 : vector<9x1xf32> to vector<9x64xf32>
    %335 = arith.subf %325, %334 : vector<9x64xf32>
    %336 = arith.mulf %335, %335 : vector<9x64xf32>
    %cst_138 = arith.constant dense<0.000000e+00> : vector<9xf32>
    %337 = vector.multi_reduction <add>, %336, %cst_138 [1] : vector<9x64xf32> to vector<9xf32>
    %338 = vector.shape_cast %337 : vector<9xf32> to vector<9x1xf32>
    %cst_139 = arith.constant 6.400000e+01 : f32
    %339 = vector.broadcast %cst_139 : f32 to vector<9x1xf32>
    %340 = arith.divf %338, %339 : vector<9x1xf32>
    %341 = vector.broadcast %333 : vector<9x1xf32> to vector<9x64xf32>
    %342 = arith.subf %325, %341 : vector<9x64xf32>
    %cst_140 = arith.constant 9.99999997E-7 : f32
    %343 = vector.broadcast %cst_140 : f32 to vector<9x1xf32>
    %344 = arith.addf %340, %343 : vector<9x1xf32>
    %345 = math.rsqrt %344 : vector<9x1xf32>
    %346 = vector.broadcast %345 : vector<9x1xf32> to vector<9x64xf32>
    %347 = arith.mulf %342, %346 : vector<9x64xf32>
    %348 = vector.broadcast %327 : vector<1x64xf32> to vector<9x64xf32>
    %349 = arith.mulf %347, %348 : vector<9x64xf32>
    %350 = vector.broadcast %329 : vector<1x64xf32> to vector<9x64xf32>
    %351 = arith.addf %349, %350 : vector<9x64xf32>
    %352 = arith.truncf %351 : vector<9x64xf32> to vector<9x64xbf16>
    %c1_141 = arith.constant 1 : index
    %c0_142 = arith.constant 0 : index
    %c0_143 = arith.constant 0 : index
    %353 = vector.load %arg14[%c1_141, %c0_142, %c0_143] : memref<2x64x256xbf16, #tpu.memory_space<vmem>>, vector<1x64x256xbf16>
    %354 = vector.shape_cast %353 : vector<1x64x256xbf16> to vector<64x256xbf16>
    %cst_144 = arith.constant dense<0.000000e+00> : vector<9x256xf32>
    %355 = tpu.matmul %352, %354, %cst_144 {dimension_numbers = #tpu.dot_dimension_numbers<[1], [0], [0], [1], [0, 0, 1, 1], [], []>} : vector<9x64xbf16>, vector<64x256xbf16>, vector<9x256xf32> -> vector<9x256xf32>
    %c1_145 = arith.constant 1 : index
    %c0_146 = arith.constant 0 : index
    %c0_147 = arith.constant 0 : index
    %356 = vector.load %arg15[%c1_145, %c0_146, %c0_147] : memref<2x1x256xf32, #tpu.memory_space<vmem>>, vector<1x1x256xf32>
    %357 = vector.shape_cast %356 : vector<1x1x256xf32> to vector<1x256xf32>
    %358 = vector.broadcast %357 : vector<1x256xf32> to vector<9x256xf32>
    %359 = arith.addf %355, %358 : vector<9x256xf32>
    %cst_148 = arith.constant 5.000000e-01 : f32
    %360 = vector.broadcast %cst_148 : f32 to vector<9x256xf32>
    %361 = arith.mulf %360, %359 : vector<9x256xf32>
    %cst_149 = arith.constant 4.471500e-02 : f32
    %362 = vector.broadcast %cst_149 : f32 to vector<9x256xf32>
    %363 = arith.mulf %362, %359 : vector<9x256xf32>
    %364 = arith.mulf %363, %359 : vector<9x256xf32>
    %365 = arith.mulf %364, %359 : vector<9x256xf32>
    %366 = arith.addf %359, %365 : vector<9x256xf32>
    %cst_150 = arith.constant 0.797884583 : f32
    %367 = vector.broadcast %cst_150 : f32 to vector<9x256xf32>
    %368 = arith.mulf %367, %366 : vector<9x256xf32>
    %369 = math.tanh %368 : vector<9x256xf32>
    %cst_151 = arith.constant 1.000000e+00 : f32
    %370 = vector.broadcast %cst_151 : f32 to vector<9x256xf32>
    %371 = arith.addf %370, %369 : vector<9x256xf32>
    %372 = arith.mulf %361, %371 : vector<9x256xf32>
    %373 = arith.truncf %372 : vector<9x256xf32> to vector<9x256xbf16>
    %c1_152 = arith.constant 1 : index
    %c0_153 = arith.constant 0 : index
    %c0_154 = arith.constant 0 : index
    %374 = vector.load %arg16[%c1_152, %c0_153, %c0_154] : memref<2x256x64xbf16, #tpu.memory_space<vmem>>, vector<1x256x64xbf16>
    %375 = vector.shape_cast %374 : vector<1x256x64xbf16> to vector<256x64xbf16>
    %cst_155 = arith.constant dense<0.000000e+00> : vector<9x64xf32>
    %376 = tpu.matmul %373, %375, %cst_155 {dimension_numbers = #tpu.dot_dimension_numbers<[1], [0], [0], [1], [0, 0, 1, 1], [], []>} : vector<9x256xbf16>, vector<256x64xbf16>, vector<9x64xf32> -> vector<9x64xf32>
    %c1_156 = arith.constant 1 : index
    %c0_157 = arith.constant 0 : index
    %c0_158 = arith.constant 0 : index
    %377 = vector.load %arg17[%c1_156, %c0_157, %c0_158] : memref<2x1x64xf32, #tpu.memory_space<vmem>>, vector<1x1x64xf32>
    %378 = vector.shape_cast %377 : vector<1x1x64xf32> to vector<1x64xf32>
    %379 = vector.broadcast %378 : vector<1x64xf32> to vector<9x64xf32>
    %380 = arith.addf %376, %379 : vector<9x64xf32>
    %381 = arith.addf %325, %380 : vector<9x64xf32>
    %c0_159 = arith.constant 0 : index
    %c0_160 = arith.constant 0 : index
    %382 = vector.load %arg18[%c0_159, %c0_160] : memref<1x64xf32, #tpu.memory_space<vmem>>, vector<1x64xf32>
    %c0_161 = arith.constant 0 : index
    %c0_162 = arith.constant 0 : index
    %383 = vector.load %arg19[%c0_161, %c0_162] : memref<1x64xf32, #tpu.memory_space<vmem>>, vector<1x64xf32>
    %cst_163 = arith.constant dense<0.000000e+00> : vector<9xf32>
    %384 = vector.multi_reduction <add>, %381, %cst_163 [1] : vector<9x64xf32> to vector<9xf32>
    %385 = vector.shape_cast %384 : vector<9xf32> to vector<9x1xf32>
    %cst_164 = arith.constant 6.400000e+01 : f32
    %386 = vector.broadcast %cst_164 : f32 to vector<9x1xf32>
    %387 = arith.divf %385, %386 : vector<9x1xf32>
    %388 = vector.broadcast %387 : vector<9x1xf32> to vector<9x64xf32>
    %389 = arith.subf %381, %388 : vector<9x64xf32>
    %390 = arith.mulf %389, %389 : vector<9x64xf32>
    %cst_165 = arith.constant dense<0.000000e+00> : vector<9xf32>
    %391 = vector.multi_reduction <add>, %390, %cst_165 [1] : vector<9x64xf32> to vector<9xf32>
    %392 = vector.shape_cast %391 : vector<9xf32> to vector<9x1xf32>
    %cst_166 = arith.constant 6.400000e+01 : f32
    %393 = vector.broadcast %cst_166 : f32 to vector<9x1xf32>
    %394 = arith.divf %392, %393 : vector<9x1xf32>
    %395 = vector.broadcast %387 : vector<9x1xf32> to vector<9x64xf32>
    %396 = arith.subf %381, %395 : vector<9x64xf32>
    %cst_167 = arith.constant 9.99999997E-7 : f32
    %397 = vector.broadcast %cst_167 : f32 to vector<9x1xf32>
    %398 = arith.addf %394, %397 : vector<9x1xf32>
    %399 = math.rsqrt %398 : vector<9x1xf32>
    %400 = vector.broadcast %399 : vector<9x1xf32> to vector<9x64xf32>
    %401 = arith.mulf %396, %400 : vector<9x64xf32>
    %402 = vector.broadcast %382 : vector<1x64xf32> to vector<9x64xf32>
    %403 = arith.mulf %401, %402 : vector<9x64xf32>
    %404 = vector.broadcast %383 : vector<1x64xf32> to vector<9x64xf32>
    %405 = arith.addf %403, %404 : vector<9x64xf32>
    %406 = vector.extract_strided_slice %405 {offsets = [1, 0], sizes = [8, 64], strides = [1, 1]} : vector<9x64xf32> to vector<8x64xf32>
    %407 = vector.extract_strided_slice %406 {offsets = [0, 0], sizes = [4, 64], strides = [1, 1]} : vector<8x64xf32> to vector<4x64xf32>
    %408 = vector.extract_strided_slice %406 {offsets = [4, 0], sizes = [4, 64], strides = [1, 1]} : vector<8x64xf32> to vector<4x64xf32>
    %409 = tpu.concatenate %407, %408 in 1 : vector<4x64xf32>, vector<4x64xf32> -> vector<4x128xf32>
    %c0_168 = arith.constant 0 : index
    %c0_169 = arith.constant 0 : index
    %c0_170 = arith.constant 0 : index
    %410 = vector.load %arg20[%c0_168, %c0_169, %c0_170] : memref<1x4x128xf32, #tpu.memory_space<vmem>>, vector<1x4x128xf32>
    %411 = vector.shape_cast %410 : vector<1x4x128xf32> to vector<4x128xf32>
    %412 = vector.shape_cast %409 : vector<4x128xf32> to vector<1x4x128xf32>
    tpu.vector_store %arg20[%c0_168, %c0_169, %c0_170], %412 {strides = array<i32>} : memref<1x4x128xf32, #tpu.memory_space<vmem>>, vector<1x4x128xf32>,
    %cst_171 = arith.constant dense<0.000000e+00> : vector<128xf32>
    %413 = vector.multi_reduction <add>, %409, %cst_171 [0] : vector<4x128xf32> to vector<128xf32>
    %414 = vector.shape_cast %413 : vector<128xf32> to vector<1x128xf32>
    %c0_172 = arith.constant 0 : index
    %c0_173 = arith.constant 0 : index
    %c0_174 = arith.constant 0 : index
    %415 = vector.load %arg21[%c0_172, %c0_173, %c0_174] : memref<1x1x128xf32, #tpu.memory_space<vmem>>, vector<1x1x128xf32>
    %416 = vector.shape_cast %415 : vector<1x1x128xf32> to vector<1x128xf32>
    %417 = vector.shape_cast %414 : vector<1x128xf32> to vector<1x1x128xf32>
    tpu.vector_store %arg21[%c0_172, %c0_173, %c0_174], %417 {strides = array<i32>} : memref<1x1x128xf32, #tpu.memory_space<vmem>>, vector<1x1x128xf32>,
    return
  }
  func.func @transform_0(%arg0: i32) -> (i32, i32, i32) {
    %c0_i32 = arith.constant 0 : i32
    %c0_i32_0 = arith.constant 0 : i32
    %c0_i32_1 = arith.constant 0 : i32
    return %arg0, %c0_i32, %c0_i32_0 : i32, i32, i32
  }
  func.func @transform_1(%arg0: i32) -> (i32, i32, i32) {
    %c0_i32 = arith.constant 0 : i32
    %c0_i32_0 = arith.constant 0 : i32
    %c0_i32_1 = arith.constant 0 : i32
    %c0_i32_2 = arith.constant 0 : i32
    return %c0_i32, %c0_i32_0, %c0_i32_1 : i32, i32, i32
  }
  func.func @transform_2(%arg0: i32) -> (i32, i32, i32) {
    %c0_i32 = arith.constant 0 : i32
    %c0_i32_0 = arith.constant 0 : i32
    %c0_i32_1 = arith.constant 0 : i32
    %c0_i32_2 = arith.constant 0 : i32
    return %c0_i32, %c0_i32_0, %c0_i32_1 : i32, i32, i32
  }
  func.func @transform_3(%arg0: i32) -> (i32, i32) {
    %c0_i32 = arith.constant 0 : i32
    %c0_i32_0 = arith.constant 0 : i32
    %c0_i32_1 = arith.constant 0 : i32
    return %c0_i32, %c0_i32_0 : i32, i32
  }
  func.func @transform_4(%arg0: i32) -> (i32, i32) {
    %c0_i32 = arith.constant 0 : i32
    %c0_i32_0 = arith.constant 0 : i32
    %c0_i32_1 = arith.constant 0 : i32
    return %c0_i32, %c0_i32_0 : i32, i32
  }
  func.func @transform_5(%arg0: i32) -> (i32, i32, i32) {
    %c0_i32 = arith.constant 0 : i32
    %c0_i32_0 = arith.constant 0 : i32
    %c0_i32_1 = arith.constant 0 : i32
    %c0_i32_2 = arith.constant 0 : i32
    return %c0_i32, %c0_i32_0, %c0_i32_1 : i32, i32, i32
  }
  func.func @transform_6(%arg0: i32) -> (i32, i32, i32) {
    %c0_i32 = arith.constant 0 : i32
    %c0_i32_0 = arith.constant 0 : i32
    %c0_i32_1 = arith.constant 0 : i32
    %c0_i32_2 = arith.constant 0 : i32
    return %c0_i32, %c0_i32_0, %c0_i32_1 : i32, i32, i32
  }
  func.func @transform_7(%arg0: i32) -> (i32, i32, i32) {
    %c0_i32 = arith.constant 0 : i32
    %c0_i32_0 = arith.constant 0 : i32
    %c0_i32_1 = arith.constant 0 : i32
    %c0_i32_2 = arith.constant 0 : i32
    return %c0_i32, %c0_i32_0, %c0_i32_1 : i32, i32, i32
  }
  func.func @transform_8(%arg0: i32) -> (i32, i32, i32) {
    %c0_i32 = arith.constant 0 : i32
    %c0_i32_0 = arith.constant 0 : i32
    %c0_i32_1 = arith.constant 0 : i32
    %c0_i32_2 = arith.constant 0 : i32
    return %c0_i32, %c0_i32_0, %c0_i32_1 : i32, i32, i32
  }
  func.func @transform_9(%arg0: i32) -> (i32, i32, i32) {
    %c0_i32 = arith.constant 0 : i32
    %c0_i32_0 = arith.constant 0 : i32
    %c0_i32_1 = arith.constant 0 : i32
    %c0_i32_2 = arith.constant 0 : i32
    return %c0_i32, %c0_i32_0, %c0_i32_1 : i32, i32, i32
  }
  func.func @transform_10(%arg0: i32) -> (i32, i32, i32) {
    %c0_i32 = arith.constant 0 : i32
    %c0_i32_0 = arith.constant 0 : i32
    %c0_i32_1 = arith.constant 0 : i32
    %c0_i32_2 = arith.constant 0 : i32
    return %c0_i32, %c0_i32_0, %c0_i32_1 : i32, i32, i32
  }
  func.func @transform_11(%arg0: i32) -> (i32, i32, i32) {
    %c0_i32 = arith.constant 0 : i32
    %c0_i32_0 = arith.constant 0 : i32
    %c0_i32_1 = arith.constant 0 : i32
    %c0_i32_2 = arith.constant 0 : i32
    return %c0_i32, %c0_i32_0, %c0_i32_1 : i32, i32, i32
  }
  func.func @transform_12(%arg0: i32) -> (i32, i32, i32) {
    %c0_i32 = arith.constant 0 : i32
    %c0_i32_0 = arith.constant 0 : i32
    %c0_i32_1 = arith.constant 0 : i32
    %c0_i32_2 = arith.constant 0 : i32
    return %c0_i32, %c0_i32_0, %c0_i32_1 : i32, i32, i32
  }
  func.func @transform_13(%arg0: i32) -> (i32, i32, i32) {
    %c0_i32 = arith.constant 0 : i32
    %c0_i32_0 = arith.constant 0 : i32
    %c0_i32_1 = arith.constant 0 : i32
    %c0_i32_2 = arith.constant 0 : i32
    return %c0_i32, %c0_i32_0, %c0_i32_1 : i32, i32, i32
  }
  func.func @transform_14(%arg0: i32) -> (i32, i32, i32) {
    %c0_i32 = arith.constant 0 : i32
    %c0_i32_0 = arith.constant 0 : i32
    %c0_i32_1 = arith.constant 0 : i32
    %c0_i32_2 = arith.constant 0 : i32
    return %c0_i32, %c0_i32_0, %c0_i32_1 : i32, i32, i32
  }
  func.func @transform_15(%arg0: i32) -> (i32, i32, i32) {
    %c0_i32 = arith.constant 0 : i32
    %c0_i32_0 = arith.constant 0 : i32
    %c0_i32_1 = arith.constant 0 : i32
    %c0_i32_2 = arith.constant 0 : i32
    return %c0_i32, %c0_i32_0, %c0_i32_1 : i32, i32, i32
  }
  func.func @transform_16(%arg0: i32) -> (i32, i32, i32) {
    %c0_i32 = arith.constant 0 : i32
    %c0_i32_0 = arith.constant 0 : i32
    %c0_i32_1 = arith.constant 0 : i32
    %c0_i32_2 = arith.constant 0 : i32
    return %c0_i32, %c0_i32_0, %c0_i32_1 : i32, i32, i32
  }
  func.func @transform_17(%arg0: i32) -> (i32, i32) {
    %c0_i32 = arith.constant 0 : i32
    %c0_i32_0 = arith.constant 0 : i32
    %c0_i32_1 = arith.constant 0 : i32
    return %c0_i32, %c0_i32_0 : i32, i32
  }
  func.func @transform_18(%arg0: i32) -> (i32, i32) {
    %c0_i32 = arith.constant 0 : i32
    %c0_i32_0 = arith.constant 0 : i32
    %c0_i32_1 = arith.constant 0 : i32
    return %c0_i32, %c0_i32_0 : i32, i32
  }
  func.func @transform_19(%arg0: i32) -> (i32, i32, i32) {
    %c0_i32 = arith.constant 0 : i32
    %c0_i32_0 = arith.constant 0 : i32
    %c0_i32_1 = arith.constant 0 : i32
    return %arg0, %c0_i32, %c0_i32_0 : i32, i32, i32
  }
  func.func @transform_20(%arg0: i32) -> (i32, i32, i32) {
    %c0_i32 = arith.constant 0 : i32
    %c0_i32_0 = arith.constant 0 : i32
    %c0_i32_1 = arith.constant 0 : i32
    return %arg0, %c0_i32, %c0_i32_0 : i32, i32, i32
  }
}

module attributes {stable_mosaic.version = 11 : i64} {
  func.func @encoder_kernel(%arg0: i32, %arg1: memref<1x4x64xf32, #tpu.memory_space<vmem>>, %arg2: memref<1x1x64xf32, #tpu.memory_space<vmem>>, %arg3: memref<1x4x64xf32, #tpu.memory_space<vmem>>, %arg4: memref<64x64xbf16, #tpu.memory_space<vmem>>, %arg5: memref<1x64xf32, #tpu.memory_space<vmem>>, %arg6: memref<2x1x64xf32, #tpu.memory_space<vmem>>, %arg7: memref<2x1x64xf32, #tpu.memory_space<vmem>>, %arg8: memref<2x64x192xbf16, #tpu.memory_space<vmem>>, %arg9: memref<2x1x192xf32, #tpu.memory_space<vmem>>, %arg10: memref<2x64x64xbf16, #tpu.memory_space<vmem>>, %arg11: memref<2x1x64xf32, #tpu.memory_space<vmem>>, %arg12: memref<2x1x64xf32, #tpu.memory_space<vmem>>, %arg13: memref<2x1x64xf32, #tpu.memory_space<vmem>>, %arg14: memref<2x64x256xbf16, #tpu.memory_space<vmem>>, %arg15: memref<2x1x256xf32, #tpu.memory_space<vmem>>, %arg16: memref<2x256x64xbf16, #tpu.memory_space<vmem>>, %arg17: memref<2x1x64xf32, #tpu.memory_space<vmem>>, %arg18: memref<1x64xf32, #tpu.memory_space<vmem>>, %arg19: memref<1x64xf32, #tpu.memory_space<vmem>>, %arg20: memref<1x2x128xf32, #tpu.memory_space<vmem>>, %arg21: memref<1x1x128xf32, #tpu.memory_space<vmem>>) attributes {dimension_semantics = [#tpu.dimension_semantics<parallel>], iteration_bounds = array<i64: 2>, scalar_prefetch = 0 : i64, scratch_operands = 0 : i64, tpu.core_type = #tpu.core_type<tc>, window_params = [{transform_indices = @transform_0, window_bounds = array<i64: 1, 4, 64>}, {pipeline_mode = #tpu.pipeline_mode<synchronous>, transform_indices = @transform_1, window_bounds = array<i64: 1, 1, 64>}, {pipeline_mode = #tpu.pipeline_mode<synchronous>, transform_indices = @transform_2, window_bounds = array<i64: 1, 4, 64>}, {pipeline_mode = #tpu.pipeline_mode<synchronous>, transform_indices = @transform_3, window_bounds = array<i64: 64, 64>}, {pipeline_mode = #tpu.pipeline_mode<synchronous>, transform_indices = @transform_4, window_bounds = array<i64: 1, 64>}, {pipeline_mode = #tpu.pipeline_mode<synchronous>, transform_indices = @transform_5, window_bounds = array<i64: 2, 1, 64>}, {pipeline_mode = #tpu.pipeline_mode<synchronous>, transform_indices = @transform_6, window_bounds = array<i64: 2, 1, 64>}, {pipeline_mode = #tpu.pipeline_mode<synchronous>, transform_indices = @transform_7, window_bounds = array<i64: 2, 64, 192>}, {pipeline_mode = #tpu.pipeline_mode<synchronous>, transform_indices = @transform_8, window_bounds = array<i64: 2, 1, 192>}, {pipeline_mode = #tpu.pipeline_mode<synchronous>, transform_indices = @transform_9, window_bounds = array<i64: 2, 64, 64>}, {pipeline_mode = #tpu.pipeline_mode<synchronous>, transform_indices = @transform_10, window_bounds = array<i64: 2, 1, 64>}, {pipeline_mode = #tpu.pipeline_mode<synchronous>, transform_indices = @transform_11, window_bounds = array<i64: 2, 1, 64>}, {pipeline_mode = #tpu.pipeline_mode<synchronous>, transform_indices = @transform_12, window_bounds = array<i64: 2, 1, 64>}, {pipeline_mode = #tpu.pipeline_mode<synchronous>, transform_indices = @transform_13, window_bounds = array<i64: 2, 64, 256>}, {pipeline_mode = #tpu.pipeline_mode<synchronous>, transform_indices = @transform_14, window_bounds = array<i64: 2, 1, 256>}, {pipeline_mode = #tpu.pipeline_mode<synchronous>, transform_indices = @transform_15, window_bounds = array<i64: 2, 256, 64>}, {pipeline_mode = #tpu.pipeline_mode<synchronous>, transform_indices = @transform_16, window_bounds = array<i64: 2, 1, 64>}, {pipeline_mode = #tpu.pipeline_mode<synchronous>, transform_indices = @transform_17, window_bounds = array<i64: 1, 64>}, {pipeline_mode = #tpu.pipeline_mode<synchronous>, transform_indices = @transform_18, window_bounds = array<i64: 1, 64>}, {transform_indices = @transform_19, window_bounds = array<i64: 1, 2, 128>}, {transform_indices = @transform_20, window_bounds = array<i64: 1, 1, 128>}]} {
    %c0 = arith.constant 0 : index
    %c0_0 = arith.constant 0 : index
    %c0_1 = arith.constant 0 : index
    %0 = vector.load %arg1[%c0, %c0_0, %c0_1] : memref<1x4x64xf32, #tpu.memory_space<vmem>>, vector<1x4x64xf32>
    %1 = vector.shape_cast %0 : vector<1x4x64xf32> to vector<4x64xf32>
    %2 = arith.truncf %1 : vector<4x64xf32> to vector<4x64xbf16>
    %c0_2 = arith.constant 0 : index
    %c0_3 = arith.constant 0 : index
    %3 = vector.load %arg4[%c0_2, %c0_3] : memref<64x64xbf16, #tpu.memory_space<vmem>>, vector<64x64xbf16>
    %cst = arith.constant dense<0.000000e+00> : vector<4x64xf32>
    %4 = tpu.matmul %2, %3, %cst {dimension_numbers = #tpu.dot_dimension_numbers<[1], [0], [0], [1], [0, 0, 1, 1], [], []>} : vector<4x64xbf16>, vector<64x64xbf16>, vector<4x64xf32> -> vector<4x64xf32>
    %c0_4 = arith.constant 0 : index
    %c0_5 = arith.constant 0 : index
    %5 = vector.load %arg5[%c0_4, %c0_5] : memref<1x64xf32, #tpu.memory_space<vmem>>, vector<1x64xf32>
    %6 = vector.broadcast %5 : vector<1x64xf32> to vector<4x64xf32>
    %7 = arith.addf %4, %6 : vector<4x64xf32>
    %c0_6 = arith.constant 0 : index
    %c0_7 = arith.constant 0 : index
    %c0_8 = arith.constant 0 : index
    %8 = vector.load %arg3[%c0_6, %c0_7, %c0_8] : memref<1x4x64xf32, #tpu.memory_space<vmem>>, vector<1x4x64xf32>
    %9 = vector.shape_cast %8 : vector<1x4x64xf32> to vector<4x64xf32>
    %10 = arith.addf %7, %9 : vector<4x64xf32>
    %c0_9 = arith.constant 0 : index
    %c0_10 = arith.constant 0 : index
    %c0_11 = arith.constant 0 : index
    %11 = vector.load %arg2[%c0_9, %c0_10, %c0_11] : memref<1x1x64xf32, #tpu.memory_space<vmem>>, vector<1x1x64xf32>
    %12 = vector.shape_cast %11 : vector<1x1x64xf32> to vector<1x64xf32>
    %13 = tpu.concatenate %12, %10 in 0 : vector<1x64xf32>, vector<4x64xf32> -> vector<5x64xf32>
    %c0_12 = arith.constant 0 : index
    %c0_13 = arith.constant 0 : index
    %c0_14 = arith.constant 0 : index
    %14 = vector.load %arg6[%c0_12, %c0_13, %c0_14] : memref<2x1x64xf32, #tpu.memory_space<vmem>>, vector<1x1x64xf32>
    %15 = vector.shape_cast %14 : vector<1x1x64xf32> to vector<1x64xf32>
    %c0_15 = arith.constant 0 : index
    %c0_16 = arith.constant 0 : index
    %c0_17 = arith.constant 0 : index
    %16 = vector.load %arg7[%c0_15, %c0_16, %c0_17] : memref<2x1x64xf32, #tpu.memory_space<vmem>>, vector<1x1x64xf32>
    %17 = vector.shape_cast %16 : vector<1x1x64xf32> to vector<1x64xf32>
    %cst_18 = arith.constant dense<0.000000e+00> : vector<5xf32>
    %18 = vector.multi_reduction <add>, %13, %cst_18 [1] : vector<5x64xf32> to vector<5xf32>
    %19 = vector.shape_cast %18 : vector<5xf32> to vector<5x1xf32>
    %cst_19 = arith.constant 6.400000e+01 : f32
    %20 = vector.broadcast %cst_19 : f32 to vector<5x1xf32>
    %21 = arith.divf %19, %20 : vector<5x1xf32>
    %22 = vector.broadcast %21 : vector<5x1xf32> to vector<5x64xf32>
    %23 = arith.subf %13, %22 : vector<5x64xf32>
    %24 = arith.mulf %23, %23 : vector<5x64xf32>
    %cst_20 = arith.constant dense<0.000000e+00> : vector<5xf32>
    %25 = vector.multi_reduction <add>, %24, %cst_20 [1] : vector<5x64xf32> to vector<5xf32>
    %26 = vector.shape_cast %25 : vector<5xf32> to vector<5x1xf32>
    %cst_21 = arith.constant 6.400000e+01 : f32
    %27 = vector.broadcast %cst_21 : f32 to vector<5x1xf32>
    %28 = arith.divf %26, %27 : vector<5x1xf32>
    %29 = vector.broadcast %21 : vector<5x1xf32> to vector<5x64xf32>
    %30 = arith.subf %13, %29 : vector<5x64xf32>
    %cst_22 = arith.constant 9.99999997E-7 : f32
    %31 = vector.broadcast %cst_22 : f32 to vector<5x1xf32>
    %32 = arith.addf %28, %31 : vector<5x1xf32>
    %33 = math.rsqrt %32 : vector<5x1xf32>
    %34 = vector.broadcast %33 : vector<5x1xf32> to vector<5x64xf32>
    %35 = arith.mulf %30, %34 : vector<5x64xf32>
    %36 = vector.broadcast %15 : vector<1x64xf32> to vector<5x64xf32>
    %37 = arith.mulf %35, %36 : vector<5x64xf32>
    %38 = vector.broadcast %17 : vector<1x64xf32> to vector<5x64xf32>
    %39 = arith.addf %37, %38 : vector<5x64xf32>
    %40 = arith.truncf %39 : vector<5x64xf32> to vector<5x64xbf16>
    %c0_23 = arith.constant 0 : index
    %c0_24 = arith.constant 0 : index
    %c0_25 = arith.constant 0 : index
    %41 = vector.load %arg8[%c0_23, %c0_24, %c0_25] : memref<2x64x192xbf16, #tpu.memory_space<vmem>>, vector<1x64x192xbf16>
    %42 = vector.shape_cast %41 : vector<1x64x192xbf16> to vector<64x192xbf16>
    %cst_26 = arith.constant dense<0.000000e+00> : vector<5x192xf32>
    %43 = tpu.matmul %40, %42, %cst_26 {dimension_numbers = #tpu.dot_dimension_numbers<[1], [0], [0], [1], [0, 0, 1, 1], [], []>} : vector<5x64xbf16>, vector<64x192xbf16>, vector<5x192xf32> -> vector<5x192xf32>
    %c0_27 = arith.constant 0 : index
    %c0_28 = arith.constant 0 : index
    %c0_29 = arith.constant 0 : index
    %44 = vector.load %arg9[%c0_27, %c0_28, %c0_29] : memref<2x1x192xf32, #tpu.memory_space<vmem>>, vector<1x1x192xf32>
    %45 = vector.shape_cast %44 : vector<1x1x192xf32> to vector<1x192xf32>
    %46 = vector.broadcast %45 : vector<1x192xf32> to vector<5x192xf32>
    %47 = arith.addf %43, %46 : vector<5x192xf32>
    %48 = vector.extract_strided_slice %47 {offsets = [0, 0], sizes = [5, 16], strides = [1, 1]} : vector<5x192xf32> to vector<5x16xf32>
    %cst_30 = arith.constant 2.500000e-01 : f32
    %49 = vector.broadcast %cst_30 : f32 to vector<5x16xf32>
    %50 = arith.mulf %48, %49 : vector<5x16xf32>
    %51 = vector.extract_strided_slice %47 {offsets = [0, 64], sizes = [5, 16], strides = [1, 1]} : vector<5x192xf32> to vector<5x16xf32>
    %52 = vector.extract_strided_slice %47 {offsets = [0, 128], sizes = [5, 16], strides = [1, 1]} : vector<5x192xf32> to vector<5x16xf32>
    %53 = arith.truncf %50 : vector<5x16xf32> to vector<5x16xbf16>
    %54 = arith.truncf %51 : vector<5x16xf32> to vector<5x16xbf16>
    %cst_31 = arith.constant dense<0.000000e+00> : vector<5x5xf32>
    %55 = tpu.matmul %53, %54, %cst_31 {dimension_numbers = #tpu.dot_dimension_numbers<[1], [1], [0], [0], [0, 0, 1, 0], [], []>} : vector<5x16xbf16>, vector<5x16xbf16>, vector<5x5xf32> -> vector<5x5xf32>
    %cst_32 = arith.constant dense<0xFF800000> : vector<5xf32>
    %56 = vector.multi_reduction <maximumf>, %55, %cst_32 [1] : vector<5x5xf32> to vector<5xf32>
    %57 = vector.shape_cast %56 : vector<5xf32> to vector<5x1xf32>
    %58 = vector.broadcast %57 : vector<5x1xf32> to vector<5x5xf32>
    %59 = arith.subf %55, %58 : vector<5x5xf32>
    %60 = math.exp %59 : vector<5x5xf32>
    %cst_33 = arith.constant dense<0.000000e+00> : vector<5xf32>
    %61 = vector.multi_reduction <add>, %60, %cst_33 [1] : vector<5x5xf32> to vector<5xf32>
    %62 = vector.shape_cast %61 : vector<5xf32> to vector<5x1xf32>
    %63 = tpu.reciprocal %62 {approx = true} : vector<5x1xf32> -> vector<5x1xf32>
    %64 = vector.broadcast %63 : vector<5x1xf32> to vector<5x5xf32>
    %65 = arith.mulf %60, %64 : vector<5x5xf32>
    %66 = arith.truncf %65 : vector<5x5xf32> to vector<5x5xbf16>
    %67 = arith.truncf %52 : vector<5x16xf32> to vector<5x16xbf16>
    %cst_34 = arith.constant dense<0.000000e+00> : vector<5x16xf32>
    %68 = tpu.matmul %66, %67, %cst_34 {dimension_numbers = #tpu.dot_dimension_numbers<[1], [0], [0], [1], [0, 0, 1, 1], [], []>} : vector<5x5xbf16>, vector<5x16xbf16>, vector<5x16xf32> -> vector<5x16xf32>
    %69 = vector.extract_strided_slice %47 {offsets = [0, 16], sizes = [5, 16], strides = [1, 1]} : vector<5x192xf32> to vector<5x16xf32>
    %cst_35 = arith.constant 2.500000e-01 : f32
    %70 = vector.broadcast %cst_35 : f32 to vector<5x16xf32>
    %71 = arith.mulf %69, %70 : vector<5x16xf32>
    %72 = vector.extract_strided_slice %47 {offsets = [0, 80], sizes = [5, 16], strides = [1, 1]} : vector<5x192xf32> to vector<5x16xf32>
    %73 = vector.extract_strided_slice %47 {offsets = [0, 144], sizes = [5, 16], strides = [1, 1]} : vector<5x192xf32> to vector<5x16xf32>
    %74 = arith.truncf %71 : vector<5x16xf32> to vector<5x16xbf16>
    %75 = arith.truncf %72 : vector<5x16xf32> to vector<5x16xbf16>
    %cst_36 = arith.constant dense<0.000000e+00> : vector<5x5xf32>
    %76 = tpu.matmul %74, %75, %cst_36 {dimension_numbers = #tpu.dot_dimension_numbers<[1], [1], [0], [0], [0, 0, 1, 0], [], []>} : vector<5x16xbf16>, vector<5x16xbf16>, vector<5x5xf32> -> vector<5x5xf32>
    %cst_37 = arith.constant dense<0xFF800000> : vector<5xf32>
    %77 = vector.multi_reduction <maximumf>, %76, %cst_37 [1] : vector<5x5xf32> to vector<5xf32>
    %78 = vector.shape_cast %77 : vector<5xf32> to vector<5x1xf32>
    %79 = vector.broadcast %78 : vector<5x1xf32> to vector<5x5xf32>
    %80 = arith.subf %76, %79 : vector<5x5xf32>
    %81 = math.exp %80 : vector<5x5xf32>
    %cst_38 = arith.constant dense<0.000000e+00> : vector<5xf32>
    %82 = vector.multi_reduction <add>, %81, %cst_38 [1] : vector<5x5xf32> to vector<5xf32>
    %83 = vector.shape_cast %82 : vector<5xf32> to vector<5x1xf32>
    %84 = tpu.reciprocal %83 {approx = true} : vector<5x1xf32> -> vector<5x1xf32>
    %85 = vector.broadcast %84 : vector<5x1xf32> to vector<5x5xf32>
    %86 = arith.mulf %81, %85 : vector<5x5xf32>
    %87 = arith.truncf %86 : vector<5x5xf32> to vector<5x5xbf16>
    %88 = arith.truncf %73 : vector<5x16xf32> to vector<5x16xbf16>
    %cst_39 = arith.constant dense<0.000000e+00> : vector<5x16xf32>
    %89 = tpu.matmul %87, %88, %cst_39 {dimension_numbers = #tpu.dot_dimension_numbers<[1], [0], [0], [1], [0, 0, 1, 1], [], []>} : vector<5x5xbf16>, vector<5x16xbf16>, vector<5x16xf32> -> vector<5x16xf32>
    %90 = vector.extract_strided_slice %47 {offsets = [0, 32], sizes = [5, 16], strides = [1, 1]} : vector<5x192xf32> to vector<5x16xf32>
    %cst_40 = arith.constant 2.500000e-01 : f32
    %91 = vector.broadcast %cst_40 : f32 to vector<5x16xf32>
    %92 = arith.mulf %90, %91 : vector<5x16xf32>
    %93 = vector.extract_strided_slice %47 {offsets = [0, 96], sizes = [5, 16], strides = [1, 1]} : vector<5x192xf32> to vector<5x16xf32>
    %94 = vector.extract_strided_slice %47 {offsets = [0, 160], sizes = [5, 16], strides = [1, 1]} : vector<5x192xf32> to vector<5x16xf32>
    %95 = arith.truncf %92 : vector<5x16xf32> to vector<5x16xbf16>
    %96 = arith.truncf %93 : vector<5x16xf32> to vector<5x16xbf16>
    %cst_41 = arith.constant dense<0.000000e+00> : vector<5x5xf32>
    %97 = tpu.matmul %95, %96, %cst_41 {dimension_numbers = #tpu.dot_dimension_numbers<[1], [1], [0], [0], [0, 0, 1, 0], [], []>} : vector<5x16xbf16>, vector<5x16xbf16>, vector<5x5xf32> -> vector<5x5xf32>
    %cst_42 = arith.constant dense<0xFF800000> : vector<5xf32>
    %98 = vector.multi_reduction <maximumf>, %97, %cst_42 [1] : vector<5x5xf32> to vector<5xf32>
    %99 = vector.shape_cast %98 : vector<5xf32> to vector<5x1xf32>
    %100 = vector.broadcast %99 : vector<5x1xf32> to vector<5x5xf32>
    %101 = arith.subf %97, %100 : vector<5x5xf32>
    %102 = math.exp %101 : vector<5x5xf32>
    %cst_43 = arith.constant dense<0.000000e+00> : vector<5xf32>
    %103 = vector.multi_reduction <add>, %102, %cst_43 [1] : vector<5x5xf32> to vector<5xf32>
    %104 = vector.shape_cast %103 : vector<5xf32> to vector<5x1xf32>
    %105 = tpu.reciprocal %104 {approx = true} : vector<5x1xf32> -> vector<5x1xf32>
    %106 = vector.broadcast %105 : vector<5x1xf32> to vector<5x5xf32>
    %107 = arith.mulf %102, %106 : vector<5x5xf32>
    %108 = arith.truncf %107 : vector<5x5xf32> to vector<5x5xbf16>
    %109 = arith.truncf %94 : vector<5x16xf32> to vector<5x16xbf16>
    %cst_44 = arith.constant dense<0.000000e+00> : vector<5x16xf32>
    %110 = tpu.matmul %108, %109, %cst_44 {dimension_numbers = #tpu.dot_dimension_numbers<[1], [0], [0], [1], [0, 0, 1, 1], [], []>} : vector<5x5xbf16>, vector<5x16xbf16>, vector<5x16xf32> -> vector<5x16xf32>
    %111 = vector.extract_strided_slice %47 {offsets = [0, 48], sizes = [5, 16], strides = [1, 1]} : vector<5x192xf32> to vector<5x16xf32>
    %cst_45 = arith.constant 2.500000e-01 : f32
    %112 = vector.broadcast %cst_45 : f32 to vector<5x16xf32>
    %113 = arith.mulf %111, %112 : vector<5x16xf32>
    %114 = vector.extract_strided_slice %47 {offsets = [0, 112], sizes = [5, 16], strides = [1, 1]} : vector<5x192xf32> to vector<5x16xf32>
    %115 = vector.extract_strided_slice %47 {offsets = [0, 176], sizes = [5, 16], strides = [1, 1]} : vector<5x192xf32> to vector<5x16xf32>
    %116 = arith.truncf %113 : vector<5x16xf32> to vector<5x16xbf16>
    %117 = arith.truncf %114 : vector<5x16xf32> to vector<5x16xbf16>
    %cst_46 = arith.constant dense<0.000000e+00> : vector<5x5xf32>
    %118 = tpu.matmul %116, %117, %cst_46 {dimension_numbers = #tpu.dot_dimension_numbers<[1], [1], [0], [0], [0, 0, 1, 0], [], []>} : vector<5x16xbf16>, vector<5x16xbf16>, vector<5x5xf32> -> vector<5x5xf32>
    %cst_47 = arith.constant dense<0xFF800000> : vector<5xf32>
    %119 = vector.multi_reduction <maximumf>, %118, %cst_47 [1] : vector<5x5xf32> to vector<5xf32>
    %120 = vector.shape_cast %119 : vector<5xf32> to vector<5x1xf32>
    %121 = vector.broadcast %120 : vector<5x1xf32> to vector<5x5xf32>
    %122 = arith.subf %118, %121 : vector<5x5xf32>
    %123 = math.exp %122 : vector<5x5xf32>
    %cst_48 = arith.constant dense<0.000000e+00> : vector<5xf32>
    %124 = vector.multi_reduction <add>, %123, %cst_48 [1] : vector<5x5xf32> to vector<5xf32>
    %125 = vector.shape_cast %124 : vector<5xf32> to vector<5x1xf32>
    %126 = tpu.reciprocal %125 {approx = true} : vector<5x1xf32> -> vector<5x1xf32>
    %127 = vector.broadcast %126 : vector<5x1xf32> to vector<5x5xf32>
    %128 = arith.mulf %123, %127 : vector<5x5xf32>
    %129 = arith.truncf %128 : vector<5x5xf32> to vector<5x5xbf16>
    %130 = arith.truncf %115 : vector<5x16xf32> to vector<5x16xbf16>
    %cst_49 = arith.constant dense<0.000000e+00> : vector<5x16xf32>
    %131 = tpu.matmul %129, %130, %cst_49 {dimension_numbers = #tpu.dot_dimension_numbers<[1], [0], [0], [1], [0, 0, 1, 1], [], []>} : vector<5x5xbf16>, vector<5x16xbf16>, vector<5x16xf32> -> vector<5x16xf32>
    %132 = tpu.concatenate %68, %89, %110, %131 in 1 : vector<5x16xf32>, vector<5x16xf32>, vector<5x16xf32>, vector<5x16xf32> -> vector<5x64xf32>
    %133 = arith.truncf %132 : vector<5x64xf32> to vector<5x64xbf16>
    %c0_50 = arith.constant 0 : index
    %c0_51 = arith.constant 0 : index
    %c0_52 = arith.constant 0 : index
    %134 = vector.load %arg10[%c0_50, %c0_51, %c0_52] : memref<2x64x64xbf16, #tpu.memory_space<vmem>>, vector<1x64x64xbf16>
    %135 = vector.shape_cast %134 : vector<1x64x64xbf16> to vector<64x64xbf16>
    %cst_53 = arith.constant dense<0.000000e+00> : vector<5x64xf32>
    %136 = tpu.matmul %133, %135, %cst_53 {dimension_numbers = #tpu.dot_dimension_numbers<[1], [0], [0], [1], [0, 0, 1, 1], [], []>} : vector<5x64xbf16>, vector<64x64xbf16>, vector<5x64xf32> -> vector<5x64xf32>
    %c0_54 = arith.constant 0 : index
    %c0_55 = arith.constant 0 : index
    %c0_56 = arith.constant 0 : index
    %137 = vector.load %arg11[%c0_54, %c0_55, %c0_56] : memref<2x1x64xf32, #tpu.memory_space<vmem>>, vector<1x1x64xf32>
    %138 = vector.shape_cast %137 : vector<1x1x64xf32> to vector<1x64xf32>
    %139 = vector.broadcast %138 : vector<1x64xf32> to vector<5x64xf32>
    %140 = arith.addf %136, %139 : vector<5x64xf32>
    %141 = arith.addf %13, %140 : vector<5x64xf32>
    %c0_57 = arith.constant 0 : index
    %c0_58 = arith.constant 0 : index
    %c0_59 = arith.constant 0 : index
    %142 = vector.load %arg12[%c0_57, %c0_58, %c0_59] : memref<2x1x64xf32, #tpu.memory_space<vmem>>, vector<1x1x64xf32>
    %143 = vector.shape_cast %142 : vector<1x1x64xf32> to vector<1x64xf32>
    %c0_60 = arith.constant 0 : index
    %c0_61 = arith.constant 0 : index
    %c0_62 = arith.constant 0 : index
    %144 = vector.load %arg13[%c0_60, %c0_61, %c0_62] : memref<2x1x64xf32, #tpu.memory_space<vmem>>, vector<1x1x64xf32>
    %145 = vector.shape_cast %144 : vector<1x1x64xf32> to vector<1x64xf32>
    %cst_63 = arith.constant dense<0.000000e+00> : vector<5xf32>
    %146 = vector.multi_reduction <add>, %141, %cst_63 [1] : vector<5x64xf32> to vector<5xf32>
    %147 = vector.shape_cast %146 : vector<5xf32> to vector<5x1xf32>
    %cst_64 = arith.constant 6.400000e+01 : f32
    %148 = vector.broadcast %cst_64 : f32 to vector<5x1xf32>
    %149 = arith.divf %147, %148 : vector<5x1xf32>
    %150 = vector.broadcast %149 : vector<5x1xf32> to vector<5x64xf32>
    %151 = arith.subf %141, %150 : vector<5x64xf32>
    %152 = arith.mulf %151, %151 : vector<5x64xf32>
    %cst_65 = arith.constant dense<0.000000e+00> : vector<5xf32>
    %153 = vector.multi_reduction <add>, %152, %cst_65 [1] : vector<5x64xf32> to vector<5xf32>
    %154 = vector.shape_cast %153 : vector<5xf32> to vector<5x1xf32>
    %cst_66 = arith.constant 6.400000e+01 : f32
    %155 = vector.broadcast %cst_66 : f32 to vector<5x1xf32>
    %156 = arith.divf %154, %155 : vector<5x1xf32>
    %157 = vector.broadcast %149 : vector<5x1xf32> to vector<5x64xf32>
    %158 = arith.subf %141, %157 : vector<5x64xf32>
    %cst_67 = arith.constant 9.99999997E-7 : f32
    %159 = vector.broadcast %cst_67 : f32 to vector<5x1xf32>
    %160 = arith.addf %156, %159 : vector<5x1xf32>
    %161 = math.rsqrt %160 : vector<5x1xf32>
    %162 = vector.broadcast %161 : vector<5x1xf32> to vector<5x64xf32>
    %163 = arith.mulf %158, %162 : vector<5x64xf32>
    %164 = vector.broadcast %143 : vector<1x64xf32> to vector<5x64xf32>
    %165 = arith.mulf %163, %164 : vector<5x64xf32>
    %166 = vector.broadcast %145 : vector<1x64xf32> to vector<5x64xf32>
    %167 = arith.addf %165, %166 : vector<5x64xf32>
    %168 = arith.truncf %167 : vector<5x64xf32> to vector<5x64xbf16>
    %c0_68 = arith.constant 0 : index
    %c0_69 = arith.constant 0 : index
    %c0_70 = arith.constant 0 : index
    %169 = vector.load %arg14[%c0_68, %c0_69, %c0_70] : memref<2x64x256xbf16, #tpu.memory_space<vmem>>, vector<1x64x256xbf16>
    %170 = vector.shape_cast %169 : vector<1x64x256xbf16> to vector<64x256xbf16>
    %cst_71 = arith.constant dense<0.000000e+00> : vector<5x256xf32>
    %171 = tpu.matmul %168, %170, %cst_71 {dimension_numbers = #tpu.dot_dimension_numbers<[1], [0], [0], [1], [0, 0, 1, 1], [], []>} : vector<5x64xbf16>, vector<64x256xbf16>, vector<5x256xf32> -> vector<5x256xf32>
    %c0_72 = arith.constant 0 : index
    %c0_73 = arith.constant 0 : index
    %c0_74 = arith.constant 0 : index
    %172 = vector.load %arg15[%c0_72, %c0_73, %c0_74] : memref<2x1x256xf32, #tpu.memory_space<vmem>>, vector<1x1x256xf32>
    %173 = vector.shape_cast %172 : vector<1x1x256xf32> to vector<1x256xf32>
    %174 = vector.broadcast %173 : vector<1x256xf32> to vector<5x256xf32>
    %175 = arith.addf %171, %174 : vector<5x256xf32>
    %cst_75 = arith.constant 5.000000e-01 : f32
    %176 = vector.broadcast %cst_75 : f32 to vector<5x256xf32>
    %177 = arith.mulf %176, %175 : vector<5x256xf32>
    %cst_76 = arith.constant 4.471500e-02 : f32
    %178 = vector.broadcast %cst_76 : f32 to vector<5x256xf32>
    %179 = arith.mulf %178, %175 : vector<5x256xf32>
    %180 = arith.mulf %179, %175 : vector<5x256xf32>
    %181 = arith.mulf %180, %175 : vector<5x256xf32>
    %182 = arith.addf %175, %181 : vector<5x256xf32>
    %cst_77 = arith.constant 0.797884583 : f32
    %183 = vector.broadcast %cst_77 : f32 to vector<5x256xf32>
    %184 = arith.mulf %183, %182 : vector<5x256xf32>
    %185 = math.tanh %184 : vector<5x256xf32>
    %cst_78 = arith.constant 1.000000e+00 : f32
    %186 = vector.broadcast %cst_78 : f32 to vector<5x256xf32>
    %187 = arith.addf %186, %185 : vector<5x256xf32>
    %188 = arith.mulf %177, %187 : vector<5x256xf32>
    %189 = arith.truncf %188 : vector<5x256xf32> to vector<5x256xbf16>
    %c0_79 = arith.constant 0 : index
    %c0_80 = arith.constant 0 : index
    %c0_81 = arith.constant 0 : index
    %190 = vector.load %arg16[%c0_79, %c0_80, %c0_81] : memref<2x256x64xbf16, #tpu.memory_space<vmem>>, vector<1x256x64xbf16>
    %191 = vector.shape_cast %190 : vector<1x256x64xbf16> to vector<256x64xbf16>
    %cst_82 = arith.constant dense<0.000000e+00> : vector<5x64xf32>
    %192 = tpu.matmul %189, %191, %cst_82 {dimension_numbers = #tpu.dot_dimension_numbers<[1], [0], [0], [1], [0, 0, 1, 1], [], []>} : vector<5x256xbf16>, vector<256x64xbf16>, vector<5x64xf32> -> vector<5x64xf32>
    %c0_83 = arith.constant 0 : index
    %c0_84 = arith.constant 0 : index
    %c0_85 = arith.constant 0 : index
    %193 = vector.load %arg17[%c0_83, %c0_84, %c0_85] : memref<2x1x64xf32, #tpu.memory_space<vmem>>, vector<1x1x64xf32>
    %194 = vector.shape_cast %193 : vector<1x1x64xf32> to vector<1x64xf32>
    %195 = vector.broadcast %194 : vector<1x64xf32> to vector<5x64xf32>
    %196 = arith.addf %192, %195 : vector<5x64xf32>
    %197 = arith.addf %141, %196 : vector<5x64xf32>
    %c1 = arith.constant 1 : index
    %c0_86 = arith.constant 0 : index
    %c0_87 = arith.constant 0 : index
    %198 = vector.load %arg6[%c1, %c0_86, %c0_87] : memref<2x1x64xf32, #tpu.memory_space<vmem>>, vector<1x1x64xf32>
    %199 = vector.shape_cast %198 : vector<1x1x64xf32> to vector<1x64xf32>
    %c1_88 = arith.constant 1 : index
    %c0_89 = arith.constant 0 : index
    %c0_90 = arith.constant 0 : index
    %200 = vector.load %arg7[%c1_88, %c0_89, %c0_90] : memref<2x1x64xf32, #tpu.memory_space<vmem>>, vector<1x1x64xf32>
    %201 = vector.shape_cast %200 : vector<1x1x64xf32> to vector<1x64xf32>
    %cst_91 = arith.constant dense<0.000000e+00> : vector<5xf32>
    %202 = vector.multi_reduction <add>, %197, %cst_91 [1] : vector<5x64xf32> to vector<5xf32>
    %203 = vector.shape_cast %202 : vector<5xf32> to vector<5x1xf32>
    %cst_92 = arith.constant 6.400000e+01 : f32
    %204 = vector.broadcast %cst_92 : f32 to vector<5x1xf32>
    %205 = arith.divf %203, %204 : vector<5x1xf32>
    %206 = vector.broadcast %205 : vector<5x1xf32> to vector<5x64xf32>
    %207 = arith.subf %197, %206 : vector<5x64xf32>
    %208 = arith.mulf %207, %207 : vector<5x64xf32>
    %cst_93 = arith.constant dense<0.000000e+00> : vector<5xf32>
    %209 = vector.multi_reduction <add>, %208, %cst_93 [1] : vector<5x64xf32> to vector<5xf32>
    %210 = vector.shape_cast %209 : vector<5xf32> to vector<5x1xf32>
    %cst_94 = arith.constant 6.400000e+01 : f32
    %211 = vector.broadcast %cst_94 : f32 to vector<5x1xf32>
    %212 = arith.divf %210, %211 : vector<5x1xf32>
    %213 = vector.broadcast %205 : vector<5x1xf32> to vector<5x64xf32>
    %214 = arith.subf %197, %213 : vector<5x64xf32>
    %cst_95 = arith.constant 9.99999997E-7 : f32
    %215 = vector.broadcast %cst_95 : f32 to vector<5x1xf32>
    %216 = arith.addf %212, %215 : vector<5x1xf32>
    %217 = math.rsqrt %216 : vector<5x1xf32>
    %218 = vector.broadcast %217 : vector<5x1xf32> to vector<5x64xf32>
    %219 = arith.mulf %214, %218 : vector<5x64xf32>
    %220 = vector.broadcast %199 : vector<1x64xf32> to vector<5x64xf32>
    %221 = arith.mulf %219, %220 : vector<5x64xf32>
    %222 = vector.broadcast %201 : vector<1x64xf32> to vector<5x64xf32>
    %223 = arith.addf %221, %222 : vector<5x64xf32>
    %224 = arith.truncf %223 : vector<5x64xf32> to vector<5x64xbf16>
    %c1_96 = arith.constant 1 : index
    %c0_97 = arith.constant 0 : index
    %c0_98 = arith.constant 0 : index
    %225 = vector.load %arg8[%c1_96, %c0_97, %c0_98] : memref<2x64x192xbf16, #tpu.memory_space<vmem>>, vector<1x64x192xbf16>
    %226 = vector.shape_cast %225 : vector<1x64x192xbf16> to vector<64x192xbf16>
    %cst_99 = arith.constant dense<0.000000e+00> : vector<5x192xf32>
    %227 = tpu.matmul %224, %226, %cst_99 {dimension_numbers = #tpu.dot_dimension_numbers<[1], [0], [0], [1], [0, 0, 1, 1], [], []>} : vector<5x64xbf16>, vector<64x192xbf16>, vector<5x192xf32> -> vector<5x192xf32>
    %c1_100 = arith.constant 1 : index
    %c0_101 = arith.constant 0 : index
    %c0_102 = arith.constant 0 : index
    %228 = vector.load %arg9[%c1_100, %c0_101, %c0_102] : memref<2x1x192xf32, #tpu.memory_space<vmem>>, vector<1x1x192xf32>
    %229 = vector.shape_cast %228 : vector<1x1x192xf32> to vector<1x192xf32>
    %230 = vector.broadcast %229 : vector<1x192xf32> to vector<5x192xf32>
    %231 = arith.addf %227, %230 : vector<5x192xf32>
    %232 = vector.extract_strided_slice %231 {offsets = [0, 0], sizes = [5, 16], strides = [1, 1]} : vector<5x192xf32> to vector<5x16xf32>
    %cst_103 = arith.constant 2.500000e-01 : f32
    %233 = vector.broadcast %cst_103 : f32 to vector<5x16xf32>
    %234 = arith.mulf %232, %233 : vector<5x16xf32>
    %235 = vector.extract_strided_slice %231 {offsets = [0, 64], sizes = [5, 16], strides = [1, 1]} : vector<5x192xf32> to vector<5x16xf32>
    %236 = vector.extract_strided_slice %231 {offsets = [0, 128], sizes = [5, 16], strides = [1, 1]} : vector<5x192xf32> to vector<5x16xf32>
    %237 = arith.truncf %234 : vector<5x16xf32> to vector<5x16xbf16>
    %238 = arith.truncf %235 : vector<5x16xf32> to vector<5x16xbf16>
    %cst_104 = arith.constant dense<0.000000e+00> : vector<5x5xf32>
    %239 = tpu.matmul %237, %238, %cst_104 {dimension_numbers = #tpu.dot_dimension_numbers<[1], [1], [0], [0], [0, 0, 1, 0], [], []>} : vector<5x16xbf16>, vector<5x16xbf16>, vector<5x5xf32> -> vector<5x5xf32>
    %cst_105 = arith.constant dense<0xFF800000> : vector<5xf32>
    %240 = vector.multi_reduction <maximumf>, %239, %cst_105 [1] : vector<5x5xf32> to vector<5xf32>
    %241 = vector.shape_cast %240 : vector<5xf32> to vector<5x1xf32>
    %242 = vector.broadcast %241 : vector<5x1xf32> to vector<5x5xf32>
    %243 = arith.subf %239, %242 : vector<5x5xf32>
    %244 = math.exp %243 : vector<5x5xf32>
    %cst_106 = arith.constant dense<0.000000e+00> : vector<5xf32>
    %245 = vector.multi_reduction <add>, %244, %cst_106 [1] : vector<5x5xf32> to vector<5xf32>
    %246 = vector.shape_cast %245 : vector<5xf32> to vector<5x1xf32>
    %247 = tpu.reciprocal %246 {approx = true} : vector<5x1xf32> -> vector<5x1xf32>
    %248 = vector.broadcast %247 : vector<5x1xf32> to vector<5x5xf32>
    %249 = arith.mulf %244, %248 : vector<5x5xf32>
    %250 = arith.truncf %249 : vector<5x5xf32> to vector<5x5xbf16>
    %251 = arith.truncf %236 : vector<5x16xf32> to vector<5x16xbf16>
    %cst_107 = arith.constant dense<0.000000e+00> : vector<5x16xf32>
    %252 = tpu.matmul %250, %251, %cst_107 {dimension_numbers = #tpu.dot_dimension_numbers<[1], [0], [0], [1], [0, 0, 1, 1], [], []>} : vector<5x5xbf16>, vector<5x16xbf16>, vector<5x16xf32> -> vector<5x16xf32>
    %253 = vector.extract_strided_slice %231 {offsets = [0, 16], sizes = [5, 16], strides = [1, 1]} : vector<5x192xf32> to vector<5x16xf32>
    %cst_108 = arith.constant 2.500000e-01 : f32
    %254 = vector.broadcast %cst_108 : f32 to vector<5x16xf32>
    %255 = arith.mulf %253, %254 : vector<5x16xf32>
    %256 = vector.extract_strided_slice %231 {offsets = [0, 80], sizes = [5, 16], strides = [1, 1]} : vector<5x192xf32> to vector<5x16xf32>
    %257 = vector.extract_strided_slice %231 {offsets = [0, 144], sizes = [5, 16], strides = [1, 1]} : vector<5x192xf32> to vector<5x16xf32>
    %258 = arith.truncf %255 : vector<5x16xf32> to vector<5x16xbf16>
    %259 = arith.truncf %256 : vector<5x16xf32> to vector<5x16xbf16>
    %cst_109 = arith.constant dense<0.000000e+00> : vector<5x5xf32>
    %260 = tpu.matmul %258, %259, %cst_109 {dimension_numbers = #tpu.dot_dimension_numbers<[1], [1], [0], [0], [0, 0, 1, 0], [], []>} : vector<5x16xbf16>, vector<5x16xbf16>, vector<5x5xf32> -> vector<5x5xf32>
    %cst_110 = arith.constant dense<0xFF800000> : vector<5xf32>
    %261 = vector.multi_reduction <maximumf>, %260, %cst_110 [1] : vector<5x5xf32> to vector<5xf32>
    %262 = vector.shape_cast %261 : vector<5xf32> to vector<5x1xf32>
    %263 = vector.broadcast %262 : vector<5x1xf32> to vector<5x5xf32>
    %264 = arith.subf %260, %263 : vector<5x5xf32>
    %265 = math.exp %264 : vector<5x5xf32>
    %cst_111 = arith.constant dense<0.000000e+00> : vector<5xf32>
    %266 = vector.multi_reduction <add>, %265, %cst_111 [1] : vector<5x5xf32> to vector<5xf32>
    %267 = vector.shape_cast %266 : vector<5xf32> to vector<5x1xf32>
    %268 = tpu.reciprocal %267 {approx = true} : vector<5x1xf32> -> vector<5x1xf32>
    %269 = vector.broadcast %268 : vector<5x1xf32> to vector<5x5xf32>
    %270 = arith.mulf %265, %269 : vector<5x5xf32>
    %271 = arith.truncf %270 : vector<5x5xf32> to vector<5x5xbf16>
    %272 = arith.truncf %257 : vector<5x16xf32> to vector<5x16xbf16>
    %cst_112 = arith.constant dense<0.000000e+00> : vector<5x16xf32>
    %273 = tpu.matmul %271, %272, %cst_112 {dimension_numbers = #tpu.dot_dimension_numbers<[1], [0], [0], [1], [0, 0, 1, 1], [], []>} : vector<5x5xbf16>, vector<5x16xbf16>, vector<5x16xf32> -> vector<5x16xf32>
    %274 = vector.extract_strided_slice %231 {offsets = [0, 32], sizes = [5, 16], strides = [1, 1]} : vector<5x192xf32> to vector<5x16xf32>
    %cst_113 = arith.constant 2.500000e-01 : f32
    %275 = vector.broadcast %cst_113 : f32 to vector<5x16xf32>
    %276 = arith.mulf %274, %275 : vector<5x16xf32>
    %277 = vector.extract_strided_slice %231 {offsets = [0, 96], sizes = [5, 16], strides = [1, 1]} : vector<5x192xf32> to vector<5x16xf32>
    %278 = vector.extract_strided_slice %231 {offsets = [0, 160], sizes = [5, 16], strides = [1, 1]} : vector<5x192xf32> to vector<5x16xf32>
    %279 = arith.truncf %276 : vector<5x16xf32> to vector<5x16xbf16>
    %280 = arith.truncf %277 : vector<5x16xf32> to vector<5x16xbf16>
    %cst_114 = arith.constant dense<0.000000e+00> : vector<5x5xf32>
    %281 = tpu.matmul %279, %280, %cst_114 {dimension_numbers = #tpu.dot_dimension_numbers<[1], [1], [0], [0], [0, 0, 1, 0], [], []>} : vector<5x16xbf16>, vector<5x16xbf16>, vector<5x5xf32> -> vector<5x5xf32>
    %cst_115 = arith.constant dense<0xFF800000> : vector<5xf32>
    %282 = vector.multi_reduction <maximumf>, %281, %cst_115 [1] : vector<5x5xf32> to vector<5xf32>
    %283 = vector.shape_cast %282 : vector<5xf32> to vector<5x1xf32>
    %284 = vector.broadcast %283 : vector<5x1xf32> to vector<5x5xf32>
    %285 = arith.subf %281, %284 : vector<5x5xf32>
    %286 = math.exp %285 : vector<5x5xf32>
    %cst_116 = arith.constant dense<0.000000e+00> : vector<5xf32>
    %287 = vector.multi_reduction <add>, %286, %cst_116 [1] : vector<5x5xf32> to vector<5xf32>
    %288 = vector.shape_cast %287 : vector<5xf32> to vector<5x1xf32>
    %289 = tpu.reciprocal %288 {approx = true} : vector<5x1xf32> -> vector<5x1xf32>
    %290 = vector.broadcast %289 : vector<5x1xf32> to vector<5x5xf32>
    %291 = arith.mulf %286, %290 : vector<5x5xf32>
    %292 = arith.truncf %291 : vector<5x5xf32> to vector<5x5xbf16>
    %293 = arith.truncf %278 : vector<5x16xf32> to vector<5x16xbf16>
    %cst_117 = arith.constant dense<0.000000e+00> : vector<5x16xf32>
    %294 = tpu.matmul %292, %293, %cst_117 {dimension_numbers = #tpu.dot_dimension_numbers<[1], [0], [0], [1], [0, 0, 1, 1], [], []>} : vector<5x5xbf16>, vector<5x16xbf16>, vector<5x16xf32> -> vector<5x16xf32>
    %295 = vector.extract_strided_slice %231 {offsets = [0, 48], sizes = [5, 16], strides = [1, 1]} : vector<5x192xf32> to vector<5x16xf32>
    %cst_118 = arith.constant 2.500000e-01 : f32
    %296 = vector.broadcast %cst_118 : f32 to vector<5x16xf32>
    %297 = arith.mulf %295, %296 : vector<5x16xf32>
    %298 = vector.extract_strided_slice %231 {offsets = [0, 112], sizes = [5, 16], strides = [1, 1]} : vector<5x192xf32> to vector<5x16xf32>
    %299 = vector.extract_strided_slice %231 {offsets = [0, 176], sizes = [5, 16], strides = [1, 1]} : vector<5x192xf32> to vector<5x16xf32>
    %300 = arith.truncf %297 : vector<5x16xf32> to vector<5x16xbf16>
    %301 = arith.truncf %298 : vector<5x16xf32> to vector<5x16xbf16>
    %cst_119 = arith.constant dense<0.000000e+00> : vector<5x5xf32>
    %302 = tpu.matmul %300, %301, %cst_119 {dimension_numbers = #tpu.dot_dimension_numbers<[1], [1], [0], [0], [0, 0, 1, 0], [], []>} : vector<5x16xbf16>, vector<5x16xbf16>, vector<5x5xf32> -> vector<5x5xf32>
    %cst_120 = arith.constant dense<0xFF800000> : vector<5xf32>
    %303 = vector.multi_reduction <maximumf>, %302, %cst_120 [1] : vector<5x5xf32> to vector<5xf32>
    %304 = vector.shape_cast %303 : vector<5xf32> to vector<5x1xf32>
    %305 = vector.broadcast %304 : vector<5x1xf32> to vector<5x5xf32>
    %306 = arith.subf %302, %305 : vector<5x5xf32>
    %307 = math.exp %306 : vector<5x5xf32>
    %cst_121 = arith.constant dense<0.000000e+00> : vector<5xf32>
    %308 = vector.multi_reduction <add>, %307, %cst_121 [1] : vector<5x5xf32> to vector<5xf32>
    %309 = vector.shape_cast %308 : vector<5xf32> to vector<5x1xf32>
    %310 = tpu.reciprocal %309 {approx = true} : vector<5x1xf32> -> vector<5x1xf32>
    %311 = vector.broadcast %310 : vector<5x1xf32> to vector<5x5xf32>
    %312 = arith.mulf %307, %311 : vector<5x5xf32>
    %313 = arith.truncf %312 : vector<5x5xf32> to vector<5x5xbf16>
    %314 = arith.truncf %299 : vector<5x16xf32> to vector<5x16xbf16>
    %cst_122 = arith.constant dense<0.000000e+00> : vector<5x16xf32>
    %315 = tpu.matmul %313, %314, %cst_122 {dimension_numbers = #tpu.dot_dimension_numbers<[1], [0], [0], [1], [0, 0, 1, 1], [], []>} : vector<5x5xbf16>, vector<5x16xbf16>, vector<5x16xf32> -> vector<5x16xf32>
    %316 = tpu.concatenate %252, %273, %294, %315 in 1 : vector<5x16xf32>, vector<5x16xf32>, vector<5x16xf32>, vector<5x16xf32> -> vector<5x64xf32>
    %317 = arith.truncf %316 : vector<5x64xf32> to vector<5x64xbf16>
    %c1_123 = arith.constant 1 : index
    %c0_124 = arith.constant 0 : index
    %c0_125 = arith.constant 0 : index
    %318 = vector.load %arg10[%c1_123, %c0_124, %c0_125] : memref<2x64x64xbf16, #tpu.memory_space<vmem>>, vector<1x64x64xbf16>
    %319 = vector.shape_cast %318 : vector<1x64x64xbf16> to vector<64x64xbf16>
    %cst_126 = arith.constant dense<0.000000e+00> : vector<5x64xf32>
    %320 = tpu.matmul %317, %319, %cst_126 {dimension_numbers = #tpu.dot_dimension_numbers<[1], [0], [0], [1], [0, 0, 1, 1], [], []>} : vector<5x64xbf16>, vector<64x64xbf16>, vector<5x64xf32> -> vector<5x64xf32>
    %c1_127 = arith.constant 1 : index
    %c0_128 = arith.constant 0 : index
    %c0_129 = arith.constant 0 : index
    %321 = vector.load %arg11[%c1_127, %c0_128, %c0_129] : memref<2x1x64xf32, #tpu.memory_space<vmem>>, vector<1x1x64xf32>
    %322 = vector.shape_cast %321 : vector<1x1x64xf32> to vector<1x64xf32>
    %323 = vector.broadcast %322 : vector<1x64xf32> to vector<5x64xf32>
    %324 = arith.addf %320, %323 : vector<5x64xf32>
    %325 = arith.addf %197, %324 : vector<5x64xf32>
    %c1_130 = arith.constant 1 : index
    %c0_131 = arith.constant 0 : index
    %c0_132 = arith.constant 0 : index
    %326 = vector.load %arg12[%c1_130, %c0_131, %c0_132] : memref<2x1x64xf32, #tpu.memory_space<vmem>>, vector<1x1x64xf32>
    %327 = vector.shape_cast %326 : vector<1x1x64xf32> to vector<1x64xf32>
    %c1_133 = arith.constant 1 : index
    %c0_134 = arith.constant 0 : index
    %c0_135 = arith.constant 0 : index
    %328 = vector.load %arg13[%c1_133, %c0_134, %c0_135] : memref<2x1x64xf32, #tpu.memory_space<vmem>>, vector<1x1x64xf32>
    %329 = vector.shape_cast %328 : vector<1x1x64xf32> to vector<1x64xf32>
    %cst_136 = arith.constant dense<0.000000e+00> : vector<5xf32>
    %330 = vector.multi_reduction <add>, %325, %cst_136 [1] : vector<5x64xf32> to vector<5xf32>
    %331 = vector.shape_cast %330 : vector<5xf32> to vector<5x1xf32>
    %cst_137 = arith.constant 6.400000e+01 : f32
    %332 = vector.broadcast %cst_137 : f32 to vector<5x1xf32>
    %333 = arith.divf %331, %332 : vector<5x1xf32>
    %334 = vector.broadcast %333 : vector<5x1xf32> to vector<5x64xf32>
    %335 = arith.subf %325, %334 : vector<5x64xf32>
    %336 = arith.mulf %335, %335 : vector<5x64xf32>
    %cst_138 = arith.constant dense<0.000000e+00> : vector<5xf32>
    %337 = vector.multi_reduction <add>, %336, %cst_138 [1] : vector<5x64xf32> to vector<5xf32>
    %338 = vector.shape_cast %337 : vector<5xf32> to vector<5x1xf32>
    %cst_139 = arith.constant 6.400000e+01 : f32
    %339 = vector.broadcast %cst_139 : f32 to vector<5x1xf32>
    %340 = arith.divf %338, %339 : vector<5x1xf32>
    %341 = vector.broadcast %333 : vector<5x1xf32> to vector<5x64xf32>
    %342 = arith.subf %325, %341 : vector<5x64xf32>
    %cst_140 = arith.constant 9.99999997E-7 : f32
    %343 = vector.broadcast %cst_140 : f32 to vector<5x1xf32>
    %344 = arith.addf %340, %343 : vector<5x1xf32>
    %345 = math.rsqrt %344 : vector<5x1xf32>
    %346 = vector.broadcast %345 : vector<5x1xf32> to vector<5x64xf32>
    %347 = arith.mulf %342, %346 : vector<5x64xf32>
    %348 = vector.broadcast %327 : vector<1x64xf32> to vector<5x64xf32>
    %349 = arith.mulf %347, %348 : vector<5x64xf32>
    %350 = vector.broadcast %329 : vector<1x64xf32> to vector<5x64xf32>
    %351 = arith.addf %349, %350 : vector<5x64xf32>
    %352 = arith.truncf %351 : vector<5x64xf32> to vector<5x64xbf16>
    %c1_141 = arith.constant 1 : index
    %c0_142 = arith.constant 0 : index
    %c0_143 = arith.constant 0 : index
    %353 = vector.load %arg14[%c1_141, %c0_142, %c0_143] : memref<2x64x256xbf16, #tpu.memory_space<vmem>>, vector<1x64x256xbf16>
    %354 = vector.shape_cast %353 : vector<1x64x256xbf16> to vector<64x256xbf16>
    %cst_144 = arith.constant dense<0.000000e+00> : vector<5x256xf32>
    %355 = tpu.matmul %352, %354, %cst_144 {dimension_numbers = #tpu.dot_dimension_numbers<[1], [0], [0], [1], [0, 0, 1, 1], [], []>} : vector<5x64xbf16>, vector<64x256xbf16>, vector<5x256xf32> -> vector<5x256xf32>
    %c1_145 = arith.constant 1 : index
    %c0_146 = arith.constant 0 : index
    %c0_147 = arith.constant 0 : index
    %356 = vector.load %arg15[%c1_145, %c0_146, %c0_147] : memref<2x1x256xf32, #tpu.memory_space<vmem>>, vector<1x1x256xf32>
    %357 = vector.shape_cast %356 : vector<1x1x256xf32> to vector<1x256xf32>
    %358 = vector.broadcast %357 : vector<1x256xf32> to vector<5x256xf32>
    %359 = arith.addf %355, %358 : vector<5x256xf32>
    %cst_148 = arith.constant 5.000000e-01 : f32
    %360 = vector.broadcast %cst_148 : f32 to vector<5x256xf32>
    %361 = arith.mulf %360, %359 : vector<5x256xf32>
    %cst_149 = arith.constant 4.471500e-02 : f32
    %362 = vector.broadcast %cst_149 : f32 to vector<5x256xf32>
    %363 = arith.mulf %362, %359 : vector<5x256xf32>
    %364 = arith.mulf %363, %359 : vector<5x256xf32>
    %365 = arith.mulf %364, %359 : vector<5x256xf32>
    %366 = arith.addf %359, %365 : vector<5x256xf32>
    %cst_150 = arith.constant 0.797884583 : f32
    %367 = vector.broadcast %cst_150 : f32 to vector<5x256xf32>
    %368 = arith.mulf %367, %366 : vector<5x256xf32>
    %369 = math.tanh %368 : vector<5x256xf32>
    %cst_151 = arith.constant 1.000000e+00 : f32
    %370 = vector.broadcast %cst_151 : f32 to vector<5x256xf32>
    %371 = arith.addf %370, %369 : vector<5x256xf32>
    %372 = arith.mulf %361, %371 : vector<5x256xf32>
    %373 = arith.truncf %372 : vector<5x256xf32> to vector<5x256xbf16>
    %c1_152 = arith.constant 1 : index
    %c0_153 = arith.constant 0 : index
    %c0_154 = arith.constant 0 : index
    %374 = vector.load %arg16[%c1_152, %c0_153, %c0_154] : memref<2x256x64xbf16, #tpu.memory_space<vmem>>, vector<1x256x64xbf16>
    %375 = vector.shape_cast %374 : vector<1x256x64xbf16> to vector<256x64xbf16>
    %cst_155 = arith.constant dense<0.000000e+00> : vector<5x64xf32>
    %376 = tpu.matmul %373, %375, %cst_155 {dimension_numbers = #tpu.dot_dimension_numbers<[1], [0], [0], [1], [0, 0, 1, 1], [], []>} : vector<5x256xbf16>, vector<256x64xbf16>, vector<5x64xf32> -> vector<5x64xf32>
    %c1_156 = arith.constant 1 : index
    %c0_157 = arith.constant 0 : index
    %c0_158 = arith.constant 0 : index
    %377 = vector.load %arg17[%c1_156, %c0_157, %c0_158] : memref<2x1x64xf32, #tpu.memory_space<vmem>>, vector<1x1x64xf32>
    %378 = vector.shape_cast %377 : vector<1x1x64xf32> to vector<1x64xf32>
    %379 = vector.broadcast %378 : vector<1x64xf32> to vector<5x64xf32>
    %380 = arith.addf %376, %379 : vector<5x64xf32>
    %381 = arith.addf %325, %380 : vector<5x64xf32>
    %c0_159 = arith.constant 0 : index
    %c0_160 = arith.constant 0 : index
    %382 = vector.load %arg18[%c0_159, %c0_160] : memref<1x64xf32, #tpu.memory_space<vmem>>, vector<1x64xf32>
    %c0_161 = arith.constant 0 : index
    %c0_162 = arith.constant 0 : index
    %383 = vector.load %arg19[%c0_161, %c0_162] : memref<1x64xf32, #tpu.memory_space<vmem>>, vector<1x64xf32>
    %cst_163 = arith.constant dense<0.000000e+00> : vector<5xf32>
    %384 = vector.multi_reduction <add>, %381, %cst_163 [1] : vector<5x64xf32> to vector<5xf32>
    %385 = vector.shape_cast %384 : vector<5xf32> to vector<5x1xf32>
    %cst_164 = arith.constant 6.400000e+01 : f32
    %386 = vector.broadcast %cst_164 : f32 to vector<5x1xf32>
    %387 = arith.divf %385, %386 : vector<5x1xf32>
    %388 = vector.broadcast %387 : vector<5x1xf32> to vector<5x64xf32>
    %389 = arith.subf %381, %388 : vector<5x64xf32>
    %390 = arith.mulf %389, %389 : vector<5x64xf32>
    %cst_165 = arith.constant dense<0.000000e+00> : vector<5xf32>
    %391 = vector.multi_reduction <add>, %390, %cst_165 [1] : vector<5x64xf32> to vector<5xf32>
    %392 = vector.shape_cast %391 : vector<5xf32> to vector<5x1xf32>
    %cst_166 = arith.constant 6.400000e+01 : f32
    %393 = vector.broadcast %cst_166 : f32 to vector<5x1xf32>
    %394 = arith.divf %392, %393 : vector<5x1xf32>
    %395 = vector.broadcast %387 : vector<5x1xf32> to vector<5x64xf32>
    %396 = arith.subf %381, %395 : vector<5x64xf32>
    %cst_167 = arith.constant 9.99999997E-7 : f32
    %397 = vector.broadcast %cst_167 : f32 to vector<5x1xf32>
    %398 = arith.addf %394, %397 : vector<5x1xf32>
    %399 = math.rsqrt %398 : vector<5x1xf32>
    %400 = vector.broadcast %399 : vector<5x1xf32> to vector<5x64xf32>
    %401 = arith.mulf %396, %400 : vector<5x64xf32>
    %402 = vector.broadcast %382 : vector<1x64xf32> to vector<5x64xf32>
    %403 = arith.mulf %401, %402 : vector<5x64xf32>
    %404 = vector.broadcast %383 : vector<1x64xf32> to vector<5x64xf32>
    %405 = arith.addf %403, %404 : vector<5x64xf32>
    %406 = vector.extract_strided_slice %405 {offsets = [1, 0], sizes = [4, 64], strides = [1, 1]} : vector<5x64xf32> to vector<4x64xf32>
    %407 = vector.extract_strided_slice %406 {offsets = [0, 0], sizes = [2, 64], strides = [1, 1]} : vector<4x64xf32> to vector<2x64xf32>
    %408 = vector.extract_strided_slice %406 {offsets = [2, 0], sizes = [2, 64], strides = [1, 1]} : vector<4x64xf32> to vector<2x64xf32>
    %409 = tpu.concatenate %407, %408 in 1 : vector<2x64xf32>, vector<2x64xf32> -> vector<2x128xf32>
    %c0_168 = arith.constant 0 : index
    %c0_169 = arith.constant 0 : index
    %c0_170 = arith.constant 0 : index
    %410 = vector.load %arg20[%c0_168, %c0_169, %c0_170] : memref<1x2x128xf32, #tpu.memory_space<vmem>>, vector<1x2x128xf32>
    %411 = vector.shape_cast %410 : vector<1x2x128xf32> to vector<2x128xf32>
    %412 = vector.shape_cast %409 : vector<2x128xf32> to vector<1x2x128xf32>
    tpu.vector_store %arg20[%c0_168, %c0_169, %c0_170], %412 {strides = array<i32>} : memref<1x2x128xf32, #tpu.memory_space<vmem>>, vector<1x2x128xf32>,
    %cst_171 = arith.constant dense<0.000000e+00> : vector<128xf32>
    %413 = vector.multi_reduction <add>, %409, %cst_171 [0] : vector<2x128xf32> to vector<128xf32>
    %414 = vector.shape_cast %413 : vector<128xf32> to vector<1x128xf32>
    %c0_172 = arith.constant 0 : index
    %c0_173 = arith.constant 0 : index
    %c0_174 = arith.constant 0 : index
    %415 = vector.load %arg21[%c0_172, %c0_173, %c0_174] : memref<1x1x128xf32, #tpu.memory_space<vmem>>, vector<1x1x128xf32>
    %416 = vector.shape_cast %415 : vector<1x1x128xf32> to vector<1x128xf32>
    %417 = vector.shape_cast %414 : vector<1x128xf32> to vector<1x1x128xf32>
    tpu.vector_store %arg21[%c0_172, %c0_173, %c0_174], %417 {strides = array<i32>} : memref<1x1x128xf32, #tpu.memory_space<vmem>>, vector<1x1x128xf32>,
    return
  }
  func.func @transform_0(%arg0: i32) -> (i32, i32, i32) {
    %c0_i32 = arith.constant 0 : i32
    %c0_i32_0 = arith.constant 0 : i32
    %c0_i32_1 = arith.constant 0 : i32
    return %arg0, %c0_i32, %c0_i32_0 : i32, i32, i32
  }
  func.func @transform_1(%arg0: i32) -> (i32, i32, i32) {
    %c0_i32 = arith.constant 0 : i32
    %c0_i32_0 = arith.constant 0 : i32
    %c0_i32_1 = arith.constant 0 : i32
    %c0_i32_2 = arith.constant 0 : i32
    return %c0_i32, %c0_i32_0, %c0_i32_1 : i32, i32, i32
  }
  func.func @transform_2(%arg0: i32) -> (i32, i32, i32) {
    %c0_i32 = arith.constant 0 : i32
    %c0_i32_0 = arith.constant 0 : i32
    %c0_i32_1 = arith.constant 0 : i32
    %c0_i32_2 = arith.constant 0 : i32
    return %c0_i32, %c0_i32_0, %c0_i32_1 : i32, i32, i32
  }
  func.func @transform_3(%arg0: i32) -> (i32, i32) {
    %c0_i32 = arith.constant 0 : i32
    %c0_i32_0 = arith.constant 0 : i32
    %c0_i32_1 = arith.constant 0 : i32
    return %c0_i32, %c0_i32_0 : i32, i32
  }
  func.func @transform_4(%arg0: i32) -> (i32, i32) {
    %c0_i32 = arith.constant 0 : i32
    %c0_i32_0 = arith.constant 0 : i32
    %c0_i32_1 = arith.constant 0 : i32
    return %c0_i32, %c0_i32_0 : i32, i32
  }
  func.func @transform_5(%arg0: i32) -> (i32, i32, i32) {
    %c0_i32 = arith.constant 0 : i32
    %c0_i32_0 = arith.constant 0 : i32
    %c0_i32_1 = arith.constant 0 : i32
    %c0_i32_2 = arith.constant 0 : i32
    return %c0_i32, %c0_i32_0, %c0_i32_1 : i32, i32, i32
  }
  func.func @transform_6(%arg0: i32) -> (i32, i32, i32) {
    %c0_i32 = arith.constant 0 : i32
    %c0_i32_0 = arith.constant 0 : i32
    %c0_i32_1 = arith.constant 0 : i32
    %c0_i32_2 = arith.constant 0 : i32
    return %c0_i32, %c0_i32_0, %c0_i32_1 : i32, i32, i32
  }
  func.func @transform_7(%arg0: i32) -> (i32, i32, i32) {
    %c0_i32 = arith.constant 0 : i32
    %c0_i32_0 = arith.constant 0 : i32
    %c0_i32_1 = arith.constant 0 : i32
    %c0_i32_2 = arith.constant 0 : i32
    return %c0_i32, %c0_i32_0, %c0_i32_1 : i32, i32, i32
  }
  func.func @transform_8(%arg0: i32) -> (i32, i32, i32) {
    %c0_i32 = arith.constant 0 : i32
    %c0_i32_0 = arith.constant 0 : i32
    %c0_i32_1 = arith.constant 0 : i32
    %c0_i32_2 = arith.constant 0 : i32
    return %c0_i32, %c0_i32_0, %c0_i32_1 : i32, i32, i32
  }
  func.func @transform_9(%arg0: i32) -> (i32, i32, i32) {
    %c0_i32 = arith.constant 0 : i32
    %c0_i32_0 = arith.constant 0 : i32
    %c0_i32_1 = arith.constant 0 : i32
    %c0_i32_2 = arith.constant 0 : i32
    return %c0_i32, %c0_i32_0, %c0_i32_1 : i32, i32, i32
  }
  func.func @transform_10(%arg0: i32) -> (i32, i32, i32) {
    %c0_i32 = arith.constant 0 : i32
    %c0_i32_0 = arith.constant 0 : i32
    %c0_i32_1 = arith.constant 0 : i32
    %c0_i32_2 = arith.constant 0 : i32
    return %c0_i32, %c0_i32_0, %c0_i32_1 : i32, i32, i32
  }
  func.func @transform_11(%arg0: i32) -> (i32, i32, i32) {
    %c0_i32 = arith.constant 0 : i32
    %c0_i32_0 = arith.constant 0 : i32
    %c0_i32_1 = arith.constant 0 : i32
    %c0_i32_2 = arith.constant 0 : i32
    return %c0_i32, %c0_i32_0, %c0_i32_1 : i32, i32, i32
  }
  func.func @transform_12(%arg0: i32) -> (i32, i32, i32) {
    %c0_i32 = arith.constant 0 : i32
    %c0_i32_0 = arith.constant 0 : i32
    %c0_i32_1 = arith.constant 0 : i32
    %c0_i32_2 = arith.constant 0 : i32
    return %c0_i32, %c0_i32_0, %c0_i32_1 : i32, i32, i32
  }
  func.func @transform_13(%arg0: i32) -> (i32, i32, i32) {
    %c0_i32 = arith.constant 0 : i32
    %c0_i32_0 = arith.constant 0 : i32
    %c0_i32_1 = arith.constant 0 : i32
    %c0_i32_2 = arith.constant 0 : i32
    return %c0_i32, %c0_i32_0, %c0_i32_1 : i32, i32, i32
  }
  func.func @transform_14(%arg0: i32) -> (i32, i32, i32) {
    %c0_i32 = arith.constant 0 : i32
    %c0_i32_0 = arith.constant 0 : i32
    %c0_i32_1 = arith.constant 0 : i32
    %c0_i32_2 = arith.constant 0 : i32
    return %c0_i32, %c0_i32_0, %c0_i32_1 : i32, i32, i32
  }
  func.func @transform_15(%arg0: i32) -> (i32, i32, i32) {
    %c0_i32 = arith.constant 0 : i32
    %c0_i32_0 = arith.constant 0 : i32
    %c0_i32_1 = arith.constant 0 : i32
    %c0_i32_2 = arith.constant 0 : i32
    return %c0_i32, %c0_i32_0, %c0_i32_1 : i32, i32, i32
  }
  func.func @transform_16(%arg0: i32) -> (i32, i32, i32) {
    %c0_i32 = arith.constant 0 : i32
    %c0_i32_0 = arith.constant 0 : i32
    %c0_i32_1 = arith.constant 0 : i32
    %c0_i32_2 = arith.constant 0 : i32
    return %c0_i32, %c0_i32_0, %c0_i32_1 : i32, i32, i32
  }
  func.func @transform_17(%arg0: i32) -> (i32, i32) {
    %c0_i32 = arith.constant 0 : i32
    %c0_i32_0 = arith.constant 0 : i32
    %c0_i32_1 = arith.constant 0 : i32
    return %c0_i32, %c0_i32_0 : i32, i32
  }
  func.func @transform_18(%arg0: i32) -> (i32, i32) {
    %c0_i32 = arith.constant 0 : i32
    %c0_i32_0 = arith.constant 0 : i32
    %c0_i32_1 = arith.constant 0 : i32
    return %c0_i32, %c0_i32_0 : i32, i32
  }
  func.func @transform_19(%arg0: i32) -> (i32, i32, i32) {
    %c0_i32 = arith.constant 0 : i32
    %c0_i32_0 = arith.constant 0 : i32
    %c0_i32_1 = arith.constant 0 : i32
    return %arg0, %c0_i32, %c0_i32_0 : i32, i32, i32
  }
  func.func @transform_20(%arg0: i32) -> (i32, i32, i32) {
    %c0_i32 = arith.constant 0 : i32
    %c0_i32_0 = arith.constant 0 : i32
    %c0_i32_1 = arith.constant 0 : i32
    return %arg0, %c0_i32, %c0_i32_0 : i32, i32, i32
  }
}

</mosaic_0001>

<bundles_post_ra>
// kernel: _lambda_.2
= control target key start
LH: loop header
LB: loop body
LE: loop exit
PB: predicated region body
PF: predicated region fallthrough
CT: control target
= control target key end

     0   :  { %s4196_s0 = inlined_call_operand.vmem [shape: f32[2,8,64], index: 0, kind: input, shape index: {}]   ;;  %s4197_s1 = inlined_call_operand.vmem [shape: f32[1,1,64], index: 1, kind: input, shape index: {}]   ;;  %s4198_s2 = inlined_call_operand.vmem [shape: f32[1,8,64], index: 2, kind: input, shape index: {}]   ;;  %s4199_s3 = inlined_call_operand.vmem [shape: bf16[64,64], index: 3, kind: input, shape index: {}]   ;;  %s4200_s4 = inlined_call_operand.vmem [shape: f32[1,64], index: 4, kind: input, shape index: {}]   ;;  %s4201_s5 = inlined_call_operand.vmem [shape: f32[2,1,64], index: 5, kind: input, shape index: {}]   ;;  %s4202_s6 = inlined_call_operand.vmem [shape: f32[2,1,64], index: 6, kind: input, shape index: {}]   ;;  %s4203_s7 = inlined_call_operand.vmem [shape: bf16[2,64,192], index: 7, kind: input, shape index: {}]   ;;  %s4204_s8 = inlined_call_operand.vmem [shape: f32[2,1,192], index: 8, kind: input, shape index: {}]   ;;  %s4205_s9 = inlined_call_operand.vmem [shape: bf16[2,64,64], index: 9, kind: input, shape index: {}]   ;;  %s4206_s10 = inlined_call_operand.vmem [shape: f32[2,1,64], index: 10, kind: input, shape index: {}]   ;;  %s4207_s11 = inlined_call_operand.vmem [shape: f32[2,1,64], index: 11, kind: input, shape index: {}]   ;;  %s4208_s12 = inlined_call_operand.vmem [shape: f32[2,1,64], index: 12, kind: input, shape index: {}]   ;;  %s4209_s13 = inlined_call_operand.vmem [shape: bf16[2,64,256], index: 13, kind: input, shape index: {}]   ;;  %s4210_s14 = inlined_call_operand.vmem [shape: f32[2,1,256], index: 14, kind: input, shape index: {}]   ;;  %s4211_s15 = inlined_call_operand.vmem [shape: bf16[2,256,64], index: 15, kind: input, shape index: {}]   ;;  %s4212_s16 = inlined_call_operand.vmem [shape: f32[2,1,64], index: 16, kind: input, shape index: {}]   ;;  %s4213_s17 = inlined_call_operand.vmem [shape: f32[1,64], index: 17, kind: input, shape index: {}]   ;;  %s4214_s18 = inlined_call_operand.vmem [shape: f32[1,64], index: 18, kind: input, shape index: {}]   ;;  %s4215_s19 = inlined_call_operand.hbm [shape: f32[2,4,128], index: 19, kind: output, shape index: {0}]   ;;  %s4216_s20 = inlined_call_operand.vmem [shape: f32[2,1,128], index: 20, kind: output, shape index: {1}]  }
   0x1   :  { %4235 = sst [smem:[#allocation12_spill]] %s4196_s0 }
   0x2   :  { %4236 = sst [smem:[#allocation13_spill]] %s4197_s1 }
   0x3   :  { %4237 = sst [smem:[#allocation14_spill]] %s4198_s2 }
   0x4   :  { %4238 = sst [smem:[#allocation15_spill]] %s4199_s3 }
   0x5   :  { %4239 = sst [smem:[#allocation16_spill]] %s4200_s4 }
   0x6   :  { %4240 = sst [smem:[#allocation17_spill]] %s4216_s20 }
   0x7   :  { %26 = vsyncpa [#allocation3], 0 }
   0x8   :  { %28 = vsyncpa [#allocation3 + $0x1], 0  ;;  %s3458_s1 = smov 0   ;;  %s3460_s22 = smov 0  }
   0x9   :  { %s3462_s23 = smov 0   ;;  %s3464_s24 = smov 0  }
   0xa LB: > { %4241 = sst [smem:[#allocation5_spill]] %s3330_s1  ;;  %s3479_s2 = sadd.s32 4294967295, %s3342_s24   ;;  %s3342_s24 = sphi %s3464_s24, %s4265_s24   ;;  %s3338_s23 = sphi %s3462_s23, %s4267_s23   ;;  %s3334_s22 = sphi %s3460_s22, %s4269_s22   ;;  %s3330_s1 = sphi %s3458_s1, %s4268_s1  }
   0xb   : > { %4242 = sst [smem:[#allocation6_spill]] %s3338_s23  ;;  %s2604_s25 = sadd.s32 4294967294, %s3342_s24  }
   0xc   : > { %4243 = sst [smem:[#allocation7_spill]] %s3342_s24  ;;  %s3483_s3 = sadd.s32 1, %s3342_s24  }
   0xd   : > { %4244 = sst [smem:[#allocation8_spill]] %s3483_s3  ;;  %s445_s26 = sadd.s32 1, %s3338_s23 }
   0xe   : > { %s442_s27 = ssub.s32 %s3342_s24, %s3483_s3  ;;  %p455_p0 = scmp.ne.s32.totalorder %s3338_s23, %s3334_s22 }
   0xf   : > { %p443_p1 = scmp.eq.s32.totalorder %s442_s27, 0  ;;  %p456_p2 = scmp.eq.s32.totalorder %s3479_s2, 1 }
  0x10   : > { %p461_p3 = scmp.ne.s32.totalorder %s3334_s22, %s3330_s1  ;;  %p462_p4 = scmp.eq.s32.totalorder %s2604_s25, 1 }
  0x11   : > { %s3494_s28 = scalar_select %p443_p1, %s3338_s23, %s445_s26  }
  0x12   : > { %p3496_p5 = por %p456_p2, %p455_p0  ;;  %p3500_p6 = por %p462_p4, %p461_p3 }
  0x13   : > { %4245 = sst [smem:[#allocation9_spill]] %s3494_s28  ;;  %p2607_p7 = scmp.ge.s32.totalorder %s3342_s24, 1 }
  0x14   : > { %s4247_s29 = scalar_select %p3500_p6, 1, 0 }
  0x15   : > { %p567_p8 = scmp.lt.s32.totalorder %s3342_s24, 3 }
  0x16   : > { %4248 = sst [smem:[#allocation10_spill]] %s4247_s29 }
  0x17   : > { %p568_p9 = pnand %p2607_p7, %p567_p8 }
  0x19   : > { %571 = sbr.rel (%p568_p9) target bundleno = 4464 (0x1170), region = 96 }
  0x1e   : > { %s4249_s21 = sld [smem:[#allocation15_spill]]  ;;  %p627_p10 = scmp.lt.s32.totalorder %s3479_s2, 1  ;;  %vm673_vm0 = vcmask 523264   ;;  %vm696_vm1 = vcmask 1040384   ;;  %vm703_vm2 = vcmask 516096   ;;  %v3344_v17 = vmov 64.0  }
  0x1f   : > { %s4251_s0 = sld [smem:[#allocation12_spill]]  ;;  %3178 = vrcp.f32 %v3344_v17  ;;  %v2653_v34 = vld [vmem:[%s4203_s7 + $0x30] sm:$0xf]  ;;  %v3020_v35 = vld [vmem:[%s4203_s7 + $0x34] sm:$0xf0]  ;;  %vm905_vm10 = vcmask 1043456  }
  0x20   : > { %s3514_s27 = scalar_select %p627_p10, %s3479_s2, 1  ;;  %v3019_v36 = vld [vmem:[%s4203_s7 + $0x34] sm:$0xf]  ;;  %v2654_v37 = vor.u32 %v3020_v35, %v2653_v34  ;;  %v2655_v38 = vld [vmem:[%s4203_s7 + $0x38] sm:$0xf0]  ;;  %vm906_vm11 = vcmask 1044480  }
  0x21   : > { %s4253_s29 = sld [smem:[#allocation14_spill]]  ;;  %v2658_v39 = vor.u32 %v3019_v36, %v2655_v38  ;;  %v2645_v40 = vld [vmem:[%s4203_s7 + $0x20] sm:$0xf]  ;;  %v3018_v41 = vld [vmem:[%s4203_s7 + $0x24] sm:$0xf0]  ;;  %s4231_s30 = smov 32  }
  0x22   : > { %4250 = sst [smem:[#allocation11_spill]] %s3514_s27  ;;  %s2609_s28 = sshll.u32 %s3514_s27, 3  ;;  %824 = vmatpush.bf16.msra.mxu1 %v2654_v37  ;;  %v3017_v42 = vld [vmem:[%s4203_s7 + $0x24] sm:$0xf]  ;;  %v2646_v43 = vor.u32 %v3018_v41, %v2645_v40  ;;  %v2647_v44 = vld [vmem:[%s4203_s7 + $0x28] sm:$0xf0] }
  0x23   : > { %s4252_s27 = sld [smem:[#allocation16_spill]]  ;;  %838 = vmatpush.bf16.msra.mxu2 %v2658_v39  ;;  %v2650_v45 = vor.u32 %v3017_v42, %v2647_v44  ;;  %v2637_v46 = vld [vmem:[%s4203_s7 + $0x10] sm:$0xf]  ;;  %v3016_v47 = vld [vmem:[%s4203_s7 + $0x14] sm:$0xf0]  ;;  %v3347_v38 = vmov 65535  }
  0x24   : > { %v3012_v0 = vld [vmem:[%s4249_s21 + $0x18] sm:$0xff]  ;;  %v3011_v1 = vld [vmem:[%s4249_s21 + $0x10] sm:$0xff]  ;;  %v3010_v2 = vld [vmem:[%s4249_s21 + $0x8] sm:$0xff]  ;;  %s4254_s24 = sld [smem:[#allocation13_spill]]  ;;  %v2638_v49 = vor.u32 %v3016_v47, %v2637_v46  ;;  %v907_v39 = vsel %vm905_vm10, 4294967295, %v3347_v38  ;;  %s4233_s25 = smov 112  }
  0x25   : > { %681 = vmatpush.bf16.msra.mxu0 %v3012_v0  ;;  %s630_s1 = scalar_lea.vmem %s4251_s0, %s2609_s28  ;;  %v3009_v3 = vld [vmem:[%s4249_s21] sm:$0xff]  ;;  %v3179_v18 = vpop.eup %3178  ;;  %v3015_v48 = vld [vmem:[%s4203_s7 + $0x14] sm:$0xf]  ;;  %v2639_v50 = vld [vmem:[%s4203_s7 + $0x18] sm:$0xf0]  ;;  %s3346_s0 = smov 64  }
  0x26   : > { %v635_v4 = vld [vmem:[%s630_s1] sm:$0xff]  ;;  %v708_v19 = vmul.f32 64.0, %v3179_v18  ;;  %vm712_vm3 = vweird.f32 %v3179_v18  ;;  %825 = vmatpush.bf16.msra.mxu1 %v2646_v43  ;;  %v2642_v51 = vor.u32 %v3015_v48, %v2639_v50  ;;  %v3014_v53 = vld [vmem:[%s4203_s7 + $0x4] sm:$0xf0]  ;;  %v2631_v57 = vld [vmem:[%s4203_s7 + $0x8] sm:$0xf0] }
  0x27   : > { %v636_v5 = vpack.c.bf16 %v635_v4, %v635_v4  ;;  %v690_v8 = vld [vmem:[%s4253_s29] sm:$0xff]  ;;  %839 = vmatpush.bf16.msra.mxu2 %v2650_v45  ;;  %v3628_v43 = vsel %vm906_vm11, %v907_v39, 0  ;;  %s3349_s26 = smov 48   ;;  %s4229_s23 = smov 96   ;;  %vm855_vm12 = vcmask 130048   ;;  %vm876_vm13 = vcmask 72704  }
  0x28   : > { %v709_v20 = vsub.f32 1.0, %v708_v19  ;;  %v2629_v52 = vld [vmem:[%s4203_s7] sm:$0xf]  ;;  %v3013_v54 = vld [vmem:[%s4203_s7 + $0x4] sm:$0xf]  ;;  %s4227_s3 = smov 16  }
  0x29   : > { %682 = vmatpush.bf16.msra.mxu0 %v3011_v1  ;;  %v3163_v6 = vld [vmem:[%s4252_s27] ss:$0 sm:$0xff]  ;;  %v2630_v56 = vor.u32 %v3014_v53, %v2629_v52  ;;  %v2634_v59 = vor.u32 %v3013_v54, %v2631_v57  ;;  %s4225_s29 = smov 80   ;;  %vm880_vm14 = vcmask 65536   ;;  %vm1161_vm15 = vcmask 261120   ;;  %s4256_s28 = smov 32  }
  0x2a   : > { %v692_v11 = vld [vmem:[%s4254_s24] sm:$0x1]  ;;  %v710_v21 = vmul.f32 %v3179_v18, %v709_v20  ;;  %826 = vmatpush.bf16.msra.mxu1 %v2638_v49  ;;  %s4257_s20 = smov 96   ;;  %s4258_s24 = smov 16  }
  0x2b   : > { %840 = vmatpush.bf16.msra.mxu2 %v2642_v51  ;;  %v3165_v20 = vld [vmem:[%s4202_s6] ss:$0 sm:$0xff]  ;;  %s4259_s1 = smov 80  }
  0x2c   : > { %v711_v22 = vadd.f32 %v3179_v18, %v710_v21 }
  0x2d   : > { %683 = vmatpush.bf16.msra.mxu0 %v3010_v2 }
  0x2e   : > { %v3545_v23 = vsel %vm712_vm3, %v3179_v18, %v711_v22  ;;  %827 = vmatpush.bf16.msra.mxu1 %v2630_v56 }
  0x2f   : > { %841 = vmatpush.bf16.msra.mxu2 %v2634_v59 }
  0x31   : > { %684 = vmatpush.bf16.msra.mxu0 %v3009_v3 }
  0x34   : > { %2626 = vmatmul.msk.bf16.vlgmr.msra.gmra.mxu0 %vm673_vm0, %v636_v5 }
  0xb1   : > { %v686_v7 = vpop.f32.mrf.mxu0 }
  0xb2   : > { %v687_v9 = vadd.f32 %v3163_v6, %v686_v7 }
  0xb4   : > { %v691_v10 = vadd.f32 %v690_v8, %v687_v9 }
  0xb6   : > { %v3536_v12 = vrot.slane %v691_v10, 7 }
  0xb8   : > { %v3539_v13 = vsel %vm696_vm1, %v692_v11, %v3536_v12  ;;  %v704_v16 = vsel %vm703_vm2, %v3536_v12, 0.0  ;;  %vm1164_vm1 = vcmask 392192  }
  0xb9   : > { %v688_v14 = vpop.f32.mrf.mxu0  ;;  %v700_v15 = vsel %vm673_vm0, %v3539_v13, 0.0 }
  0xba   : > { %701 = vadd.xlane.f32.xlu0 %v700_v15  ;;  %v3164_v15 = vld [vmem:[%s4201_s5] ss:$0 sm:$0xff] }
  0xc2   : > { %705 = vadd.xlane.f32.xlu0 %v704_v16 }
 0x12d   : > { %v702_v24 = vpop.xlane.xlu0 %701 }
 0x12e   : > { %v714_v25 = vmul.f32 %v3545_v23, %v702_v24 }
 0x130   : > { %v3549_v26 = vsub.f32 %v3539_v13, %v714_v25 }
 0x132   : > { %v718_v27 = vmul.f32 %v3549_v26, %v3549_v26 }
 0x134   : > { %v720_v28 = vsel %vm673_vm0, %v718_v27, 0.0 }
 0x135   : > { %721 = vadd.xlane.f32.xlu1 %v720_v28  ;;  %v706_v29 = vpop.xlane.xlu0 %705 }
 0x136   : > { %v715_v30 = vmul.f32 %v3545_v23, %v706_v29 }
 0x138   : > { %v3556_v31 = vsub.f32 %v3536_v12, %v715_v30 }
 0x13a   : > { %v719_v32 = vmul.f32 %v3556_v31, %v3556_v31 }
 0x13c   : > { %v723_v33 = vsel %vm703_vm2, %v719_v32, 0.0 }
 0x13d   : > { %724 = vadd.xlane.f32.xlu1 %v723_v33 }
 0x1a8   : > { %v722_v55 = vpop.xlane.xlu1 %721 }
 0x1a9   : > { %v726_v58 = vmul.f32 %v722_v55, %v3545_v23 }
 0x1ab   : > { %v728_v60 = vadd.f32 1e-06, %v726_v58 }
 0x1ad   : > { %3180 = vrsqrt.f32 %v728_v60  ;;  %vm736_vm5 = vweird.f32 %v728_v60 }
 0x1b0   : > { %v725_v61 = vpop.xlane.xlu1 %724 }
 0x1b1   : > { %v727_v62 = vmul.f32 %v725_v61, %v3545_v23 }
 0x1b3   : > { %v3181_v63 = vpop.eup %3180  ;;  %v729_v0 = vadd.f32 1e-06, %v727_v62 }
 0x1b4   : > { %v731_v1 = vmul.f32 %v3181_v63, %v728_v60  ;;  %vm737_vm4 = vweird.f32 %v3181_v63 }
 0x1b5   : > { %3182 = vrsqrt.f32 %v729_v0  ;;  %vm738_vm6 = vmor %vm736_vm5, %vm737_vm4  ;;  %vm746_vm8 = vweird.f32 %v729_v0 }
 0x1b6   : > { %v732_v2 = vmul.f32 %v3181_v63, %v731_v1 }
 0x1b8   : > { %v733_v3 = vmul.f32 0.5, %v732_v2 }
 0x1ba   : > { %v734_v4 = vsub.f32 1.5, %v733_v3 }
 0x1bb   : > { %v3183_v5 = vpop.eup %3182 }
 0x1bc   : > { %v735_v6 = vmul.f32 %v3181_v63, %v734_v4  ;;  %v741_v7 = vmul.f32 %v3183_v5, %v729_v0  ;;  %vm747_vm7 = vweird.f32 %v3183_v5 }
 0x1bd   : > { %vm748_vm9 = vmor %vm746_vm8, %vm747_vm7 }
 0x1be   : > { %v742_v8 = vmul.f32 %v3183_v5, %v741_v7  ;;  %v739_v9 = vsel %vm738_vm6, %v3181_v63, %v735_v6 }
 0x1bf   : > { %v750_v14 = vmul.f32 %v739_v9, %v3549_v26  ;;  %v771_v26 = vld [vmem:[%s4204_s8] sm:$0x3] }
 0x1c0   : > { %v743_v10 = vmul.f32 0.5, %v742_v8  ;;  %v773_v28 = vperm.slane %v771_v26, 0  ;;  %v774_v34 = vperm.slane %v771_v26, 1 }
 0x1c1   : > { %v755_v19 = vmul.f32 %v3164_v15, %v750_v14 }
 0x1c2   : > { %v744_v11 = vsub.f32 1.5, %v743_v10 }
 0x1c3   : > { %v760_v22 = vadd.f32 %v3165_v20, %v755_v19 }
 0x1c4   : > { %v745_v16 = vmul.f32 %v3183_v5, %v744_v11 }
 0x1c6   : > { %v749_v17 = vsel %vm748_vm9, %v3183_v5, %v745_v16 }
 0x1c7   : > { %v751_v18 = vmul.f32 %v749_v17, %v3556_v31 }
 0x1c9   : > { %v756_v21 = vmul.f32 %v3164_v15, %v751_v18 }
 0x1cb   : > { %v761_v24 = vadd.f32 %v3165_v20, %v756_v21 }
 0x1cd   : > { %v762_v25 = vpack.c.bf16 %v761_v24, %v760_v22 }
 0x1cf   : > { %2659 = vmatmul.msk.bf16.vlgmr.msra.gmra.mxu1 %vm673_vm0, %v762_v25  ;;  %2660 = vmatmul.msk.bf16.vlgmr.msra.gmra.mxu2 %vm673_vm0, %v762_v25 }
 0x24c   : > { %v829_v27 = vpop.f32.mrf.mxu1 }
 0x24d   : > { %v830_v30 = vadd.f32 %v829_v27, %v773_v28 }
 0x24f   : > { %v848_v33 = vmul.f32 0.25, %v830_v30 }
 0x252   : > { %v843_v29 = vpop.f32.mrf.mxu2 }
 0x253   : > { %v844_v41 = vadd.f32 %v843_v29, %v774_v34 }
 0x254   : > { %v831_v31 = vpop.f32.mrf.mxu1 }
 0x255   : > { %v832_v32 = vadd.f32 %v831_v31, %v773_v28 }
 0x257   : > { %v849_v35 = vmul.f32 0.25, %v832_v32  ;;  %v851_v36 = vpack.c.bf16 %v832_v32, %v830_v30 }
 0x259   : > { %v850_v37 = vpack.c.bf16 %v849_v35, %v848_v33  ;;  %999 = vrot.lane.b32.xlu0 %v851_v36, %s4231_s30  ;;  %853 = vrot.lane.b32.xlu2 %v851_v36, %s3346_s0 }
 0x25a   : > { %v845_v40 = vpop.f32.mrf.mxu2 }
 0x25b   : > { %v846_v42 = vadd.f32 %v845_v40, %v774_v34  ;;  %927 = vrot.lane.b32.xlu1 %v850_v37, %s4233_s25 }
 0x25d   : > { %v3630_v44 = vpack.c.bf16 %v846_v42, %v844_v41 }
 0x25f   : > { %v910_v45 = vand.u32 %v3628_v43, %v3630_v44 }
 0x261   : > { %919 = vmatpush.bf16.msra.mxu3 %v910_v45  ;;  %929 = vrot.lane.b32.xlu2 %v851_v36, %s3349_s26 }
 0x269   : > { %997 = vrot.lane.b32.xlu2 %v850_v37, %s4229_s23 }
 0x271   : > { %1068 = vrot.lane.b32.xlu2 %v851_v36, %s4227_s3 }
 0x279   : > { %1066 = vrot.lane.b32.xlu2 %v850_v37, %s4225_s29 }
 0x2b3   : > { %v854_v46 = vpop.permute.xlu2 %853 }
 0x2b4   : > { %v860_v47 = vsel %vm855_vm12, %v854_v46, 0 }
 0x2b5   : > { %869 = vmatpush.bf16.xpose.msrb.mxu0 %v860_v47 }
 0x2bb   : > { %v930_v48 = vpop.permute.xlu2 %929 }
 0x2bc   : > { %v935_v49 = vsel %vm855_vm12, %v930_v48, 0  ;;  %2661 = vmatmul.msk.bf16.vlgmr.msrb.gmra.mxu0 %vm855_vm12, %v850_v37 }
 0x2bd   : > { %944 = vmatpush.bf16.xpose.msra.mxu0 %v935_v49 }
 0x2c3   : > { %v998_v50 = vpop.permute.xlu2 %997 }
 0x2cb   : > { %v1000_v51 = vpop.permute.xlu0 %999  ;;  %v1069_v52 = vpop.permute.xlu2 %1068 }
 0x2cc   : > { %v1074_v53 = vsel %vm855_vm12, %v1069_v52, 0  ;;  %v1005_v54 = vsel %vm855_vm12, %v1000_v51, 0 }
 0x2cd   : > { %1014 = vmatpush.bf16.xpose.msrb.mxu2 %v1005_v54  ;;  %v928_v55 = vpop.permute.xlu1 %927  ;;  %1083 = vmatpush.bf16.xpose.msrb.mxu0 %v1074_v53 }
 0x2ce   : > { %2663 = vmatmul.msk.bf16.vlgmr.msra.gmra.mxu0 %vm855_vm12, %v928_v55 }
 0x2d3   : > { %v1067_v56 = vpop.permute.xlu2 %1066 }
 0x2d4   : > { %2665 = vmatmul.msk.bf16.vlgmr.msrb.gmra.mxu2 %vm855_vm12, %v998_v50 }
 0x2de   : > { %2667 = vmatmul.msk.bf16.vlgmr.msrb.gmra.mxu0 %vm855_vm12, %v1067_v56 }
 0x339   : > { %v871_v57 = vpop.f32.mrf.mxu0 }
 0x33a   : > { %v877_v58 = vsel %vm876_vm13, %v871_v57, -inf }
 0x33b   : > { %878 = vmax.xlane.f32.xlu0 %v877_v58 }
 0x341   : > { %v873_v59 = vpop.f32.mrf.mxu0 }
 0x342   : > { %v881_v60 = vsel %vm880_vm14, %v873_v59, -inf }
 0x343   : > { %882 = vmax.xlane.f32.xlu2 %v881_v60 }
 0x34b   : > { %v946_v61 = vpop.f32.mrf.mxu0 }
 0x34c   : > { %v951_v62 = vsel %vm876_vm13, %v946_v61, -inf }
 0x34d   : > { %952 = vmax.xlane.f32.xlu1 %v951_v62 }
 0x353   : > { %v948_v63 = vpop.f32.mrf.mxu0 }
 0x354   : > { %v954_v0 = vsel %vm880_vm14, %v948_v63, -inf }
 0x355   : > { %955 = vmax.xlane.f32.xlu0 %v954_v0 }
 0x357   : > { %v1016_v1 = vpop.f32.mrf.mxu2 }
 0x358   : > { %v1021_v2 = vsel %vm876_vm13, %v1016_v1, -inf }
 0x359   : > { %1022 = vmax.xlane.f32.xlu2 %v1021_v2 }
 0x35b   : > { %v1085_v3 = vpop.f32.mrf.mxu0 }
 0x35c   : > { %v1090_v4 = vsel %vm876_vm13, %v1085_v3, -inf }
 0x35d   : > { %1091 = vmax.xlane.f32.xlu0 %v1090_v4 }
 0x35f   : > { %v1018_v5 = vpop.f32.mrf.mxu2 }
 0x360   : > { %v1024_v6 = vsel %vm880_vm14, %v1018_v5, -inf }
 0x361   : > { %1025 = vmax.xlane.f32.xlu1 %v1024_v6 }
 0x363   : > { %v1087_v7 = vpop.f32.mrf.mxu0 }
 0x364   : > { %v1093_v8 = vsel %vm880_vm14, %v1087_v7, -inf }
 0x365   : > { %1094 = vmax.xlane.f32.xlu2 %v1093_v8 }
 0x3ae   : > { %v879_v9 = vpop.xlane.xlu0 %878 }
 0x3af   : > { %v884_v10 = vsub.f32 %v871_v57, %v879_v9 }
 0x3b1   : > { %v886_v11 = vmul.f32 1.442695, %v884_v10 }
 0x3b3   : > { %3184 = vpow2.f32 %v886_v11 }
 0x3b6   : > { %v883_v14 = vpop.xlane.xlu2 %882 }
 0x3b7   : > { %v885_v15 = vsub.f32 %v873_v59, %v883_v14 }
 0x3b9   : > { %v3185_v16 = vpop.eup %3184  ;;  %v888_v17 = vmul.f32 1.442695, %v885_v15 }
 0x3ba   : > { %v890_v18 = vsel %vm876_vm13, %v3185_v16, 0.0 }
 0x3bb   : > { %3186 = vpow2.f32 %v888_v17  ;;  %891 = vadd.xlane.f32.xlu1 %v890_v18 }
 0x3c0   : > { %v953_v21 = vpop.xlane.xlu1 %952 }
 0x3c1   : > { %v3187_v19 = vpop.eup %3186  ;;  %v957_v25 = vsub.f32 %v946_v61, %v953_v21 }
 0x3c2   : > { %v893_v20 = vsel %vm880_vm14, %v3187_v19, 0.0 }
 0x3c3   : > { %894 = vadd.xlane.f32.xlu0 %v893_v20  ;;  %v959_v28 = vmul.f32 1.442695, %v957_v25 }
 0x3c8   : > { %v956_v27 = vpop.xlane.xlu0 %955 }
 0x3c9   : > { %v958_v32 = vsub.f32 %v948_v63, %v956_v27 }
 0x3cb   : > { %v961_v35 = vmul.f32 1.442695, %v958_v32 }
 0x3cc   : > { %v1023_v22 = vpop.xlane.xlu2 %1022 }
 0x3cd   : > { %v1027_v24 = vsub.f32 %v1016_v1, %v1023_v22 }
 0x3cf   : > { %v1029_v26 = vmul.f32 1.442695, %v1027_v24 }
 0x3d0   : > { %v1092_v36 = vpop.xlane.xlu0 %1091 }
 0x3d1   : > { %3188 = vpow2.f32 %v1029_v26  ;;  %v1096_v39 = vsub.f32 %v1085_v3, %v1092_v36 }
 0x3d2   : > { %3190 = vpow2.f32 %v959_v28 }
 0x3d3   : > { %v1098_v42 = vmul.f32 1.442695, %v1096_v39  ;;  %v3022_v39 = vld [vmem:[%s4205_s9 + $0x8] sm:$0xff] }
 0x3d4   : > { %v1026_v29 = vpop.xlane.xlu1 %1025 }
 0x3d5   : > { %v1028_v30 = vsub.f32 %v1018_v5, %v1026_v29 }
 0x3d7   : > { %v3189_v31 = vpop.eup %3188  ;;  %v1031_v33 = vmul.f32 1.442695, %v1028_v30  ;;  %975 = vrot.lane.b32.xlu0 %v3630_v44, %s4233_s25 }
 0x3d8   : > { %v1033_v34 = vsel %vm876_vm13, %v3189_v31, 0.0  ;;  %v3191_v37 = vpop.eup %3190  ;;  %v1095_v47 = vpop.xlane.xlu2 %1094 }
 0x3d9   : > { %3192 = vpow2.f32 %v1031_v33  ;;  %1034 = vadd.xlane.f32.xlu2 %v1033_v34  ;;  %v963_v41 = vsel %vm876_vm13, %v3191_v37, 0.0  ;;  %v1097_v49 = vsub.f32 %v1087_v7, %v1095_v47 }
 0x3da   : > { %3194 = vpow2.f32 %v961_v35 }
 0x3db   : > { %3196 = vpow2.f32 %v1098_v42  ;;  %v1100_v51 = vmul.f32 1.442695, %v1097_v49 }
 0x3dd   : > { %3198 = vpow2.f32 %v1100_v51 }
 0x3df   : > { %v3193_v38 = vpop.eup %3192 }
 0x3e0   : > { %v1036_v40 = vsel %vm880_vm14, %v3193_v38, 0.0  ;;  %v3195_v45 = vpop.eup %3194 }
 0x3e1   : > { %1037 = vadd.xlane.f32.xlu1 %v1036_v40  ;;  %964 = vadd.xlane.f32.xlu2 %v963_v41  ;;  %v966_v46 = vsel %vm880_vm14, %v3195_v45, 0.0  ;;  %v3197_v48 = vpop.eup %3196  ;;  %v3021_v40 = vld [vmem:[%s4205_s9] sm:$0xff] }
 0x3e2   : > { %v1102_v50 = vsel %vm876_vm13, %v3197_v48, 0.0 }
 0x3e3   : > { %v3199_v52 = vpop.eup %3198 }
 0x3e4   : > { %v1105_v53 = vsel %vm880_vm14, %v3199_v52, 0.0 }
 0x3e9   : > { %967 = vadd.xlane.f32.xlu1 %v966_v46 }
 0x3f1   : > { %1103 = vadd.xlane.f32.xlu1 %v1102_v50 }
 0x3f9   : > { %1044 = vrot.lane.b32.xlu2 %v3630_v44, %s4229_s23 }
 0x401   : > { %1106 = vadd.xlane.f32.xlu0 %v1105_v53 }
 0x40a   : > { %1113 = vrot.lane.b32.xlu1 %v3630_v44, %s4225_s29  ;;  %s4255_s29 = smov 112  }
 0x42e   : > { %v892_v54 = vpop.xlane.xlu1 %891 }
 0x42f   : > { %3200 = vrcp.f32 %v892_v54 }
 0x435   : > { %v3201_v56 = vpop.eup %3200 }
 0x436   : > { %v895_v55 = vpop.xlane.xlu0 %894  ;;  %v898_v58 = vmul.f32 %v3201_v56, %v3185_v16 }
 0x437   : > { %3202 = vrcp.f32 %v895_v55 }
 0x43d   : > { %v3203_v57 = vpop.eup %3202 }
 0x43e   : > { %v899_v59 = vmul.f32 %v3203_v57, %v3187_v19 }
 0x440   : > { %v900_v60 = vpack.c.bf16 %v899_v59, %v898_v58  ;;  %v3166_v59 = vld [vmem:[%s4206_s10] ss:$0 sm:$0xff] }
 0x442   : > { %2662 = vmatmul.msk.bf16.vlgmr.msra.gmra.mxu3 %vm876_vm13, %v900_v60 }
 0x449   : > { %v976_v61 = vpop.permute.xlu0 %975 }
 0x44a   : > { %v981_v62 = vand.u32 %v976_v61, %v3628_v43 }
 0x44c   : > { %990 = vmatpush.bf16.msrb.mxu1 %v981_v62  ;;  %v1035_v63 = vpop.xlane.xlu2 %1034 }
 0x44d   : > { %3204 = vrcp.f32 %v1035_v63 }
 0x453   : > { %v3205_v44 = vpop.eup %3204 }
 0x454   : > { %v1038_v0 = vpop.xlane.xlu1 %1037  ;;  %v965_v1 = vpop.xlane.xlu2 %964  ;;  %v1041_v7 = vmul.f32 %v3205_v44, %v3189_v31 }
 0x455   : > { %3206 = vrcp.f32 %v1038_v0 }
 0x456   : > { %3208 = vrcp.f32 %v965_v1 }
 0x45b   : > { %v3207_v2 = vpop.eup %3206 }
 0x45c   : > { %v1042_v3 = vmul.f32 %v3207_v2, %v3193_v38  ;;  %v968_v4 = vpop.xlane.xlu1 %967  ;;  %v1045_v5 = vpop.permute.xlu2 %1044  ;;  %v3023_v38 = vld [vmem:[%s4205_s9 + $0x10] sm:$0xff] }
 0x45d   : > { %3210 = vrcp.f32 %v968_v4  ;;  %v1050_v6 = vand.u32 %v1045_v5, %v3628_v43  ;;  %v3209_v9 = vpop.eup %3208 }
 0x45e   : > { %v1043_v8 = vpack.c.bf16 %v1042_v3, %v1041_v7  ;;  %v971_v11 = vmul.f32 %v3209_v9, %v3191_v37  ;;  %v3024_v37 = vld [vmem:[%s4205_s9 + $0x18] sm:$0xff] }
 0x45f   : > { %1059 = vmatpush.bf16.msrb.mxu3 %v1050_v6  ;;  %1211 = vmatpush.bf16.msra.mxu2 %v3024_v37 }
 0x462   : > { %2666 = vmatmul.msk.bf16.vlgmr.msrb.gmra.mxu3 %vm876_vm13, %v1043_v8 }
 0x463   : > { %v3211_v10 = vpop.eup %3210  ;;  %1212 = vmatpush.bf16.msra.mxu2 %v3023_v38 }
 0x464   : > { %v972_v14 = vmul.f32 %v3211_v10, %v3195_v45  ;;  %v1104_v16 = vpop.xlane.xlu1 %1103 }
 0x465   : > { %3212 = vrcp.f32 %v1104_v16 }
 0x466   : > { %v973_v15 = vpack.c.bf16 %v972_v14, %v971_v11  ;;  %v2712_v11 = vld [vmem:[%s4209_s13 + $0x30] sm:$0xf]  ;;  %v3032_v14 = vld [vmem:[%s4209_s13 + $0x34] sm:$0xf0] }
 0x467   : > { %1213 = vmatpush.bf16.msra.mxu2 %v3022_v39  ;;  %v2713_v16 = vor.u32 %v3032_v14, %v2712_v11  ;;  %v2690_v39 = vld [vmem:[%s4209_s13 + $0x8] sm:$0xf0]  ;;  %v3044_v11 = vld [vmem:[%s4211_s15 + $0x58] sm:$0xff]  ;;  %v3037_v14 = vld [vmem:[%s4211_s15 + $0x20] sm:$0xff] }
 0x468   : > { %2664 = vmatmul.msk.bf16.vlgmr.msrb.gmra.mxu1 %vm876_vm13, %v973_v15  ;;  %v3031_v15 = vld [vmem:[%s4209_s13 + $0x34] sm:$0xf] }
 0x469   : > { %1341 = vmatpush.bf16.msra.mxu3 %v2713_v16  ;;  %v3036_v16 = vld [vmem:[%s4211_s15 + $0x18] sm:$0xff] }
 0x46b   : > { %v3213_v18 = vpop.eup %3212  ;;  %1214 = vmatpush.bf16.msra.mxu2 %v3021_v40 }
 0x46c   : > { %v1110_v24 = vmul.f32 %v3213_v18, %v3197_v48 }
 0x474   : > { %v1107_v17 = vpop.xlane.xlu0 %1106 }
 0x475   : > { %3214 = vrcp.f32 %v1107_v17  ;;  %v2714_v17 = vld [vmem:[%s4209_s13 + $0x38] sm:$0xf0] }
 0x476   : > { %v2717_v18 = vor.u32 %v3031_v15, %v2714_v17  ;;  %v3043_v15 = vld [vmem:[%s4211_s15 + $0x50] sm:$0xff]  ;;  %v3042_v17 = vld [vmem:[%s4211_s15 + $0x48] sm:$0xff] }
 0x478   : > { %1355 = vmatpush.bf16.msra.mxu0 %v2717_v18  ;;  %v1288_v18 = vld [vmem:[%s4210_s14] sm:$0x3] }
 0x47b   : > { %v3215_v19 = vpop.eup %3214 }
 0x47c   : > { %v1111_v20 = vmul.f32 %v3215_v19, %v3199_v52  ;;  %v1114_v21 = vpop.permute.xlu1 %1113  ;;  %v2704_v19 = vld [vmem:[%s4209_s13 + $0x20] sm:$0xf] }
 0x47d   : > { %v1119_v22 = vand.u32 %v1114_v21, %v3628_v43  ;;  %v3029_v21 = vld [vmem:[%s4209_s13 + $0x24] sm:$0xf] }
 0x47e   : > { %v1112_v25 = vpack.c.bf16 %v1111_v20, %v1110_v24  ;;  %v3030_v20 = vld [vmem:[%s4209_s13 + $0x24] sm:$0xf0]  ;;  %v2706_v24 = vld [vmem:[%s4209_s13 + $0x28] sm:$0xf0] }
 0x47f   : > { %1128 = vmatpush.bf16.msra.mxu1 %v1119_v22  ;;  %v2705_v22 = vor.u32 %v3030_v20, %v2704_v19  ;;  %v3035_v19 = vld [vmem:[%s4211_s15 + $0x10] sm:$0xff]  ;;  %v3041_v20 = vld [vmem:[%s4211_s15 + $0x40] sm:$0xff] }
 0x481   : > { %1342 = vmatpush.bf16.msra.mxu3 %v2705_v22  ;;  %v3034_v22 = vld [vmem:[%s4211_s15 + $0x8] sm:$0xff] }
 0x482   : > { %2668 = vmatmul.msk.bf16.vlgmr.msra.gmra.mxu1 %vm876_vm13, %v1112_v25  ;;  %v2709_v25 = vor.u32 %v3029_v21, %v2706_v24  ;;  %v1291_v21 = vperm.slane %v1288_v18, 1 }
 0x484   : > { %1356 = vmatpush.bf16.msra.mxu0 %v2709_v25 }
 0x4c5   : > { %v921_v26 = vpop.f32.mrf.mxu3 }
 0x4cd   : > { %v923_v27 = vpop.f32.mrf.mxu3 }
 0x4e5   : > { %v992_v28 = vpop.f32.mrf.mxu1  ;;  %v1061_v29 = vpop.f32.mrf.mxu3 }
 0x4ed   : > { %v994_v30 = vpop.f32.mrf.mxu1  ;;  %v1063_v32 = vpop.f32.mrf.mxu3 }
 0x4ee   : > { %v3133_v31 = vpack.i.bf16 %v994_v30, %v992_v28  ;;  %v3138_v33 = vpack.i.bf16 %v1063_v32, %v1061_v29  ;;  %v3027_v28 = vld [vmem:[%s4209_s13 + $0x14] sm:$0xf]  ;;  %v2698_v30 = vld [vmem:[%s4209_s13 + $0x18] sm:$0xf0] }
 0x4ef   : > { %v2701_v32 = vor.u32 %v3027_v28, %v2698_v30  ;;  %v1290_v28 = vperm.slane %v1288_v18, 0 }
 0x4f0   : > { %3134 = vrot.lane.b32.xlu2 %v3133_v31, %s4227_s3 }
 0x4f1   : > { %1357 = vmatpush.bf16.msra.mxu0 %v2701_v32 }
 0x4f8   : > { %3139 = vrot.lane.b32.xlu2 %v3138_v33, %s4231_s30 }
 0x4ff   : > { %v1130_v34 = vpop.f32.mrf.mxu1 }
 0x507   : > { %v1132_v35 = vpop.f32.mrf.mxu1 }
 0x508   : > { %v3143_v36 = vpack.i.bf16 %v1132_v35, %v1130_v34  ;;  %v2688_v34 = vld [vmem:[%s4209_s13] sm:$0xf]  ;;  %v3026_v35 = vld [vmem:[%s4209_s13 + $0x4] sm:$0xf0] }
 0x509   : > { %v2689_v38 = vor.u32 %v3026_v35, %v2688_v34 }
 0x50a   : > { %3144 = vrot.lane.b32.xlu1 %v3143_v36, %s3349_s26  ;;  %v3025_v36 = vld [vmem:[%s4209_s13 + $0x4] sm:$0xf] }
 0x50b   : > { %v2693_v40 = vor.u32 %v3025_v36, %v2690_v39 }
 0x50d   : > { %1358 = vmatpush.bf16.msra.mxu0 %v2693_v40 }
 0x54a   : > { %v3135_v41 = vpop.permute.xlu2 %3134 }
 0x54b   : > { %v3137_v45 = vunpack.i.h.bf16 %v3135_v41  ;;  %v3136_v46 = vunpack.i.l.bf16 %v3135_v41 }
 0x54d   : > { %v1160_v50 = vsel %vm855_vm12, %v923_v27, %v3137_v45  ;;  %v1159_v51 = vsel %vm855_vm12, %v921_v26, %v3136_v46  ;;  %v2696_v26 = vld [vmem:[%s4209_s13 + $0x10] sm:$0xf]  ;;  %v3028_v27 = vld [vmem:[%s4209_s13 + $0x14] sm:$0xf0] }
 0x54e   : > { %v2697_v29 = vor.u32 %v3028_v27, %v2696_v26  ;;  %v3033_v26 = vld [vmem:[%s4211_s15] sm:$0xff] }
 0x550   : > { %1343 = vmatpush.bf16.msra.mxu3 %v2697_v29 }
 0x552   : > { %v3140_v42 = vpop.permute.xlu2 %3139 }
 0x553   : > { %v3142_v47 = vunpack.i.h.bf16 %v3140_v42  ;;  %v3141_v48 = vunpack.i.l.bf16 %v3140_v42 }
 0x554   : > { %1344 = vmatpush.bf16.msra.mxu3 %v2689_v38 }
 0x555   : > { %v1162_v54 = vsel %vm1161_vm15, %v1159_v51, %v3141_v48  ;;  %v1163_v55 = vsel %vm1161_vm15, %v1160_v50, %v3142_v47 }
 0x57c   : > { %v3145_v49 = vpop.permute.xlu1 %3144 }
 0x57d   : > { %v3147_v52 = vunpack.i.h.bf16 %v3145_v49  ;;  %v3146_v53 = vunpack.i.l.bf16 %v3145_v49 }
 0x57f   : > { %v1165_v56 = vsel %vm1164_vm1, %v1162_v54, %v3146_v53  ;;  %v1166_v57 = vsel %vm1164_vm1, %v1163_v55, %v3147_v52 }
 0x580   : > { %v1167_v58 = vpack.c.bf16 %v1166_v57, %v1165_v56 }
 0x582   : > { %2685 = vmatmul.msk.bf16.vlgmr.msra.gmra.mxu2 %vm673_vm0, %v1167_v58  ;;  %v3167_v58 = vld [vmem:[%s4207_s11] ss:$0 sm:$0xff] }
 0x605   : > { %v1216_v60 = vpop.f32.mrf.mxu2 }
 0x606   : > { %v1217_v61 = vadd.f32 %v3166_v59, %v1216_v60 }
 0x608   : > { %v3701_v62 = vadd.f32 %v1217_v61, %v3539_v13 }
 0x60a   : > { %v1225_v63 = vsel %vm673_vm0, %v3701_v62, 0.0 }
 0x60b   : > { %1226 = vadd.xlane.f32.xlu2 %v1225_v63  ;;  %v3168_v63 = vld [vmem:[%s4208_s12] ss:$0 sm:$0xff] }
 0x60d   : > { %v1218_v0 = vpop.f32.mrf.mxu2 }
 0x60e   : > { %v1219_v1 = vadd.f32 %v3166_v59, %v1218_v0 }
 0x610   : > { %v3706_v44 = vadd.f32 %v1219_v1, %v3536_v12 }
 0x612   : > { %v1228_v2 = vsel %vm703_vm2, %v3706_v44, 0.0 }
 0x613   : > { %1229 = vadd.xlane.f32.xlu1 %v1228_v2 }
 0x67e   : > { %v1227_v3 = vpop.xlane.xlu2 %1226 }
 0x67f   : > { %v1231_v4 = vmul.f32 %v1227_v3, %v3545_v23 }
 0x681   : > { %v3712_v5 = vsub.f32 %v3701_v62, %v1231_v4 }
 0x683   : > { %v1235_v13 = vmul.f32 %v3712_v5, %v3712_v5 }
 0x685   : > { %v1237_v6 = vsel %vm673_vm0, %v1235_v13, 0.0 }
 0x686   : > { %v1230_v7 = vpop.xlane.xlu1 %1229  ;;  %1238 = vadd.xlane.f32.xlu0 %v1237_v6  ;;  %v3047_v6 = vld [vmem:[%s4211_s15 + $0x70] sm:$0xff] }
 0x687   : > { %v1232_v12 = vmul.f32 %v1230_v7, %v3545_v23  ;;  %v3040_v7 = vld [vmem:[%s4211_s15 + $0x38] sm:$0xff] }
 0x688   : > { %1535 = vmatpush.bf16.msrb.mxu1 %v3040_v7 }
 0x689   : > { %v3719_v8 = vsub.f32 %v3706_v44, %v1232_v12  ;;  %v3046_v12 = vld [vmem:[%s4211_s15 + $0x68] sm:$0xff] }
 0x68b   : > { %v1236_v9 = vmul.f32 %v3719_v8, %v3719_v8 }
 0x68d   : > { %v1240_v10 = vsel %vm703_vm2, %v1236_v9, 0.0  ;;  %v3045_v9 = vld [vmem:[%s4211_s15 + $0x60] sm:$0xff] }
 0x68e   : > { %1241 = vadd.xlane.f32.xlu0 %v1240_v10  ;;  %v3038_v10 = vld [vmem:[%s4211_s15 + $0x28] sm:$0xff] }
 0x6f9   : > { %v1239_v31 = vpop.xlane.xlu0 %1238 }
 0x6fa   : > { %v1243_v33 = vmul.f32 %v1239_v31, %v3545_v23 }
 0x6fc   : > { %v1245_v37 = vadd.f32 1e-06, %v1243_v33 }
 0x6fe   : > { %3216 = vrsqrt.f32 %v1245_v37  ;;  %vm1253_vm4 = vweird.f32 %v1245_v37 }
 0x701   : > { %v1242_v41 = vpop.xlane.xlu0 %1241 }
 0x702   : > { %v1244_v42 = vmul.f32 %v1242_v41, %v3545_v23 }
 0x704   : > { %v3217_v45 = vpop.eup %3216  ;;  %v1246_v46 = vadd.f32 1e-06, %v1244_v42 }
 0x705   : > { %v1248_v47 = vmul.f32 %v3217_v45, %v1245_v37  ;;  %vm1254_vm3 = vweird.f32 %v3217_v45 }
 0x706   : > { %3218 = vrsqrt.f32 %v1246_v46  ;;  %vm1255_vm5 = vmor %vm1253_vm4, %vm1254_vm3  ;;  %vm1263_vm7 = vweird.f32 %v1246_v46 }
 0x707   : > { %v1249_v48 = vmul.f32 %v3217_v45, %v1248_v47 }
 0x709   : > { %v1250_v49 = vmul.f32 0.5, %v1249_v48 }
 0x70b   : > { %v1251_v50 = vsub.f32 1.5, %v1250_v49 }
 0x70c   : > { %v3219_v51 = vpop.eup %3218 }
 0x70d   : > { %v1252_v52 = vmul.f32 %v3217_v45, %v1251_v50  ;;  %v1258_v53 = vmul.f32 %v3219_v51, %v1246_v46  ;;  %vm1264_vm6 = vweird.f32 %v3219_v51 }
 0x70e   : > { %vm1265_vm8 = vmor %vm1263_vm7, %vm1264_vm6 }
 0x70f   : > { %v1259_v54 = vmul.f32 %v3219_v51, %v1258_v53  ;;  %v1256_v55 = vsel %vm1255_vm5, %v3217_v45, %v1252_v52 }
 0x710   : > { %v1267_v59 = vmul.f32 %v1256_v55, %v3712_v5  ;;  %v3048_v5 = vld [vmem:[%s4211_s15 + $0x78] sm:$0xff] }
 0x711   : > { %v1260_v56 = vmul.f32 0.5, %v1259_v54  ;;  %1549 = vmatpush.bf16.msrb.mxu2 %v3048_v5 }
 0x712   : > { %v1272_v0 = vmul.f32 %v3167_v58, %v1267_v59 }
 0x713   : > { %v1261_v57 = vsub.f32 1.5, %v1260_v56 }
 0x714   : > { %v1277_v3 = vadd.f32 %v3168_v63, %v1272_v0 }
 0x715   : > { %v1262_v60 = vmul.f32 %v3219_v51, %v1261_v57  ;;  %1550 = vmatpush.bf16.msrb.mxu2 %v3047_v6 }
 0x717   : > { %v1266_v61 = vsel %vm1265_vm8, %v3219_v51, %v1262_v60 }
 0x718   : > { %v1268_v1 = vmul.f32 %v1266_v61, %v3719_v8  ;;  %v3039_v8 = vld [vmem:[%s4211_s15 + $0x30] sm:$0xff] }
 0x719   : > { %1551 = vmatpush.bf16.msrb.mxu2 %v3046_v12  ;;  %1536 = vmatpush.bf16.msrb.mxu1 %v3039_v8 }
 0x71a   : > { %v1273_v2 = vmul.f32 %v3167_v58, %v1268_v1 }
 0x71c   : > { %v1278_v4 = vadd.f32 %v3168_v63, %v1273_v2 }
 0x71d   : > { %1552 = vmatpush.bf16.msrb.mxu2 %v3045_v9  ;;  %1537 = vmatpush.bf16.msrb.mxu1 %v3038_v10  ;;  %v3169_v9 = vld [vmem:[%s4212_s16] ss:$0 sm:$0xff] }
 0x71e   : > { %v1279_v13 = vpack.c.bf16 %v1278_v4, %v1277_v3 }
 0x720   : > { %2718 = vmatmul.msk.bf16.vlgmr.msra.gmra.mxu3 %vm673_vm0, %v1279_v13  ;;  %2719 = vmatmul.msk.bf16.vlgmr.msra.gmra.mxu0 %vm673_vm0, %v1279_v13 }
 0x721   : > { %1553 = vmatpush.bf16.msrb.mxu2 %v3044_v11  ;;  %1538 = vmatpush.bf16.msrb.mxu1 %v3037_v14 }
 0x725   : > { %1554 = vmatpush.bf16.msrb.mxu2 %v3043_v15  ;;  %1539 = vmatpush.bf16.msrb.mxu1 %v3036_v16 }
 0x729   : > { %1555 = vmatpush.bf16.msrb.mxu2 %v3042_v17  ;;  %1540 = vmatpush.bf16.msrb.mxu1 %v3035_v19 }
 0x72d   : > { %1556 = vmatpush.bf16.msrb.mxu2 %v3041_v20  ;;  %1541 = vmatpush.bf16.msrb.mxu1 %v3034_v22 }
 0x731   : > { %1542 = vmatpush.bf16.msrb.mxu1 %v3033_v26 }
 0x79d   : > { %v1360_v24 = vpop.f32.mrf.mxu0 }
 0x79e   : > { %v1361_v25 = vadd.f32 %v1360_v24, %v1291_v21 }
 0x7a0   : > { %v1370_v27 = vmul.f32 0.044715, %v1361_v25  ;;  %v1366_v59 = vmul.f32 0.5, %v1361_v25 }
 0x7a2   : > { %v1374_v29 = vmul.f32 %v1370_v27, %v1361_v25 }
 0x7a3   : > { %v1346_v30 = vpop.f32.mrf.mxu3 }
 0x7a4   : > { %v1378_v31 = vmul.f32 %v1374_v29, %v1361_v25  ;;  %v1347_v32 = vadd.f32 %v1346_v30, %v1290_v28 }
 0x7a5   : > { %v1362_v33 = vpop.f32.mrf.mxu0 }
 0x7a6   : > { %v1382_v34 = vadd.f32 %v1378_v31, %v1361_v25  ;;  %v1369_v35 = vmul.f32 0.044715, %v1347_v32  ;;  %v1363_v36 = vadd.f32 %v1362_v33, %v1291_v21  ;;  %v1365_v13 = vmul.f32 0.5, %v1347_v32  ;;  %v2821_v33 = vld [vmem:[%s4203_s7 + $0x70] sm:$0xf] }
 0x7a8   : > { %v1373_v37 = vmul.f32 %v1369_v35, %v1347_v32  ;;  %v1372_v38 = vmul.f32 0.044715, %v1363_v36  ;;  %v1386_v39 = vmul.f32 0.7978846, %v1382_v34  ;;  %v1368_v60 = vmul.f32 0.5, %v1363_v36 }
 0x7a9   : > { %v3056_v34 = vld [vmem:[%s4203_s7 + $0x74] sm:$0xf0]  ;;  %v3055_v35 = vld [vmem:[%s4203_s7 + $0x74] sm:$0xf] }
 0x7aa   : > { %v1377_v40 = vmul.f32 %v1373_v37, %v1347_v32  ;;  %v1376_v41 = vmul.f32 %v1372_v38, %v1363_v36  ;;  %3220 = vtanh.f32 %v1386_v39  ;;  %v2823_v37 = vld [vmem:[%s4203_s7 + $0x78] sm:$0xf0]  ;;  %v2813_v39 = vld [vmem:[%s4203_s7 + $0x60] sm:$0xf] }
 0x7ab   : > { %v1348_v42 = vpop.f32.mrf.mxu3  ;;  %v2826_v38 = vor.u32 %v3055_v35, %v2823_v37 }
 0x7ac   : > { %v1381_v45 = vadd.f32 %v1377_v40, %v1347_v32  ;;  %v1380_v46 = vmul.f32 %v1376_v41, %v1363_v36  ;;  %v1349_v47 = vadd.f32 %v1348_v42, %v1290_v28  ;;  %v3054_v40 = vld [vmem:[%s4203_s7 + $0x64] sm:$0xf0]  ;;  %v3053_v41 = vld [vmem:[%s4203_s7 + $0x64] sm:$0xf] }
 0x7ad   : > { %1701 = vmatpush.bf16.msrb.mxu0 %v2826_v38  ;;  %v2814_v42 = vor.u32 %v3054_v40, %v2813_v39 }
 0x7ae   : > { %v1384_v48 = vadd.f32 %v1380_v46, %v1363_v36  ;;  %v1371_v49 = vmul.f32 0.044715, %v1349_v47  ;;  %v1385_v50 = vmul.f32 0.7978846, %v1381_v45  ;;  %v1367_v5 = vmul.f32 0.5, %v1349_v47 }
 0x7af   : > { %v2822_v36 = vor.u32 %v3056_v34, %v2821_v33  ;;  %v2815_v45 = vld [vmem:[%s4203_s7 + $0x68] sm:$0xf0] }
 0x7b0   : > { %v1388_v51 = vmul.f32 0.7978846, %v1384_v48  ;;  %v1375_v52 = vmul.f32 %v1371_v49, %v1349_v47  ;;  %v3221_v54 = vpop.eup %3220  ;;  %v2818_v46 = vor.u32 %v3053_v41, %v2815_v45  ;;  %v3052_v48 = vld [vmem:[%s4203_s7 + $0x54] sm:$0xf0]  ;;  %v3051_v49 = vld [vmem:[%s4203_s7 + $0x54] sm:$0xf] }
 0x7b1   : > { %v1394_v57 = vadd.f32 1.0, %v3221_v54  ;;  %1687 = vmatpush.bf16.msrb.mxu3 %v2822_v36 }
 0x7b2   : > { %v1379_v53 = vmul.f32 %v1375_v52, %v1349_v47  ;;  %3222 = vtanh.f32 %v1388_v51  ;;  %1702 = vmatpush.bf16.msrb.mxu0 %v2818_v46  ;;  %v2807_v51 = vld [vmem:[%s4203_s7 + $0x58] sm:$0xf0] }
 0x7b3   : > { %3224 = vtanh.f32 %v1385_v50  ;;  %v1398_v0 = vmul.f32 %v1394_v57, %v1366_v59  ;;  %v3049_v57 = vld [vmem:[%s4203_s7 + $0x44] sm:$0xf] }
 0x7b4   : > { %v1383_v55 = vadd.f32 %v1379_v53, %v1349_v47  ;;  %v2805_v47 = vld [vmem:[%s4203_s7 + $0x50] sm:$0xf]  ;;  %v2810_v53 = vor.u32 %v3051_v49, %v2807_v51 }
 0x7b5   : > { %1688 = vmatpush.bf16.msrb.mxu3 %v2814_v42  ;;  %v2806_v50 = vor.u32 %v3052_v48, %v2805_v47 }
 0x7b6   : > { %v1387_v56 = vmul.f32 0.7978846, %v1383_v55  ;;  %1703 = vmatpush.bf16.msrb.mxu0 %v2810_v53  ;;  %v2797_v55 = vld [vmem:[%s4203_s7 + $0x40] sm:$0xf] }
 0x7b8   : > { %v3223_v58 = vpop.eup %3222  ;;  %3226 = vtanh.f32 %v1387_v56  ;;  %v3050_v56 = vld [vmem:[%s4203_s7 + $0x44] sm:$0xf0] }
 0x7b9   : > { %v1396_v61 = vadd.f32 1.0, %v3223_v58  ;;  %v3225_v63 = vpop.eup %3224  ;;  %1689 = vmatpush.bf16.msrb.mxu3 %v2806_v50  ;;  %v2798_v59 = vor.u32 %v3050_v56, %v2797_v55 }
 0x7ba   : > { %v1393_v3 = vadd.f32 1.0, %v3225_v63 }
 0x7bb   : > { %v1400_v1 = vmul.f32 %v1396_v61, %v1368_v60  ;;  %v2799_v60 = vld [vmem:[%s4203_s7 + $0x48] sm:$0xf0] }
 0x7bc   : > { %v1397_v7 = vmul.f32 %v1393_v3, %v1365_v13  ;;  %v2802_v61 = vor.u32 %v3049_v57, %v2799_v60 }
 0x7bd   : > { %v1402_v2 = vpack.c.bf16 %v1400_v1, %v1398_v0  ;;  %1690 = vmatpush.bf16.msrb.mxu3 %v2798_v59 }
 0x7be   : > { %v3227_v4 = vpop.eup %3226  ;;  %1704 = vmatpush.bf16.msrb.mxu0 %v2802_v61 }
 0x7bf   : > { %1557 = vmatmul.bf16.vlgmr.msrb.gmra.mxu2 %v1402_v2  ;;  %v1395_v6 = vadd.f32 1.0, %v3227_v4 }
 0x7c1   : > { %v1399_v12 = vmul.f32 %v1395_v6, %v1367_v5 }
 0x7c3   : > { %v1401_v8 = vpack.c.bf16 %v1399_v12, %v1397_v7 }
 0x7c5   : > { %1543 = vmatmul.bf16.vlgmr.msrb.gmra.mxu1 %v1401_v8 }
 0x842   : > { %v1544_v10 = vpop.f32.mrf.mxu1  ;;  %v1558_v11 = vpop.f32.mrf.mxu2 }
 0x843   : > { %v1545_v14 = vadd.f32 %v3169_v9, %v1544_v10 }
 0x845   : > { %v1559_v15 = vadd.f32 %v1558_v11, %v1545_v14  ;;  %v3170_v14 = vld [vmem:[%s4201_s5 + $0x1] ss:$0 sm:$0xff] }
 0x847   : > { %v3839_v16 = vadd.f32 %v1559_v15, %v3701_v62 }
 0x849   : > { %v1569_v17 = vsel %vm673_vm0, %v3839_v16, 0.0 }
 0x84a   : > { %v1546_v18 = vpop.f32.mrf.mxu1  ;;  %1570 = vadd.xlane.f32.xlu0 %v1569_v17  ;;  %v1560_v20 = vpop.f32.mrf.mxu2 }
 0x84b   : > { %v1547_v19 = vadd.f32 %v3169_v9, %v1546_v18 }
 0x84d   : > { %v1561_v21 = vadd.f32 %v1560_v20, %v1547_v19  ;;  %v3171_v19 = vld [vmem:[%s4202_s6 + $0x1] ss:$0 sm:$0xff] }
 0x84f   : > { %v3844_v22 = vadd.f32 %v1561_v21, %v3706_v44 }
 0x851   : > { %v1572_v24 = vsel %vm703_vm2, %v3844_v22, 0.0 }
 0x852   : > { %1573 = vadd.xlane.f32.xlu0 %v1572_v24 }
 0x8bd   : > { %v1571_v25 = vpop.xlane.xlu0 %1570 }
 0x8be   : > { %v1575_v26 = vmul.f32 %v1571_v25, %v3545_v23 }
 0x8c0   : > { %v3850_v62 = vsub.f32 %v3839_v16, %v1575_v26 }
 0x8c2   : > { %v1579_v27 = vmul.f32 %v3850_v62, %v3850_v62 }
 0x8c4   : > { %v1581_v28 = vsel %vm673_vm0, %v1579_v27, 0.0 }
 0x8c5   : > { %1582 = vadd.xlane.f32.xlu2 %v1581_v28  ;;  %v1574_v29 = vpop.xlane.xlu0 %1573  ;;  %v2794_v28 = vld [vmem:[%s4204_s8 + $0x2] sm:$0x3] }
 0x8c6   : > { %v1576_v44 = vmul.f32 %v1574_v29, %v3545_v23  ;;  %v1637_v29 = vperm.slane %v2794_v28, 1  ;;  %v1636_v33 = vperm.slane %v2794_v28, 0 }
 0x8c8   : > { %v3857_v30 = vsub.f32 %v3844_v22, %v1576_v44 }
 0x8ca   : > { %v1580_v31 = vmul.f32 %v3857_v30, %v3857_v30 }
 0x8cc   : > { %v1584_v32 = vsel %vm703_vm2, %v1580_v31, 0.0 }
 0x8cd   : > { %1585 = vadd.xlane.f32.xlu0 %v1584_v32 }
 0x938   : > { %v1583_v52 = vpop.xlane.xlu2 %1582 }
 0x939   : > { %v1587_v54 = vmul.f32 %v1583_v52, %v3545_v23 }
 0x93b   : > { %v1589_v58 = vadd.f32 1e-06, %v1587_v54 }
 0x93d   : > { %3228 = vrsqrt.f32 %v1589_v58  ;;  %vm1597_vm11 = vweird.f32 %v1589_v58 }
 0x940   : > { %v1586_v63 = vpop.xlane.xlu0 %1585 }
 0x941   : > { %v1588_v0 = vmul.f32 %v1586_v63, %v3545_v23 }
 0x943   : > { %v3229_v1 = vpop.eup %3228  ;;  %v1590_v2 = vadd.f32 1e-06, %v1588_v0 }
 0x944   : > { %v1592_v3 = vmul.f32 %v3229_v1, %v1589_v58  ;;  %vm1598_vm9 = vweird.f32 %v3229_v1 }
 0x945   : > { %3230 = vrsqrt.f32 %v1590_v2  ;;  %vm1599_vm3 = vmor %vm1597_vm11, %vm1598_vm9  ;;  %vm1607_vm5 = vweird.f32 %v1590_v2 }
 0x946   : > { %v1593_v4 = vmul.f32 %v3229_v1, %v1592_v3 }
 0x948   : > { %v1594_v13 = vmul.f32 0.5, %v1593_v4 }
 0x94a   : > { %v1595_v5 = vsub.f32 1.5, %v1594_v13 }
 0x94b   : > { %v3231_v6 = vpop.eup %3230 }
 0x94c   : > { %v1596_v7 = vmul.f32 %v3229_v1, %v1595_v5  ;;  %v1602_v12 = vmul.f32 %v3231_v6, %v1590_v2  ;;  %vm1608_vm4 = vweird.f32 %v3231_v6 }
 0x94d   : > { %vm1609_vm6 = vmor %vm1607_vm5, %vm1608_vm4 }
 0x94e   : > { %v1603_v8 = vmul.f32 %v3231_v6, %v1602_v12  ;;  %v1600_v9 = vsel %vm1599_vm3, %v3229_v1, %v1596_v7 }
 0x94f   : > { %v1611_v15 = vmul.f32 %v1600_v9, %v3850_v62 }
 0x950   : > { %v1604_v10 = vmul.f32 0.5, %v1603_v8 }
 0x951   : > { %v1616_v20 = vmul.f32 %v3170_v14, %v1611_v15 }
 0x952   : > { %v1605_v11 = vsub.f32 1.5, %v1604_v10 }
 0x953   : > { %v1621_v25 = vadd.f32 %v3171_v19, %v1616_v20 }
 0x954   : > { %v1606_v17 = vmul.f32 %v3231_v6, %v1605_v11 }
 0x956   : > { %v1610_v18 = vsel %vm1609_vm6, %v3231_v6, %v1606_v17 }
 0x957   : > { %v1612_v21 = vmul.f32 %v1610_v18, %v3857_v30 }
 0x959   : > { %v1617_v24 = vmul.f32 %v3170_v14, %v1612_v21 }
 0x95b   : > { %v1622_v26 = vadd.f32 %v3171_v19, %v1617_v24 }
 0x95d   : > { %v1623_v27 = vpack.c.bf16 %v1622_v26, %v1621_v25 }
 0x95f   : > { %2827 = vmatmul.msk.bf16.vlgmr.msrb.gmra.mxu3 %vm673_vm0, %v1623_v27  ;;  %2828 = vmatmul.msk.bf16.vlgmr.msrb.gmra.mxu0 %vm673_vm0, %v1623_v27 }
 0x9dc   : > { %v1706_v62 = vpop.f32.mrf.mxu0 }
 0x9dd   : > { %v1707_v32 = vadd.f32 %v1706_v62, %v1637_v29 }
 0x9e2   : > { %v1692_v44 = vpop.f32.mrf.mxu3 }
 0x9e3   : > { %v1693_v35 = vadd.f32 %v1692_v44, %v1636_v33 }
 0x9e4   : > { %v1708_v31 = vpop.f32.mrf.mxu0 }
 0x9e5   : > { %v1709_v34 = vadd.f32 %v1708_v31, %v1637_v29  ;;  %v1711_v39 = vmul.f32 0.25, %v1693_v35 }
 0x9e7   : > { %v3925_v30 = vpack.c.bf16 %v1709_v34, %v1707_v32 }
 0x9e9   : > { %v1766_v36 = vand.u32 %v3925_v30, %v3628_v43 }
 0x9ea   : > { %v1694_v37 = vpop.f32.mrf.mxu3 }
 0x9eb   : > { %v1695_v38 = vadd.f32 %v1694_v37, %v1636_v33  ;;  %1775 = vmatpush.bf16.msra.mxu0 %v1766_v36 }
 0x9ed   : > { %v1712_v40 = vmul.f32 0.25, %v1695_v38  ;;  %v1714_v41 = vpack.c.bf16 %v1695_v38, %v1693_v35 }
 0x9ef   : > { %v1713_v42 = vpack.c.bf16 %v1712_v40, %v1711_v39  ;;  %1785 = vrot.lane.b32.xlu2 %v1714_v41, %s3349_s26  ;;  %1716 = vrot.lane.b32.xlu1 %v1714_v41, %s3346_s0 }
 0x9f1   : > { %1783 = vrot.lane.b32.xlu0 %v1713_v42, %s4255_s29 }
 0x9f7   : > { %1855 = vrot.lane.b32.xlu1 %v1714_v41, %s4256_s28  ;;  %1853 = vrot.lane.b32.xlu2 %v1713_v42, %s4257_s20 }
 0x9f9   : > { %1924 = vrot.lane.b32.xlu0 %v1714_v41, %s4258_s24 }
 0x9ff   : > { %1922 = vrot.lane.b32.xlu1 %v1713_v42, %s4259_s1 }
 0xa49   : > { %v1786_v45 = vpop.permute.xlu2 %1785 }
 0xa4a   : > { %v1791_v46 = vsel %vm855_vm12, %v1786_v45, 0 }
 0xa4b   : > { %1800 = vmatpush.bf16.xpose.msra.mxu1 %v1791_v46 }
 0xa51   : > { %v1854_v55 = vpop.permute.xlu2 %1853 }
 0xa61   : > { %v1717_v47 = vpop.permute.xlu1 %1716 }
 0xa62   : > { %v1722_v48 = vsel %vm855_vm12, %v1717_v47, 0 }
 0xa63   : > { %1731 = vmatpush.bf16.xpose.msra.mxu3 %v1722_v48  ;;  %v1784_v49 = vpop.permute.xlu0 %1783 }
 0xa64   : > { %2831 = vmatmul.msk.bf16.vlgmr.msra.gmra.mxu1 %vm855_vm12, %v1784_v49 }
 0xa69   : > { %v1856_v50 = vpop.permute.xlu1 %1855 }
 0xa6a   : > { %v1861_v51 = vsel %vm855_vm12, %v1856_v50, 0  ;;  %2829 = vmatmul.msk.bf16.vlgmr.msra.gmra.mxu3 %vm855_vm12, %v1713_v42 }
 0xa6b   : > { %1870 = vmatpush.bf16.xpose.msrb.mxu3 %v1861_v51  ;;  %v1925_v52 = vpop.permute.xlu0 %1924 }
 0xa6c   : > { %v1930_v53 = vsel %vm855_vm12, %v1925_v52, 0 }
 0xa6d   : > { %1939 = vmatpush.bf16.xpose.msrb.mxu1 %v1930_v53 }
 0xa71   : > { %v1923_v54 = vpop.permute.xlu1 %1922 }
 0xa74   : > { %2835 = vmatmul.msk.bf16.vlgmr.msrb.gmra.mxu1 %vm855_vm12, %v1923_v54 }
 0xa7a   : > { %2833 = vmatmul.msk.bf16.vlgmr.msrb.gmra.mxu3 %vm855_vm12, %v1854_v55 }
 0xae1   : > { %v1802_v56 = vpop.f32.mrf.mxu1 }
 0xae2   : > { %v1807_v57 = vsel %vm876_vm13, %v1802_v56, -inf }
 0xae3   : > { %1808 = vmax.xlane.f32.xlu0 %v1807_v57 }
 0xae9   : > { %v1804_v58 = vpop.f32.mrf.mxu1 }
 0xaea   : > { %v1810_v59 = vsel %vm880_vm14, %v1804_v58, -inf }
 0xaeb   : > { %1811 = vmax.xlane.f32.xlu2 %v1810_v59 }
 0xaed   : > { %v1733_v60 = vpop.f32.mrf.mxu3 }
 0xaee   : > { %v1738_v61 = vsel %vm876_vm13, %v1733_v60, -inf }
 0xaef   : > { %1739 = vmax.xlane.f32.xlu1 %v1738_v61 }
 0xaf1   : > { %v1941_v63 = vpop.f32.mrf.mxu1 }
 0xaf2   : > { %v1946_v0 = vsel %vm876_vm13, %v1941_v63, -inf }
 0xaf3   : > { %1947 = vmax.xlane.f32.xlu2 %v1946_v0 }
 0xaf5   : > { %v1735_v1 = vpop.f32.mrf.mxu3 }
 0xaf6   : > { %v1741_v2 = vsel %vm880_vm14, %v1735_v1, -inf }
 0xaf7   : > { %1742 = vmax.xlane.f32.xlu0 %v1741_v2 }
 0xaf9   : > { %v1943_v3 = vpop.f32.mrf.mxu1 }
 0xafa   : > { %v1949_v4 = vsel %vm880_vm14, %v1943_v3, -inf }
 0xafb   : > { %1950 = vmax.xlane.f32.xlu1 %v1949_v4 }
 0xafd   : > { %v1872_v13 = vpop.f32.mrf.mxu3 }
 0xafe   : > { %v1877_v5 = vsel %vm876_vm13, %v1872_v13, -inf }
 0xaff   : > { %1878 = vmax.xlane.f32.xlu0 %v1877_v5 }
 0xb05   : > { %v1874_v6 = vpop.f32.mrf.mxu3 }
 0xb06   : > { %v1880_v7 = vsel %vm880_vm14, %v1874_v6, -inf }
 0xb07   : > { %1881 = vmax.xlane.f32.xlu2 %v1880_v7 }
 0xb13   : > { %1831 = vrot.lane.b32.xlu0 %v3925_v30, %s4255_s29 }
 0xb56   : > { %v1809_v12 = vpop.xlane.xlu0 %1808 }
 0xb57   : > { %v1813_v8 = vsub.f32 %v1802_v56, %v1809_v12 }
 0xb59   : > { %v1815_v9 = vmul.f32 1.442695, %v1813_v8 }
 0xb5b   : > { %3232 = vpow2.f32 %v1815_v9 }
 0xb5e   : > { %v1812_v10 = vpop.xlane.xlu2 %1811 }
 0xb5f   : > { %v1814_v11 = vsub.f32 %v1804_v58, %v1812_v10 }
 0xb61   : > { %v3233_v14 = vpop.eup %3232  ;;  %v1817_v15 = vmul.f32 1.442695, %v1814_v11 }
 0xb62   : > { %v1740_v17 = vpop.xlane.xlu1 %1739  ;;  %v1819_v18 = vsel %vm876_vm13, %v3233_v14, 0.0 }
 0xb63   : > { %3234 = vpow2.f32 %v1817_v15  ;;  %v1744_v19 = vsub.f32 %v1733_v60, %v1740_v17  ;;  %1820 = vadd.xlane.f32.xlu1 %v1819_v18 }
 0xb65   : > { %v1746_v20 = vmul.f32 1.442695, %v1744_v19 }
 0xb66   : > { %v1948_v21 = vpop.xlane.xlu2 %1947 }
 0xb67   : > { %3236 = vpow2.f32 %v1746_v20  ;;  %v1952_v24 = vsub.f32 %v1941_v63, %v1948_v21 }
 0xb69   : > { %v3235_v25 = vpop.eup %3234  ;;  %v1954_v26 = vmul.f32 1.442695, %v1952_v24 }
 0xb6a   : > { %v1743_v27 = vpop.xlane.xlu0 %1742  ;;  %v1822_v62 = vsel %vm880_vm14, %v3235_v25, 0.0 }
 0xb6b   : > { %v1745_v28 = vsub.f32 %v1735_v1, %v1743_v27  ;;  %1823 = vadd.xlane.f32.xlu0 %v1822_v62  ;;  %3238 = vpow2.f32 %v1954_v26 }
 0xb6d   : > { %v3237_v29 = vpop.eup %3236  ;;  %v1748_v44 = vmul.f32 1.442695, %v1745_v28 }
 0xb6e   : > { %v1951_v31 = vpop.xlane.xlu1 %1950  ;;  %v1750_v32 = vsel %vm876_vm13, %v3237_v29, 0.0 }
 0xb6f   : > { %3240 = vpow2.f32 %v1748_v44  ;;  %v1953_v33 = vsub.f32 %v1943_v3, %v1951_v31  ;;  %1751 = vadd.xlane.f32.xlu2 %v1750_v32 }
 0xb71   : > { %v1956_v34 = vmul.f32 1.442695, %v1953_v33  ;;  %v3957_v36 = vpop.eup %3238 }
 0xb72   : > { %v1879_v35 = vpop.xlane.xlu0 %1878  ;;  %v1958_v40 = vsel %vm876_vm13, %v3957_v36, 0.0 }
 0xb73   : > { %v1883_v37 = vsub.f32 %v1872_v13, %v1879_v35  ;;  %3242 = vpow2.f32 %v1956_v34  ;;  %v3060_v35 = vld [vmem:[%s4205_s9 + $0x38] sm:$0xff] }
 0xb74   : > { %2067 = vmatpush.bf16.msra.mxu3 %v3060_v35  ;;  %v2878_v35 = vld [vmem:[%s4209_s13 + $0x48] sm:$0xf0] }
 0xb75   : > { %v3241_v38 = vpop.eup %3240  ;;  %v1885_v39 = vmul.f32 1.442695, %v1883_v37  ;;  %v3058_v37 = vld [vmem:[%s4205_s9 + $0x28] sm:$0xff] }
 0xb76   : > { %v1753_v41 = vsel %vm880_vm14, %v3241_v38, 0.0 }
 0xb77   : > { %3244 = vpow2.f32 %v1885_v39  ;;  %1959 = vadd.xlane.f32.xlu2 %v1958_v40  ;;  %1754 = vadd.xlane.f32.xlu1 %v1753_v41 }
 0xb79   : > { %v3243_v45 = vpop.eup %3242 }
 0xb7a   : > { %v1882_v42 = vpop.xlane.xlu2 %1881  ;;  %v1961_v49 = vsel %vm880_vm14, %v3243_v45, 0.0 }
 0xb7b   : > { %v1884_v46 = vsub.f32 %v1874_v6, %v1882_v42 }
 0xb7d   : > { %v3245_v47 = vpop.eup %3244  ;;  %v1887_v48 = vmul.f32 1.442695, %v1884_v46 }
 0xb7e   : > { %v1889_v50 = vsel %vm876_vm13, %v3245_v47, 0.0 }
 0xb7f   : > { %3246 = vpow2.f32 %v1887_v48  ;;  %1900 = vrot.lane.b32.xlu0 %v3925_v30, %s4257_s20  ;;  %1962 = vadd.xlane.f32.xlu1 %v1961_v49 }
 0xb80   : > { %1890 = vadd.xlane.f32.xlu2 %v1889_v50 }
 0xb85   : > { %v3247_v51 = vpop.eup %3246  ;;  %v1832_v52 = vpop.permute.xlu0 %1831 }
 0xb86   : > { %v1837_v53 = vand.u32 %v1832_v52, %v3628_v43  ;;  %v1892_v54 = vsel %vm880_vm14, %v3247_v51, 0.0 }
 0xb87   : > { %1893 = vadd.xlane.f32.xlu1 %v1892_v54 }
 0xb88   : > { %1846 = vmatpush.bf16.msra.mxu2 %v1837_v53 }
 0xb98   : > { %1969 = vrot.lane.b32.xlu2 %v3925_v30, %s4259_s1  ;;  %s3006_s1 = sshll.u32 %s3479_s2, 2 }
 0xb99   : > { %s2518_s30 = scalar_lea.hbm %s4215_s19, %s3006_s1 }
 0xbd6   : > { %v1821_v55 = vpop.xlane.xlu1 %1820 }
 0xbd7   : > { %3248 = vrcp.f32 %v1821_v55 }
 0xbdd   : > { %v3249_v58 = vpop.eup %3248 }
 0xbde   : > { %v1824_v56 = vpop.xlane.xlu0 %1823  ;;  %v1827_v60 = vmul.f32 %v3249_v58, %v3233_v14 }
 0xbdf   : > { %3250 = vrcp.f32 %v1824_v56 }
 0xbe2   : > { %v1752_v57 = vpop.xlane.xlu2 %1751 }
 0xbe3   : > { %3252 = vrcp.f32 %v1752_v57  ;;  %v3172_v57 = vld [vmem:[%s4206_s10 + $0x1] ss:$0 sm:$0xff] }
 0xbe5   : > { %v3251_v59 = vpop.eup %3250 }
 0xbe6   : > { %v1828_v61 = vmul.f32 %v3251_v59, %v3235_v25 }
 0xbe8   : > { %v1829_v63 = vpack.c.bf16 %v1828_v61, %v1827_v60 }
 0xbe9   : > { %v3253_v2 = vpop.eup %3252 }
 0xbea   : > { %v1960_v0 = vpop.xlane.xlu2 %1959  ;;  %v1755_v1 = vpop.xlane.xlu1 %1754  ;;  %2832 = vmatmul.msk.bf16.vlgmr.msra.gmra.mxu2 %vm876_vm13, %v1829_v63  ;;  %v1758_v5 = vmul.f32 %v3253_v2, %v3237_v29 }
 0xbeb   : > { %3254 = vrcp.f32 %v1755_v1 }
 0xbf1   : > { %v1901_v3 = vpop.permute.xlu0 %1900  ;;  %v3255_v4 = vpop.eup %3254 }
 0xbf2   : > { %v1906_v30 = vand.u32 %v1901_v3, %v3628_v43  ;;  %v1963_v13 = vpop.xlane.xlu1 %1962  ;;  %v1759_v6 = vmul.f32 %v3255_v4, %v3241_v38  ;;  %v3057_v38 = vld [vmem:[%s4205_s9 + $0x20] sm:$0xff] }
 0xbf3   : > { %3256 = vrcp.f32 %v1963_v13  ;;  %v1891_v7 = vpop.xlane.xlu2 %1890 }
 0xbf4   : > { %3258 = vrcp.f32 %v1960_v0  ;;  %1915 = vmatpush.bf16.msrb.mxu0 %v1906_v30  ;;  %v1760_v12 = vpack.c.bf16 %v1759_v6, %v1758_v5 }
 0xbf5   : > { %3260 = vrcp.f32 %v1891_v7 }
 0xbf6   : > { %2830 = vmatmul.msk.bf16.vlgmr.msra.gmra.mxu0 %vm876_vm13, %v1760_v12 }
 0xbf9   : > { %v3257_v8 = vpop.eup %3256 }
 0xbfa   : > { %v3259_v9 = vpop.eup %3258  ;;  %v1894_v10 = vpop.xlane.xlu1 %1893  ;;  %v1967_v11 = vmul.f32 %v3257_v8, %v3243_v45  ;;  %v2900_v8 = vld [vmem:[%s4209_s13 + $0x70] sm:$0xf] }
 0xbfb   : > { %3262 = vrcp.f32 %v1894_v10  ;;  %v1970_v14 = vpop.permute.xlu2 %1969  ;;  %v1966_v17 = vmul.f32 %v3259_v9, %v3957_v36  ;;  %v3261_v18 = vpop.eup %3260  ;;  %v3059_v36 = vld [vmem:[%s4205_s9 + $0x30] sm:$0xff]  ;;  %v3068_v9 = vld [vmem:[%s4209_s13 + $0x74] sm:$0xf0] }
 0xbfc   : > { %v1975_v15 = vand.u32 %v1970_v14, %v3628_v43  ;;  %v1897_v21 = vmul.f32 %v3261_v18, %v3245_v47  ;;  %2068 = vmatpush.bf16.msra.mxu3 %v3059_v36  ;;  %v3067_v10 = vld [vmem:[%s4209_s13 + $0x74] sm:$0xf]  ;;  %v2902_v14 = vld [vmem:[%s4209_s13 + $0x78] sm:$0xf0]  ;;  %v3066_v18 = vld [vmem:[%s4209_s13 + $0x64] sm:$0xf0] }
 0xbfd   : > { %v1968_v19 = vpack.c.bf16 %v1967_v11, %v1966_v17  ;;  %v2901_v11 = vor.u32 %v3068_v9, %v2900_v8  ;;  %v2892_v17 = vld [vmem:[%s4209_s13 + $0x60] sm:$0xf]  ;;  %v3072_v8 = vld [vmem:[%s4211_s15 + $0x98] sm:$0xff] }
 0xbfe   : > { %1984 = vmatpush.bf16.msrb.mxu2 %v1975_v15  ;;  %v2905_v15 = vor.u32 %v3067_v10, %v2902_v14  ;;  %v3080_v9 = vld [vmem:[%s4211_s15 + $0xd8] sm:$0xff]  ;;  %v3071_v10 = vld [vmem:[%s4211_s15 + $0x90] sm:$0xff]  ;;  %v3070_v14 = vld [vmem:[%s4211_s15 + $0x88] sm:$0xff] }
 0xbff   : > { %2201 = vmatpush.bf16.msra.mxu0 %v2901_v11  ;;  %v3079_v11 = vld [vmem:[%s4211_s15 + $0xd0] sm:$0xff] }
 0xc00   : > { %2069 = vmatpush.bf16.msra.mxu3 %v3058_v37  ;;  %2215 = vmatpush.bf16.msra.mxu1 %v2905_v15  ;;  %v3078_v15 = vld [vmem:[%s4211_s15 + $0xc8] sm:$0xff] }
 0xc01   : > { %v3263_v20 = vpop.eup %3262  ;;  %2836 = vmatmul.msk.bf16.vlgmr.msrb.gmra.mxu2 %vm876_vm13, %v1968_v19  ;;  %v3065_v19 = vld [vmem:[%s4209_s13 + $0x64] sm:$0xf] }
 0xc02   : > { %v1898_v24 = vmul.f32 %v3263_v20, %v3247_v51  ;;  %v2893_v20 = vor.u32 %v3066_v18, %v2892_v17  ;;  %v2873_v17 = vld [vmem:[%s4210_s14 + $0x2] sm:$0x3] }
 0xc03   : > { %v3069_v18 = vld [vmem:[%s4211_s15 + $0x80] sm:$0xff] }
 0xc04   : > { %v1899_v25 = vpack.c.bf16 %v1898_v24, %v1897_v21  ;;  %2070 = vmatpush.bf16.msra.mxu3 %v3057_v38  ;;  %v2894_v21 = vld [vmem:[%s4209_s13 + $0x68] sm:$0xf0]  ;;  %2202 = vmatpush.bf16.msra.mxu0 %v2893_v20  ;;  %v2150_v20 = vperm.slane %v2873_v17, 0 }
 0xc05   : > { %v2897_v24 = vor.u32 %v3065_v19, %v2894_v21  ;;  %v3077_v19 = vld [vmem:[%s4211_s15 + $0xc0] sm:$0xff]  ;;  %v2151_v21 = vperm.slane %v2873_v17, 1 }
 0xc06   : > { %2834 = vmatmul.msk.bf16.vlgmr.msrb.gmra.mxu0 %vm876_vm13, %v1899_v25  ;;  %v2884_v25 = vld [vmem:[%s4209_s13 + $0x50] sm:$0xf] }
 0xc07   : > { %2216 = vmatpush.bf16.msra.mxu1 %v2897_v24 }
 0xc6d   : > { %v1848_v26 = vpop.f32.mrf.mxu2 }
 0xc73   : > { %v1777_v27 = vpop.f32.mrf.mxu0 }
 0xc75   : > { %v1850_v62 = vpop.f32.mrf.mxu2 }
 0xc76   : > { %v3148_v28 = vpack.i.bf16 %v1850_v62, %v1848_v26  ;;  %v3064_v26 = vld [vmem:[%s4209_s13 + $0x54] sm:$0xf0] }
 0xc77   : > { %v2885_v62 = vor.u32 %v3064_v26, %v2884_v25 }
 0xc78   : > { %3149 = vrot.lane.b32.xlu1 %v3148_v28, %s4258_s24  ;;  %v2886_v28 = vld [vmem:[%s4209_s13 + $0x58] sm:$0xf0]  ;;  %s619_s24 = sand.u32 1, %s3334_s22  }
 0xc79   : > { %2203 = vmatpush.bf16.msra.mxu0 %v2885_v62  ;;  %s2608_s27 = sshll.u32 %s619_s24, 2  ;;  %s2505_s20 = scalar_lea.sflag [#allocation3], %s619_s24 }
 0xc7a   : > { %s621_s25 = scalar_lea.vmem [#allocation2], %s2608_s27  ;;  %s3300_s27 = scalar_lea.hbm %s4215_s19, 8 }
 0xc7b   : > { %v1779_v43 = vpop.f32.mrf.mxu0  ;;  %s2520_s29 = sshll.u32 %s621_s25, 4  ;;  %s2521_s29 = int_to_ptr.vmem [resolvable:$true] %s2520_s29 }
 0xc83   : > { %v1917_v29 = vpop.f32.mrf.mxu0 }
 0xc84   : > { %v1986_v44 = vpop.f32.mrf.mxu2 }
 0xc8b   : > { %v1919_v31 = vpop.f32.mrf.mxu0 }
 0xc8c   : > { %v3153_v32 = vpack.i.bf16 %v1919_v31, %v1917_v29  ;;  %v1988_v33 = vpop.f32.mrf.mxu2  ;;  %v2876_v31 = vld [vmem:[%s4209_s13 + $0x40] sm:$0xf] }
 0xc8d   : > { %v3158_v34 = vpack.i.bf16 %v1988_v33, %v1986_v44  ;;  %v3061_v33 = vld [vmem:[%s4209_s13 + $0x44] sm:$0xf] }
 0xc8e   : > { %3154 = vrot.lane.b32.xlu0 %v3153_v32, %s4256_s28  ;;  %v3062_v32 = vld [vmem:[%s4209_s13 + $0x44] sm:$0xf0]  ;;  %v2881_v37 = vor.u32 %v3061_v33, %v2878_v35  ;;  %s2522_s28 = sshll.u32 %s2518_s30, 4  ;;  %s2523_s28 = int_to_ptr.hbm [resolvable:$true] %s2522_s28 }
 0xc96   : > { %3159 = vrot.lane.b32.xlu0 %v3158_v34, %s3349_s26  ;;  %v2877_v34 = vor.u32 %v3062_v32, %v2876_v31 }
 0xc98   : > { %2204 = vmatpush.bf16.msra.mxu0 %v2877_v34 }
 0xcea   : > { %v3150_v40 = vpop.permute.xlu1 %3149 }
 0xceb   : > { %v3152_v41 = vunpack.i.h.bf16 %v3150_v40  ;;  %v3151_v42 = vunpack.i.l.bf16 %v3150_v40 }
 0xced   : > { %v2016_v48 = vsel %vm855_vm12, %v1779_v43, %v3152_v41  ;;  %v2015_v49 = vsel %vm855_vm12, %v1777_v27, %v3151_v42  ;;  %v3063_v27 = vld [vmem:[%s4209_s13 + $0x54] sm:$0xf] }
 0xcee   : > { %v2889_v43 = vor.u32 %v3063_v27, %v2886_v28 }
 0xcf0   : > { %2217 = vmatpush.bf16.msra.mxu1 %v2889_v43 }
 0xcf4   : > { %2218 = vmatpush.bf16.msra.mxu1 %v2881_v37 }
 0xd00   : > { %v3155_v39 = vpop.permute.xlu0 %3154 }
 0xd01   : > { %v3157_v45 = vunpack.i.h.bf16 %v3155_v39  ;;  %v3156_v46 = vunpack.i.l.bf16 %v3155_v39 }
 0xd03   : > { %v2018_v52 = vsel %vm1161_vm15, %v2016_v48, %v3157_v45  ;;  %v2017_v53 = vsel %vm1161_vm15, %v2015_v49, %v3156_v46 }
 0xd08   : > { %v3160_v47 = vpop.permute.xlu0 %3159 }
 0xd09   : > { %v3162_v50 = vunpack.i.h.bf16 %v3160_v47  ;;  %v3161_v51 = vunpack.i.l.bf16 %v3160_v47 }
 0xd0b   : > { %v2019_v54 = vsel %vm1164_vm1, %v2017_v53, %v3161_v51  ;;  %v2020_v55 = vsel %vm1164_vm1, %v2018_v52, %v3162_v50 }
 0xd0c   : > { %v2021_v56 = vpack.c.bf16 %v2020_v55, %v2019_v54  ;;  %v3173_v55 = vld [vmem:[%s4207_s11 + $0x1] ss:$0 sm:$0xff] }
 0xd0e   : > { %2862 = vmatmul.msk.bf16.vlgmr.msra.gmra.mxu3 %vm673_vm0, %v2021_v56 }
 0xd91   : > { %v2072_v58 = vpop.f32.mrf.mxu3 }
 0xd92   : > { %v2073_v59 = vadd.f32 %v3172_v57, %v2072_v58 }
 0xd94   : > { %v4003_v60 = vadd.f32 %v2073_v59, %v3839_v16  ;;  %v3174_v59 = vld [vmem:[%s4208_s12 + $0x1] ss:$0 sm:$0xff] }
 0xd96   : > { %v2083_v61 = vsel %vm673_vm0, %v4003_v60, 0.0 }
 0xd97   : > { %2084 = vadd.xlane.f32.xlu2 %v2083_v61 }
 0xd99   : > { %v2074_v63 = vpop.f32.mrf.mxu3 }
 0xd9a   : > { %v2075_v0 = vadd.f32 %v3172_v57, %v2074_v63 }
 0xd9c   : > { %v4008_v1 = vadd.f32 %v2075_v0, %v3844_v22 }
 0xd9e   : > { %v2086_v2 = vsel %vm703_vm2, %v4008_v1, 0.0 }
 0xd9f   : > { %2087 = vadd.xlane.f32.xlu0 %v2086_v2 }
 0xe0a   : > { %v2085_v3 = vpop.xlane.xlu2 %2084 }
 0xe0b   : > { %v2089_v4 = vmul.f32 %v2085_v3, %v3545_v23 }
 0xe0d   : > { %v4014_v30 = vsub.f32 %v4003_v60, %v2089_v4 }
 0xe0f   : > { %v2093_v16 = vmul.f32 %v4014_v30, %v4014_v30 }
 0xe11   : > { %v2095_v13 = vsel %vm673_vm0, %v2093_v16, 0.0  ;;  %v3084_v16 = vld [vmem:[%s4211_s15 + $0xf8] sm:$0xff] }
 0xe12   : > { %v2088_v5 = vpop.xlane.xlu0 %2087  ;;  %2096 = vadd.xlane.f32.xlu1 %v2095_v13  ;;  %2411 = vmatpush.bf16.msrb.mxu3 %v3084_v16  ;;  %v3075_v13 = vld [vmem:[%s4211_s15 + $0xb0] sm:$0xff] }
 0xe13   : > { %v2090_v22 = vmul.f32 %v2088_v5, %v3545_v23  ;;  %v3083_v5 = vld [vmem:[%s4211_s15 + $0xf0] sm:$0xff] }
 0xe15   : > { %v4021_v6 = vsub.f32 %v4008_v1, %v2090_v22  ;;  %v3074_v22 = vld [vmem:[%s4211_s15 + $0xa8] sm:$0xff] }
 0xe16   : > { %2412 = vmatpush.bf16.msrb.mxu3 %v3083_v5 }
 0xe17   : > { %v2094_v7 = vmul.f32 %v4021_v6, %v4021_v6 }
 0xe19   : > { %v2098_v12 = vsel %vm703_vm2, %v2094_v7, 0.0  ;;  %v3073_v7 = vld [vmem:[%s4211_s15 + $0xa0] sm:$0xff] }
 0xe1a   : > { %2099 = vadd.xlane.f32.xlu2 %v2098_v12  ;;  %v3081_v12 = vld [vmem:[%s4211_s15 + $0xe0] sm:$0xff] }
 0xe85   : > { %v2097_v29 = vpop.xlane.xlu1 %2096 }
 0xe86   : > { %v2101_v44 = vmul.f32 %v2097_v29, %v3545_v23 }
 0xe88   : > { %v2103_v36 = vadd.f32 1e-06, %v2101_v44 }
 0xe8a   : > { %3264 = vrsqrt.f32 %v2103_v36  ;;  %vm2111_vm13 = vweird.f32 %v2103_v36 }
 0xe8d   : > { %v2100_v38 = vpop.xlane.xlu2 %2099 }
 0xe8e   : > { %v2102_v39 = vmul.f32 %v2100_v38, %v3545_v23 }
 0xe90   : > { %v3265_v40 = vpop.eup %3264  ;;  %v2104_v41 = vadd.f32 1e-06, %v2102_v39 }
 0xe91   : > { %v2106_v42 = vmul.f32 %v3265_v40, %v2103_v36  ;;  %vm2112_vm12 = vweird.f32 %v3265_v40 }
 0xe92   : > { %3266 = vrsqrt.f32 %v2104_v41  ;;  %vm2113_vm14 = vmor %vm2111_vm13, %vm2112_vm12  ;;  %vm2121_vm1 = vweird.f32 %v2104_v41 }
 0xe93   : > { %v2107_v45 = vmul.f32 %v3265_v40, %v2106_v42 }
 0xe95   : > { %v2108_v46 = vmul.f32 0.5, %v2107_v45 }
 0xe97   : > { %v2109_v47 = vsub.f32 1.5, %v2108_v46 }
 0xe98   : > { %v3267_v48 = vpop.eup %3266 }
 0xe99   : > { %v2110_v49 = vmul.f32 %v3265_v40, %v2109_v47  ;;  %v2116_v50 = vmul.f32 %v3267_v48, %v2104_v41  ;;  %vm2122_vm15 = vweird.f32 %v3267_v48 }
 0xe9a   : > { %vm2123_vm7 = vmor %vm2121_vm1, %vm2122_vm15 }
 0xe9b   : > { %v2117_v51 = vmul.f32 %v3267_v48, %v2116_v50  ;;  %v2114_v52 = vsel %vm2113_vm14, %v3265_v40, %v2110_v49 }
 0xe9c   : > { %v2125_v56 = vmul.f32 %v2114_v52, %v4014_v30  ;;  %v3076_v30 = vld [vmem:[%s4211_s15 + $0xb8] sm:$0xff] }
 0xe9d   : > { %v2118_v53 = vmul.f32 0.5, %v2117_v51  ;;  %2397 = vmatpush.bf16.msra.mxu2 %v3076_v30 }
 0xe9e   : > { %v2130_v61 = vmul.f32 %v3173_v55, %v2125_v56 }
 0xe9f   : > { %v2119_v54 = vsub.f32 1.5, %v2118_v53 }
 0xea0   : > { %v2135_v2 = vadd.f32 %v3174_v59, %v2130_v61 }
 0xea1   : > { %v2120_v57 = vmul.f32 %v3267_v48, %v2119_v54  ;;  %2398 = vmatpush.bf16.msra.mxu2 %v3075_v13 }
 0xea3   : > { %v2124_v58 = vsel %vm2123_vm7, %v3267_v48, %v2120_v57 }
 0xea4   : > { %v2126_v63 = vmul.f32 %v2124_v58, %v4021_v6  ;;  %v3082_v6 = vld [vmem:[%s4211_s15 + $0xe8] sm:$0xff] }
 0xea5   : > { %2399 = vmatpush.bf16.msra.mxu2 %v3074_v22  ;;  %2413 = vmatpush.bf16.msrb.mxu3 %v3082_v6  ;;  %v3175_v22 = vld [vmem:[%s4212_s16 + $0x1] ss:$0 sm:$0xff] }
 0xea6   : > { %v2131_v0 = vmul.f32 %v3173_v55, %v2126_v63 }
 0xea8   : > { %v2136_v3 = vadd.f32 %v3174_v59, %v2131_v0 }
 0xea9   : > { %2400 = vmatpush.bf16.msra.mxu2 %v3073_v7  ;;  %2414 = vmatpush.bf16.msrb.mxu3 %v3081_v12 }
 0xeaa   : > { %v2137_v4 = vpack.c.bf16 %v2136_v3, %v2135_v2 }
 0xeac   : > { %2906 = vmatmul.msk.bf16.vlgmr.msra.gmra.mxu0 %vm673_vm0, %v2137_v4  ;;  %2907 = vmatmul.msk.bf16.vlgmr.msra.gmra.mxu1 %vm673_vm0, %v2137_v4 }
 0xead   : > { %2401 = vmatpush.bf16.msra.mxu2 %v3072_v8  ;;  %2415 = vmatpush.bf16.msrb.mxu3 %v3080_v9 }
 0xeb1   : > { %2402 = vmatpush.bf16.msra.mxu2 %v3071_v10  ;;  %2416 = vmatpush.bf16.msrb.mxu3 %v3079_v11 }
 0xeb5   : > { %2403 = vmatpush.bf16.msra.mxu2 %v3070_v14  ;;  %2417 = vmatpush.bf16.msrb.mxu3 %v3078_v15 }
 0xeb9   : > { %2404 = vmatpush.bf16.msra.mxu2 %v3069_v18  ;;  %2418 = vmatpush.bf16.msrb.mxu3 %v3077_v19 }
 0xf29   : > { %v2206_v24 = vpop.f32.mrf.mxu0  ;;  %v2220_v25 = vpop.f32.mrf.mxu1 }
 0xf2a   : > { %v2207_v26 = vadd.f32 %v2206_v24, %v2150_v20  ;;  %v2221_v27 = vadd.f32 %v2220_v25, %v2151_v21 }
 0xf2c   : > { %v2229_v62 = vmul.f32 0.044715, %v2207_v26  ;;  %v2230_v28 = vmul.f32 0.044715, %v2221_v27  ;;  %v2225_v58 = vmul.f32 0.5, %v2207_v26  ;;  %v2226_v63 = vmul.f32 0.5, %v2221_v27 }
 0xf2e   : > { %v2233_v43 = vmul.f32 %v2229_v62, %v2207_v26  ;;  %v2234_v29 = vmul.f32 %v2230_v28, %v2221_v27 }
 0xf30   : > { %v2237_v44 = vmul.f32 %v2233_v43, %v2207_v26  ;;  %v2238_v31 = vmul.f32 %v2234_v29, %v2221_v27 }
 0xf31   : > { %v2208_v32 = vpop.f32.mrf.mxu0  ;;  %v2222_v33 = vpop.f32.mrf.mxu1 }
 0xf32   : > { %v2241_v34 = vadd.f32 %v2237_v44, %v2207_v26  ;;  %v2209_v35 = vadd.f32 %v2208_v32, %v2150_v20  ;;  %v2223_v36 = vadd.f32 %v2222_v33, %v2151_v21  ;;  %v2242_v37 = vadd.f32 %v2238_v31, %v2221_v27 }
 0xf34   : > { %v2231_v38 = vmul.f32 0.044715, %v2209_v35  ;;  %v2232_v39 = vmul.f32 0.044715, %v2223_v36  ;;  %v2245_v40 = vmul.f32 0.7978846, %v2241_v34 }
 0xf35   : > { %v2246_v42 = vmul.f32 0.7978846, %v2242_v37  ;;  %v2227_v59 = vmul.f32 0.5, %v2209_v35  ;;  %v2228_v0 = vmul.f32 0.5, %v2223_v36 }
 0xf36   : > { %v2235_v41 = vmul.f32 %v2231_v38, %v2209_v35  ;;  %v2236_v45 = vmul.f32 %v2232_v39, %v2223_v36  ;;  %3268 = vtanh.f32 %v2245_v40 }
 0xf37   : > { %3270 = vtanh.f32 %v2246_v42 }
 0xf38   : > { %v2239_v46 = vmul.f32 %v2235_v41, %v2209_v35  ;;  %v2240_v47 = vmul.f32 %v2236_v45, %v2223_v36 }
 0xf3a   : > { %v2243_v48 = vadd.f32 %v2239_v46, %v2209_v35  ;;  %v2244_v49 = vadd.f32 %v2240_v47, %v2223_v36 }
 0xf3c   : > { %v2247_v50 = vmul.f32 0.7978846, %v2243_v48  ;;  %v2248_v51 = vmul.f32 0.7978846, %v2244_v49  ;;  %v3269_v52 = vpop.eup %3268 }
 0xf3d   : > { %v3271_v53 = vpop.eup %3270  ;;  %v2253_v54 = vadd.f32 1.0, %v3269_v52 }
 0xf3e   : > { %3272 = vtanh.f32 %v2247_v50  ;;  %v2254_v56 = vadd.f32 1.0, %v3271_v53 }
 0xf3f   : > { %3274 = vtanh.f32 %v2248_v51  ;;  %v2257_v3 = vmul.f32 %v2253_v54, %v2225_v58  ;;  %v3177_v51 = vld [vmem:[%s4214_s18] ss:$0 sm:$0xff] }
 0xf40   : > { %v2258_v30 = vmul.f32 %v2254_v56, %v2226_v63 }
 0xf44   : > { %v3273_v55 = vpop.eup %3272 }
 0xf45   : > { %v3275_v57 = vpop.eup %3274  ;;  %v2255_v61 = vadd.f32 1.0, %v3273_v55 }
 0xf46   : > { %v2256_v2 = vadd.f32 1.0, %v3275_v57 }
 0xf47   : > { %v2259_v4 = vmul.f32 %v2255_v61, %v2227_v59 }
 0xf48   : > { %v2260_v16 = vmul.f32 %v2256_v2, %v2228_v0 }
 0xf49   : > { %v2261_v13 = vpack.c.bf16 %v2259_v4, %v2257_v3 }
 0xf4a   : > { %v2262_v5 = vpack.c.bf16 %v2260_v16, %v2258_v30 }
 0xf4b   : > { %2405 = vmatmul.bf16.vlgmr.msra.gmra.mxu2 %v2261_v13 }
 0xf4c   : > { %2419 = vmatmul.bf16.vlgmr.msrb.gmra.mxu3 %v2262_v5 }
 0xfce   : > { %v2406_v6 = vpop.f32.mrf.mxu2 }
 0xfcf   : > { %v2407_v7 = vadd.f32 %v3175_v22, %v2406_v6  ;;  %v2420_v12 = vpop.f32.mrf.mxu3 }
 0xfd1   : > { %v2421_v8 = vadd.f32 %v2420_v12, %v2407_v7 }
 0xfd3   : > { %v2425_v9 = vadd.f32 %v2421_v8, %v4003_v60 }
 0xfd5   : > { %v2429_v10 = vsel %vm673_vm0, %v2425_v9, 0.0 }
 0xfd6   : > { %v2408_v11 = vpop.f32.mrf.mxu2  ;;  %2430 = vadd.xlane.f32.xlu0 %v2429_v10 }
 0xfd7   : > { %v2409_v14 = vadd.f32 %v3175_v22, %v2408_v11  ;;  %v2422_v15 = vpop.f32.mrf.mxu3 }
 0xfd9   : > { %v2423_v17 = vadd.f32 %v2422_v15, %v2409_v14 }
 0xfdb   : > { %v2426_v18 = vadd.f32 %v2423_v17, %v4008_v1 }
 0xfdd   : > { %v2432_v19 = vsel %vm703_vm2, %v2426_v18, 0.0 }
 0xfde   : > { %2433 = vadd.xlane.f32.xlu1 %v2432_v19 }
0x1049   : > { %v2431_v20 = vpop.xlane.xlu0 %2430 }
0x104a   : > { %v2435_v21 = vmul.f32 %v2431_v20, %v3545_v23 }
0x104c   : > { %v2437_v24 = vsub.f32 %v2425_v9, %v2435_v21 }
0x104e   : > { %v2439_v25 = vmul.f32 %v2437_v24, %v2437_v24 }
0x1050   : > { %v2441_v26 = vsel %vm673_vm0, %v2439_v25, 0.0 }
0x1051   : > { %v2434_v60 = vpop.xlane.xlu1 %2433  ;;  %2442 = vadd.xlane.f32.xlu2 %v2441_v26 }
0x1052   : > { %v2436_v27 = vmul.f32 %v2434_v60, %v3545_v23 }
0x1054   : > { %v2438_v62 = vsub.f32 %v2426_v18, %v2436_v27 }
0x1056   : > { %v2440_v28 = vmul.f32 %v2438_v62, %v2438_v62 }
0x1058   : > { %v2444_v43 = vsel %vm703_vm2, %v2440_v28, 0.0 }
0x1059   : > { %2445 = vadd.xlane.f32.xlu0 %v2444_v43 }
0x10c4   : > { %v2443_v1 = vpop.xlane.xlu2 %2442 }
0x10c5   : > { %v2447_v29 = vmul.f32 %v2443_v1, %v3545_v23 }
0x10c7   : > { %v2449_v44 = vadd.f32 1e-06, %v2447_v29 }
0x10c9   : > { %3276 = vrsqrt.f32 %v2449_v44  ;;  %vm2457_vm2 = vweird.f32 %v2449_v44 }
0x10cc   : > { %v2446_v31 = vpop.xlane.xlu0 %2445 }
0x10cd   : > { %v2448_v32 = vmul.f32 %v2446_v31, %v3545_v23  ;;  %v3176_v23 = vld [vmem:[%s4213_s17] ss:$0 sm:$0xff] }
0x10cf   : > { %v3277_v33 = vpop.eup %3276  ;;  %v2450_v34 = vadd.f32 1e-06, %v2448_v32 }
0x10d0   : > { %v2452_v35 = vmul.f32 %v3277_v33, %v2449_v44  ;;  %vm2458_vm8 = vweird.f32 %v3277_v33 }
0x10d1   : > { %3278 = vrsqrt.f32 %v2450_v34  ;;  %vm2459_vm9 = vmor %vm2457_vm2, %vm2458_vm8  ;;  %vm2467_vm3 = vweird.f32 %v2450_v34 }
0x10d2   : > { %v2453_v36 = vmul.f32 %v3277_v33, %v2452_v35 }
0x10d4   : > { %v2454_v37 = vmul.f32 0.5, %v2453_v36 }
0x10d6   : > { %v2455_v38 = vsub.f32 1.5, %v2454_v37 }
0x10d7   : > { %v3279_v39 = vpop.eup %3278 }
0x10d8   : > { %v2456_v40 = vmul.f32 %v3277_v33, %v2455_v38  ;;  %v2462_v41 = vmul.f32 %v3279_v39, %v2450_v34  ;;  %vm2468_vm11 = vweird.f32 %v3279_v39 }
0x10d9   : > { %vm2469_vm4 = vmor %vm2467_vm3, %vm2468_vm11 }
0x10da   : > { %v2460_v42 = vsel %vm2459_vm9, %v3277_v33, %v2456_v40  ;;  %v2463_v45 = vmul.f32 %v3279_v39, %v2462_v41 }
0x10db   : > { %v2471_v47 = vmul.f32 %v2460_v42, %v2437_v24 }
0x10dc   : > { %v2464_v46 = vmul.f32 0.5, %v2463_v45 }
0x10dd   : > { %v2476_v50 = vmul.f32 %v3176_v23, %v2471_v47 }
0x10de   : > { %v2465_v48 = vsub.f32 1.5, %v2464_v46 }
0x10df   : > { %v2481_v55 = vadd.f32 %v3177_v51, %v2476_v50 }
0x10e0   : > { %v2466_v49 = vmul.f32 %v3279_v39, %v2465_v48 }
0x10e1   : > { %v2485_v57 = vrot.slane %v2481_v55, 4 }
0x10e2   : > { %v2470_v52 = vsel %vm2469_vm4, %v3279_v39, %v2466_v49 }
0x10e3   : > { %v2472_v53 = vmul.f32 %v2470_v52, %v2438_v62 }
0x10e5   : > { %v2477_v54 = vmul.f32 %v3176_v23, %v2472_v53 }
0x10e7   : > { %v2482_v56 = vadd.f32 %v3177_v51, %v2477_v54 }
0x10e9   : > { %v2486_v58 = vrot.slane %v2482_v56, 4 }
0x10eb   : > { %v2487_v59 = vsel %vm905_vm10, %v2485_v57, %v2486_v58 }
0x10ec   : > { %2488 = vrot.lane.b32.xlu1 %v2487_v59, %s3346_s0  ;;  %s3294_s0 = sshra.s32 %s2523_s28, 4  ;;  %s3295_s0 = int_to_ptr.hbm [resolvable:$true] %s3294_s0 }
0x10ed   : > { %s3296_s2 = scalar_lea.hbm %s3295_s0, 4  ;;  %p3301_p0 = scmp.lt.s32.totalorder %s3295_s0, %s4215_s19 }
0x10ee   : > { %p3297_p11 = scmp.ne.s32.totalorder %s3295_s0, %s3296_s2  ;;  %p3302_p1 = scmp.lt.s32.totalorder %s3300_s27, %s3296_s2 }
0x10f0   : > { %p3298_p12 = pnand %p3297_p11, %p3496_p5  ;;  %p3303_p2 = por %p3302_p1, %p3301_p0 }
0x10f2   : > { %p3299_p13 = pneg %p3298_p12 }
0x10f4   : > { %p3304_p3 = pnand %p3303_p2, %p3299_p13 }
0x115e   : > { %v2489_v61 = vpop.permute.xlu1 %2488 }
0x115f   : > { %v2491_v63 = vsel %vm673_vm0, %v2481_v55, %v2489_v61 }
0x1160   : > { %2492 = vst [vmem:[%s621_s25 - $0x1] sm:$0x1e] %v2491_v63  ;;  %v2494_v0 = vrot.slane %v2491_v63, 1 }
0x1161   : > { %3307 = shalt.err (!%p3304_p3)
}
0x1162   : > { %s4260_s24 = sld [smem:[#allocation11_spill]]  ;;  %v2496_v2 = vsel %vm905_vm10, %v2494_v0, 0.0 }
0x1163   : > { %3085 = dma.vmem_to_hbm [thread:$0]  (%p3496_p5), %s2521_s29, 64, %s2523_s28, %s2505_s20   ;;  %v2497_v3 = vrot.slane %v2496_v2, 4 }
0x1164   : > { %s4261_s26 = sld [smem:[#allocation17_spill]] }
0x1165   : > { %v2498_v4 = vadd.f32 %v2497_v3, %v2496_v2 }
0x1167   : > { %v2499_v30 = vrot.slane %v2498_v4, 2 }
0x1169   : > { %v2500_v16 = vadd.f32 %v2499_v30, %v2498_v4 }
0x116a   : > { %s633_s1 = scalar_lea.vmem %s4261_s26, %s4260_s24 }
0x116b   : > { %v2501_v13 = vrot.slane %v2500_v16, 1 }
0x116d   : > { %v2502_v5 = vadd.f32 %v2501_v13, %v2500_v16 }
0x116f   : > { %2503 = vst [vmem:[%s633_s1] sm:$0x1] %v2502_v5 }
0x1170 PF: > { %s4262_s0 = sld [smem:[#allocation7_spill]] }
0x1171   : > { %s4263_s2 = sld [smem:[#allocation5_spill]] }
0x1176   : > { %p3091_p4 = scmp.ge.s32.totalorder %s4262_s0, 2 }
0x1177   : > { %s2537_s4 = sand.u32 1, %s4263_s2  }
0x1178   : > { %p3088_p5 = pnand %p3091_p4, %p3500_p6  ;;  %s2538_s29 = scalar_lea.sflag [#allocation3], %s2537_s4 }
0x117a   : > { %p3089_p7 = pneg %p3088_p5 }
0x117c   : > { %3325 = dma.done.wait (%p3089_p7), %s2538_s29, 64  }
0x117d   : > { %3327 = vsyncadd (%p3089_p7), %s2538_s29, 4294967232  ;;  %s4265_s24 = sld [smem:[#allocation8_spill]]  ;;  %s4268_s1 = smov %s3334_s22 }
0x117e   : > { %s4266_s28 = sld [smem:[#allocation6_spill]] }
0x117f   : > { %s4267_s23 = sld [smem:[#allocation9_spill]] }
0x1183   : > { %p31_p8 = scmp.ge.s32.totalorder %s4265_s24, 4  }
0x1184   : > { %s4269_s22 = smov %s4266_s28 }
0x1185   :  { %33 = sbr.rel (!%p31_p8) target bundleno = 10 (0xa), region = 155 }
0x118a   :  { %2550 = vsyncpa [#allocation3], 1 }
0x118b   :  { %2552 = vsyncpa [#allocation3 + $0x1], 1 }

// kernel: _lambda_.3
= control target key start
LH: loop header
LB: loop body
LE: loop exit
PB: predicated region body
PF: predicated region fallthrough
CT: control target
= control target key end

     0   :  { %s3695_s0 = inlined_call_operand.vmem [shape: f32[2,4,64], index: 0, kind: input, shape index: {}]   ;;  %s3696_s1 = inlined_call_operand.vmem [shape: f32[1,1,64], index: 1, kind: input, shape index: {}]   ;;  %s3697_s2 = inlined_call_operand.vmem [shape: f32[1,4,64], index: 2, kind: input, shape index: {}]   ;;  %s3698_s3 = inlined_call_operand.vmem [shape: bf16[64,64], index: 3, kind: input, shape index: {}]   ;;  %s3699_s4 = inlined_call_operand.vmem [shape: f32[1,64], index: 4, kind: input, shape index: {}]   ;;  %s3700_s5 = inlined_call_operand.vmem [shape: f32[2,1,64], index: 5, kind: input, shape index: {}]   ;;  %s3701_s6 = inlined_call_operand.vmem [shape: f32[2,1,64], index: 6, kind: input, shape index: {}]   ;;  %s3702_s7 = inlined_call_operand.vmem [shape: bf16[2,64,192], index: 7, kind: input, shape index: {}]   ;;  %s3703_s8 = inlined_call_operand.vmem [shape: f32[2,1,192], index: 8, kind: input, shape index: {}]   ;;  %s3704_s9 = inlined_call_operand.vmem [shape: bf16[2,64,64], index: 9, kind: input, shape index: {}]   ;;  %s3705_s10 = inlined_call_operand.vmem [shape: f32[2,1,64], index: 10, kind: input, shape index: {}]   ;;  %s3706_s11 = inlined_call_operand.vmem [shape: f32[2,1,64], index: 11, kind: input, shape index: {}]   ;;  %s3707_s12 = inlined_call_operand.vmem [shape: f32[2,1,64], index: 12, kind: input, shape index: {}]   ;;  %s3708_s13 = inlined_call_operand.vmem [shape: bf16[2,64,256], index: 13, kind: input, shape index: {}]   ;;  %s3709_s14 = inlined_call_operand.vmem [shape: f32[2,1,256], index: 14, kind: input, shape index: {}]   ;;  %s3710_s15 = inlined_call_operand.vmem [shape: bf16[2,256,64], index: 15, kind: input, shape index: {}]   ;;  %s3711_s16 = inlined_call_operand.vmem [shape: f32[2,1,64], index: 16, kind: input, shape index: {}]   ;;  %s3712_s17 = inlined_call_operand.vmem [shape: f32[1,64], index: 17, kind: input, shape index: {}]   ;;  %s3713_s18 = inlined_call_operand.vmem [shape: f32[1,64], index: 18, kind: input, shape index: {}]   ;;  %s3714_s19 = inlined_call_operand.hbm [shape: f32[2,2,128], index: 19, kind: output, shape index: {0}]   ;;  %s3715_s20 = inlined_call_operand.vmem [shape: f32[2,1,128], index: 20, kind: output, shape index: {1}]  }
   0x1   :  { %3734 = sst [smem:[#allocation12_spill]] %s3695_s0 }
   0x2   :  { %3735 = sst [smem:[#allocation13_spill]] %s3696_s1 }
   0x3   :  { %3736 = sst [smem:[#allocation14_spill]] %s3697_s2 }
   0x4   :  { %3737 = sst [smem:[#allocation15_spill]] %s3698_s3 }
   0x5   :  { %3738 = sst [smem:[#allocation16_spill]] %s3699_s4 }
   0x6   :  { %3739 = sst [smem:[#allocation17_spill]] %s3715_s20 }
   0x7   :  { %26 = vsyncpa [#allocation3], 0 }
   0x8   :  { %28 = vsyncpa [#allocation3 + $0x1], 0  ;;  %s3065_s1 = smov 0   ;;  %s3067_s22 = smov 0  }
   0x9   :  { %s3069_s23 = smov 0   ;;  %s3071_s24 = smov 0  }
   0xa LB: > { %3740 = sst [smem:[#allocation5_spill]] %s2937_s1  ;;  %s3086_s2 = sadd.s32 4294967295, %s2949_s24   ;;  %s2949_s24 = sphi %s3071_s24, %s3764_s24   ;;  %s2945_s23 = sphi %s3069_s23, %s3766_s23   ;;  %s2941_s22 = sphi %s3067_s22, %s3768_s22   ;;  %s2937_s1 = sphi %s3065_s1, %s3767_s1  }
   0xb   : > { %3741 = sst [smem:[#allocation6_spill]] %s2945_s23  ;;  %s2291_s25 = sadd.s32 4294967294, %s2949_s24  }
   0xc   : > { %3742 = sst [smem:[#allocation7_spill]] %s2949_s24  ;;  %s3090_s3 = sadd.s32 1, %s2949_s24  }
   0xd   : > { %3743 = sst [smem:[#allocation8_spill]] %s3090_s3  ;;  %s445_s26 = sadd.s32 1, %s2945_s23 }
   0xe   : > { %s442_s27 = ssub.s32 %s2949_s24, %s3090_s3  ;;  %p455_p0 = scmp.ne.s32.totalorder %s2945_s23, %s2941_s22 }
   0xf   : > { %p443_p1 = scmp.eq.s32.totalorder %s442_s27, 0  ;;  %p456_p2 = scmp.eq.s32.totalorder %s3086_s2, 1 }
  0x10   : > { %p461_p3 = scmp.ne.s32.totalorder %s2941_s22, %s2937_s1  ;;  %p462_p4 = scmp.eq.s32.totalorder %s2291_s25, 1 }
  0x11   : > { %s3101_s28 = scalar_select %p443_p1, %s2945_s23, %s445_s26  }
  0x12   : > { %p3103_p5 = por %p456_p2, %p455_p0  ;;  %p3107_p6 = por %p462_p4, %p461_p3 }
  0x13   : > { %3744 = sst [smem:[#allocation9_spill]] %s3101_s28  ;;  %p2294_p7 = scmp.ge.s32.totalorder %s2949_s24, 1 }
  0x14   : > { %s3746_s29 = scalar_select %p3107_p6, 1, 0 }
  0x15   : > { %p567_p8 = scmp.lt.s32.totalorder %s2949_s24, 3 }
  0x16   : > { %3747 = sst [smem:[#allocation10_spill]] %s3746_s29 }
  0x17   : > { %p568_p9 = pnand %p2294_p7, %p567_p8 }
  0x19   : > { %571 = sbr.rel (%p568_p9) target bundleno = 4361 (0x1109), region = 96 }
  0x1e   : > { %s3748_s21 = sld [smem:[#allocation15_spill]]  ;;  %p627_p10 = scmp.lt.s32.totalorder %s3086_s2, 1  ;;  %vm673_vm0 = vcmask 523264   ;;  %vm696_vm1 = vcmask 1040384   ;;  %vm700_vm2 = vcmask 520192   ;;  %v2951_v16 = vmov 64.0  }
  0x1f   : > { %s3750_s0 = sld [smem:[#allocation12_spill]]  ;;  %2835 = vrcp.f32 %v2951_v16  ;;  %v2340_v28 = vld [vmem:[%s3702_s7 + $0x30] sm:$0xf]  ;;  %v2707_v29 = vld [vmem:[%s3702_s7 + $0x34] sm:$0xf0]  ;;  %vm866_vm7 = vcmask 1041408  }
  0x20   : > { %s3121_s27 = scalar_select %p627_p10, %s3086_s2, 1  ;;  %v2706_v30 = vld [vmem:[%s3702_s7 + $0x34] sm:$0xf]  ;;  %v2341_v31 = vor.u32 %v2707_v29, %v2340_v28  ;;  %v2342_v32 = vld [vmem:[%s3702_s7 + $0x38] sm:$0xf0]  ;;  %vm867_vm8 = vcmask 1042432  }
  0x21   : > { %s3752_s29 = sld [smem:[#allocation14_spill]]  ;;  %v2345_v33 = vor.u32 %v2706_v30, %v2342_v32  ;;  %v2332_v34 = vld [vmem:[%s3702_s7 + $0x20] sm:$0xf]  ;;  %v2705_v35 = vld [vmem:[%s3702_s7 + $0x24] sm:$0xf0]  ;;  %s3728_s30 = smov 32  }
  0x22   : > { %3749 = sst [smem:[#allocation11_spill]] %s3121_s27  ;;  %s2296_s28 = sshll.u32 %s3121_s27, 2  ;;  %800 = vmatpush.bf16.msra.mxu1 %v2341_v31  ;;  %v2704_v36 = vld [vmem:[%s3702_s7 + $0x24] sm:$0xf]  ;;  %v2333_v37 = vor.u32 %v2705_v35, %v2332_v34  ;;  %v2334_v38 = vld [vmem:[%s3702_s7 + $0x28] sm:$0xf0] }
  0x23   : > { %s3751_s27 = sld [smem:[#allocation16_spill]]  ;;  %813 = vmatpush.bf16.msra.mxu2 %v2345_v33  ;;  %v2337_v39 = vor.u32 %v2704_v36, %v2334_v38  ;;  %v2324_v40 = vld [vmem:[%s3702_s7 + $0x10] sm:$0xf]  ;;  %v2703_v41 = vld [vmem:[%s3702_s7 + $0x14] sm:$0xf0]  ;;  %s3724_s25 = smov 96  }
  0x24   : > { %v2699_v0 = vld [vmem:[%s3748_s21 + $0x18] sm:$0xff]  ;;  %v2698_v1 = vld [vmem:[%s3748_s21 + $0x10] sm:$0xff]  ;;  %v2697_v2 = vld [vmem:[%s3748_s21 + $0x8] sm:$0xff]  ;;  %s3753_s24 = sld [smem:[#allocation13_spill]]  ;;  %v2325_v43 = vor.u32 %v2703_v41, %v2324_v40  ;;  %s2956_s26 = smov 48   ;;  %vm828_vm9 = vcmask 130048  }
  0x25   : > { %681 = vmatpush.bf16.msra.mxu0 %v2699_v0  ;;  %s630_s1 = scalar_lea.vmem %s3750_s0, %s2296_s28  ;;  %v2696_v3 = vld [vmem:[%s3748_s21] sm:$0xff]  ;;  %v2836_v17 = vpop.eup %2835  ;;  %v2702_v42 = vld [vmem:[%s3702_s7 + $0x14] sm:$0xf]  ;;  %v2326_v44 = vld [vmem:[%s3702_s7 + $0x18] sm:$0xf0]  ;;  %s2953_s0 = smov 64  }
  0x26   : > { %v635_v4 = vld [vmem:[%s630_s1] sm:$0xf]  ;;  %v705_v18 = vmul.f32 64.0, %v2836_v17  ;;  %vm709_vm3 = vweird.f32 %v2836_v17  ;;  %801 = vmatpush.bf16.msra.mxu1 %v2333_v37  ;;  %v2701_v46 = vld [vmem:[%s3702_s7 + $0x4] sm:$0xf0]  ;;  %v2329_v47 = vor.u32 %v2702_v42, %v2326_v44  ;;  %s3732_s23 = smov 112  }
  0x27   : > { %v636_v5 = vpack.c.bf16 %v635_v4, %v635_v4  ;;  %v690_v8 = vld [vmem:[%s3752_s29] sm:$0xf]  ;;  %814 = vmatpush.bf16.msra.mxu2 %v2337_v39  ;;  %v2700_v48 = vld [vmem:[%s3702_s7 + $0x4] sm:$0xf]  ;;  %v2318_v49 = vld [vmem:[%s3702_s7 + $0x8] sm:$0xf0] }
  0x28   : > { %v706_v19 = vsub.f32 1.0, %v705_v18  ;;  %v2316_v45 = vld [vmem:[%s3702_s7] sm:$0xf]  ;;  %v2321_v51 = vor.u32 %v2700_v48, %v2318_v49  ;;  %s3730_s3 = smov 16   ;;  %s3726_s29 = smov 80   ;;  %vm848_vm10 = vcmask 36864  }
  0x29   : > { %682 = vmatpush.bf16.msra.mxu0 %v2698_v1  ;;  %v2820_v6 = vld [vmem:[%s3751_s27] ss:$0 sm:$0xff]  ;;  %v2317_v50 = vor.u32 %v2701_v46, %v2316_v45  ;;  %vm862_vm11 = vcmask 39936   ;;  %vm1069_vm12 = vcmask 261120   ;;  %vm1071_vm13 = vcmask 392192   ;;  %s3756_s20 = smov 32  }
  0x2a   : > { %v692_v11 = vld [vmem:[%s3753_s24] sm:$0x1]  ;;  %v707_v20 = vmul.f32 %v2836_v17, %v706_v19  ;;  %802 = vmatpush.bf16.msra.mxu1 %v2325_v43  ;;  %s3757_s24 = smov 80   ;;  %s3758_s1 = smov 96  }
  0x2b   : > { %815 = vmatpush.bf16.msra.mxu2 %v2329_v47  ;;  %v2821_v61 = vld [vmem:[%s3700_s5] ss:$0 sm:$0xff] }
  0x2c   : > { %v708_v21 = vadd.f32 %v2836_v17, %v707_v20  ;;  %v2822_v0 = vld [vmem:[%s3701_s6] ss:$0 sm:$0xff] }
  0x2d   : > { %683 = vmatpush.bf16.msra.mxu0 %v2697_v2  ;;  %v747_v4 = vld [vmem:[%s3703_s8] sm:$0x3] }
  0x2e   : > { %v3147_v22 = vsel %vm709_vm3, %v2836_v17, %v708_v21  ;;  %803 = vmatpush.bf16.msra.mxu1 %v2317_v50 }
  0x2f   : > { %816 = vmatpush.bf16.msra.mxu2 %v2321_v51 }
  0x31   : > { %684 = vmatpush.bf16.msra.mxu0 %v2696_v3 }
  0x34   : > { %2313 = vmatmul.msk.bf16.vlgmr.msra.gmra.mxu0 %vm673_vm0, %v636_v5  ;;  %v749_v5 = vperm.slane %v747_v4, 0 }
  0xb1   : > { %v686_v7 = vpop.f32.mrf.mxu0 }
  0xb2   : > { %v687_v9 = vadd.f32 %v2820_v6, %v686_v7 }
  0xb4   : > { %v691_v10 = vadd.f32 %v690_v8, %v687_v9 }
  0xb6   : > { %v694_v12 = vrot.slane %v691_v10, 7  ;;  %v750_v10 = vperm.slane %v747_v4, 1 }
  0xb8   : > { %v3143_v13 = vsel %vm696_vm1, %v692_v11, %v694_v12  ;;  %v2954_v12 = vmov 65535  }
  0xb9   : > { %v688_v14 = vpop.f32.mrf.mxu0  ;;  %v701_v15 = vsel %vm700_vm2, %v3143_v13, 0.0 }
  0xba   : > { %702 = vadd.xlane.f32.xlu0 %v701_v15  ;;  %v868_v14 = vsel %vm866_vm7, 4294967295, %v2954_v12 }
  0xbb   : > { %v3216_v18 = vsel %vm867_vm8, %v868_v14, 0 }
 0x12d   : > { %v703_v23 = vpop.xlane.xlu0 %702 }
 0x12e   : > { %v711_v24 = vmul.f32 %v3147_v22, %v703_v23 }
 0x130   : > { %v712_v25 = vsub.f32 %v3143_v13, %v711_v24 }
 0x132   : > { %v713_v26 = vmul.f32 %v712_v25, %v712_v25 }
 0x134   : > { %v714_v27 = vsel %vm700_vm2, %v713_v26, 0.0 }
 0x135   : > { %715 = vadd.xlane.f32.xlu0 %v714_v27 }
 0x1a8   : > { %v716_v52 = vpop.xlane.xlu0 %715 }
 0x1a9   : > { %v717_v53 = vmul.f32 %v716_v52, %v3147_v22 }
 0x1ab   : > { %v718_v54 = vadd.f32 1e-06, %v717_v53 }
 0x1ad   : > { %2837 = vrsqrt.f32 %v718_v54  ;;  %vm725_vm5 = vweird.f32 %v718_v54 }
 0x1b3   : > { %v2838_v55 = vpop.eup %2837 }
 0x1b4   : > { %v720_v56 = vmul.f32 %v2838_v55, %v718_v54  ;;  %vm726_vm4 = vweird.f32 %v2838_v55 }
 0x1b5   : > { %vm727_vm6 = vmor %vm725_vm5, %vm726_vm4 }
 0x1b6   : > { %v721_v57 = vmul.f32 %v2838_v55, %v720_v56 }
 0x1b8   : > { %v722_v58 = vmul.f32 0.5, %v721_v57 }
 0x1ba   : > { %v723_v59 = vsub.f32 1.5, %v722_v58 }
 0x1bc   : > { %v724_v60 = vmul.f32 %v2838_v55, %v723_v59 }
 0x1be   : > { %v728_v62 = vsel %vm727_vm6, %v2838_v55, %v724_v60 }
 0x1bf   : > { %v729_v63 = vmul.f32 %v728_v62, %v712_v25 }
 0x1c1   : > { %v733_v1 = vmul.f32 %v2821_v61, %v729_v63 }
 0x1c3   : > { %v737_v2 = vadd.f32 %v2822_v0, %v733_v1 }
 0x1c5   : > { %v738_v3 = vpack.c.bf16 %v737_v2, %v737_v2 }
 0x1c7   : > { %2346 = vmatmul.msk.bf16.vlgmr.msra.gmra.mxu1 %vm673_vm0, %v738_v3  ;;  %2347 = vmatmul.msk.bf16.vlgmr.msra.gmra.mxu2 %vm673_vm0, %v738_v3 }
 0x244   : > { %v805_v6 = vpop.f32.mrf.mxu1 }
 0x245   : > { %v806_v7 = vadd.f32 %v805_v6, %v749_v5 }
 0x247   : > { %v822_v8 = vmul.f32 0.25, %v806_v7  ;;  %v824_v9 = vpack.c.bf16 %v806_v7, %v806_v7 }
 0x249   : > { %v823_v11 = vpack.c.bf16 %v822_v8, %v822_v8  ;;  %946 = vrot.lane.b32.xlu2 %v824_v9, %s3728_s30  ;;  %826 = vrot.lane.b32.xlu1 %v824_v9, %s2953_s0 }
 0x24a   : > { %v818_v15 = vpop.f32.mrf.mxu2 }
 0x24b   : > { %v819_v16 = vadd.f32 %v818_v15, %v750_v10  ;;  %944 = vrot.lane.b32.xlu0 %v823_v11, %s3724_s25 }
 0x24c   : > { %v807_v17 = vpop.f32.mrf.mxu1 }
 0x24d   : > { %v3218_v19 = vpack.c.bf16 %v819_v16, %v819_v16 }
 0x24f   : > { %v871_v20 = vand.u32 %v3216_v18, %v3218_v19 }
 0x251   : > { %880 = vmatpush.bf16.msra.mxu3 %v871_v20  ;;  %889 = vrot.lane.b32.xlu1 %v824_v9, %s2956_s26 }
 0x252   : > { %887 = vrot.lane.b32.xlu2 %v823_v11, %s3732_s23  ;;  %v820_v21 = vpop.f32.mrf.mxu2 }
 0x259   : > { %1002 = vrot.lane.b32.xlu1 %v824_v9, %s3730_s3 }
 0x25a   : > { %1000 = vrot.lane.b32.xlu2 %v823_v11, %s3726_s29 }
 0x2a3   : > { %v947_v23 = vpop.permute.xlu2 %946 }
 0x2a4   : > { %v952_v24 = vsel %vm828_vm9, %v947_v23, 0 }
 0x2a5   : > { %961 = vmatpush.bf16.xpose.msrb.mxu2 %v952_v24 }
 0x2ac   : > { %v888_v32 = vpop.permute.xlu2 %887 }
 0x2b4   : > { %v1001_v33 = vpop.permute.xlu2 %1000 }
 0x2bb   : > { %v827_v25 = vpop.permute.xlu1 %826 }
 0x2bc   : > { %v833_v26 = vsel %vm828_vm9, %v827_v25, 0 }
 0x2bd   : > { %842 = vmatpush.bf16.xpose.msrb.mxu0 %v833_v26  ;;  %v945_v27 = vpop.permute.xlu0 %944 }
 0x2be   : > { %2352 = vmatmul.msk.bf16.vlgmr.msrb.gmra.mxu2 %vm828_vm9, %v945_v27 }
 0x2c3   : > { %v890_v28 = vpop.permute.xlu1 %889 }
 0x2c4   : > { %v895_v29 = vsel %vm828_vm9, %v890_v28, 0  ;;  %2348 = vmatmul.msk.bf16.vlgmr.msrb.gmra.mxu0 %vm828_vm9, %v823_v11 }
 0x2c5   : > { %904 = vmatpush.bf16.xpose.msra.mxu0 %v895_v29 }
 0x2cb   : > { %v1003_v30 = vpop.permute.xlu1 %1002 }
 0x2cc   : > { %v1008_v31 = vsel %vm828_vm9, %v1003_v30, 0 }
 0x2cd   : > { %1017 = vmatpush.bf16.xpose.msrb.mxu0 %v1008_v31 }
 0x2d4   : > { %2350 = vmatmul.msk.bf16.vlgmr.msra.gmra.mxu0 %vm828_vm9, %v888_v32 }
 0x2e4   : > { %2354 = vmatmul.msk.bf16.vlgmr.msrb.gmra.mxu0 %vm828_vm9, %v1001_v33 }
 0x341   : > { %v844_v34 = vpop.f32.mrf.mxu0  ;;  %v963_v35 = vpop.f32.mrf.mxu2 }
 0x342   : > { %v967_v36 = vsel %vm848_vm10, %v963_v35, -inf  ;;  %v849_v37 = vsel %vm848_vm10, %v844_v34, -inf }
 0x343   : > { %968 = vmax.xlane.f32.xlu0 %v967_v36  ;;  %850 = vmax.xlane.f32.xlu1 %v849_v37  ;;  %v2710_v36 = vld [vmem:[%s3704_s9 + $0x10] sm:$0xff]  ;;  %v2709_v37 = vld [vmem:[%s3704_s9 + $0x8] sm:$0xff] }
 0x349   : > { %v846_v38 = vpop.f32.mrf.mxu0  ;;  %v965_v39 = vpop.f32.mrf.mxu2 }
 0x34a   : > { %v2708_v38 = vld [vmem:[%s3704_s9] sm:$0xff] }
 0x351   : > { %v906_v40 = vpop.f32.mrf.mxu0 }
 0x352   : > { %v910_v41 = vsel %vm848_vm10, %v906_v40, -inf }
 0x353   : > { %911 = vmax.xlane.f32.xlu2 %v910_v41 }
 0x359   : > { %v908_v42 = vpop.f32.mrf.mxu0 }
 0x361   : > { %v1019_v43 = vpop.f32.mrf.mxu0 }
 0x362   : > { %v1023_v44 = vsel %vm848_vm10, %v1019_v43, -inf }
 0x363   : > { %1024 = vmax.xlane.f32.xlu2 %v1023_v44 }
 0x369   : > { %v1021_v45 = vpop.f32.mrf.mxu0 }
 0x3b6   : > { %v969_v46 = vpop.xlane.xlu0 %968  ;;  %v851_v47 = vpop.xlane.xlu1 %850 }
 0x3b7   : > { %v970_v48 = vsub.f32 %v963_v35, %v969_v46  ;;  %v852_v49 = vsub.f32 %v844_v34, %v851_v47  ;;  %v2711_v35 = vld [vmem:[%s3704_s9 + $0x18] sm:$0xff]  ;;  %v2823_v46 = vld [vmem:[%s3705_s10] ss:$0 sm:$0xff] }
 0x3b8   : > { %1117 = vmatpush.bf16.msra.mxu2 %v2711_v35 }
 0x3b9   : > { %v971_v50 = vmul.f32 1.442695, %v970_v48  ;;  %v853_v51 = vmul.f32 1.442695, %v852_v49 }
 0x3bb   : > { %2839 = vpow2.f32 %v971_v50 }
 0x3bc   : > { %2841 = vpow2.f32 %v853_v51  ;;  %1118 = vmatpush.bf16.msra.mxu2 %v2710_v36 }
 0x3c0   : > { %1119 = vmatpush.bf16.msra.mxu2 %v2709_v37  ;;  %v2727_v37 = vld [vmem:[%s3710_s15 + $0x38] sm:$0xff] }
 0x3c1   : > { %v2840_v52 = vpop.eup %2839 }
 0x3c2   : > { %v2842_v53 = vpop.eup %2841  ;;  %v973_v54 = vsel %vm848_vm10, %v2840_v52, 0.0 }
 0x3c3   : > { %974 = vadd.xlane.f32.xlu0 %v973_v54  ;;  %v855_v55 = vsel %vm848_vm10, %v2842_v53, 0.0 }
 0x3c4   : > { %856 = vadd.xlane.f32.xlu1 %v855_v55  ;;  %1120 = vmatpush.bf16.msra.mxu2 %v2708_v38  ;;  %v2733_v38 = vld [vmem:[%s3710_s15 + $0x68] sm:$0xff] }
 0x3c6   : > { %v912_v56 = vpop.xlane.xlu2 %911 }
 0x3c7   : > { %v913_v57 = vsub.f32 %v906_v40, %v912_v56 }
 0x3c9   : > { %v914_v58 = vmul.f32 1.442695, %v913_v57  ;;  %v2399_v57 = vld [vmem:[%s3708_s13 + $0x30] sm:$0xf] }
 0x3cb   : > { %2843 = vpow2.f32 %v914_v58  ;;  %v2718_v58 = vld [vmem:[%s3708_s13 + $0x34] sm:$0xf] }
 0x3d1   : > { %v2844_v59 = vpop.eup %2843 }
 0x3d2   : > { %v916_v60 = vsel %vm848_vm10, %v2844_v59, 0.0 }
 0x3d3   : > { %917 = vadd.xlane.f32.xlu2 %v916_v60  ;;  %v2401_v60 = vld [vmem:[%s3708_s13 + $0x38] sm:$0xf0] }
 0x3d6   : > { %v1025_v61 = vpop.xlane.xlu2 %1024 }
 0x3d7   : > { %v1026_v62 = vsub.f32 %v1019_v43, %v1025_v61  ;;  %v2404_v61 = vor.u32 %v2718_v58, %v2401_v60 }
 0x3d9   : > { %v1027_v63 = vmul.f32 1.442695, %v1026_v62  ;;  %1234 = vmatpush.bf16.msra.mxu0 %v2404_v61  ;;  %v2391_v62 = vld [vmem:[%s3708_s13 + $0x20] sm:$0xf] }
 0x3db   : > { %2845 = vpow2.f32 %v1027_v63  ;;  %v2717_v63 = vld [vmem:[%s3708_s13 + $0x24] sm:$0xf0] }
 0x3dd   : > { %923 = vrot.lane.b32.xlu1 %v3218_v19, %s3732_s23 }
 0x3e1   : > { %v2846_v0 = vpop.eup %2845 }
 0x3e2   : > { %v1029_v1 = vsel %vm848_vm10, %v2846_v0, 0.0 }
 0x3e3   : > { %1030 = vadd.xlane.f32.xlu0 %v1029_v1  ;;  %v2392_v1 = vor.u32 %v2717_v63, %v2391_v62 }
 0x3eb   : > { %979 = vrot.lane.b32.xlu2 %v3218_v19, %s3724_s25 }
 0x3f7   : > { %1035 = vrot.lane.b32.xlu0 %v3218_v19, %s3726_s29  ;;  %s3755_s29 = smov 16  }
 0x436   : > { %v975_v6 = vpop.xlane.xlu0 %974 }
 0x437   : > { %v857_v2 = vpop.xlane.xlu1 %856 }
 0x438   : > { %2847 = vrcp.f32 %v857_v2  ;;  %v2393_v2 = vld [vmem:[%s3708_s13 + $0x28] sm:$0xf0] }
 0x439   : > { %2849 = vrcp.f32 %v975_v6  ;;  %v2714_v6 = vld [vmem:[%s3708_s13 + $0x14] sm:$0xf] }
 0x43e   : > { %v2848_v3 = vpop.eup %2847 }
 0x43f   : > { %v859_v4 = vmul.f32 %v2848_v3, %v2842_v53  ;;  %v2850_v8 = vpop.eup %2849 }
 0x440   : > { %v977_v10 = vmul.f32 %v2850_v8, %v2840_v52  ;;  %v2385_v8 = vld [vmem:[%s3708_s13 + $0x18] sm:$0xf0] }
 0x441   : > { %v860_v5 = vpack.c.bf16 %v859_v4, %v859_v4  ;;  %v2383_v4 = vld [vmem:[%s3708_s13 + $0x10] sm:$0xf] }
 0x442   : > { %v978_v17 = vpack.c.bf16 %v977_v10, %v977_v10  ;;  %v2375_v10 = vld [vmem:[%s3708_s13] sm:$0xf] }
 0x443   : > { %2349 = vmatmul.msk.bf16.vlgmr.msra.gmra.mxu3 %vm862_vm11, %v860_v5  ;;  %v2715_v5 = vld [vmem:[%s3708_s13 + $0x14] sm:$0xf0] }
 0x446   : > { %v918_v7 = vpop.xlane.xlu2 %917 }
 0x447   : > { %2851 = vrcp.f32 %v918_v7  ;;  %v2384_v7 = vor.u32 %v2715_v5, %v2383_v4 }
 0x44d   : > { %v2852_v9 = vpop.eup %2851 }
 0x44e   : > { %v980_v11 = vpop.permute.xlu2 %979  ;;  %v920_v12 = vmul.f32 %v2852_v9, %v2844_v59  ;;  %v2388_v9 = vor.u32 %v2714_v6, %v2385_v8 }
 0x44f   : > { %v924_v14 = vpop.permute.xlu1 %923  ;;  %v985_v15 = vand.u32 %v980_v11, %v3216_v18  ;;  %v2713_v11 = vld [vmem:[%s3708_s13 + $0x4] sm:$0xf0] }
 0x450   : > { %v929_v16 = vand.u32 %v924_v14, %v3216_v18  ;;  %v921_v19 = vpack.c.bf16 %v920_v12, %v920_v12  ;;  %v2712_v12 = vld [vmem:[%s3708_s13 + $0x4] sm:$0xf]  ;;  %v2376_v14 = vor.u32 %v2713_v11, %v2375_v10 }
 0x451   : > { %994 = vmatpush.bf16.msrb.mxu3 %v985_v15  ;;  %v2377_v15 = vld [vmem:[%s3708_s13 + $0x8] sm:$0xf0] }
 0x452   : > { %938 = vmatpush.bf16.msrb.mxu1 %v929_v16  ;;  %v2380_v16 = vor.u32 %v2712_v12, %v2377_v15 }
 0x454   : > { %2353 = vmatmul.msk.bf16.vlgmr.msrb.gmra.mxu3 %vm862_vm11, %v978_v17  ;;  %v2735_v17 = vld [vmem:[%s3710_s15 + $0x78] sm:$0xff] }
 0x455   : > { %2351 = vmatmul.msk.bf16.vlgmr.msrb.gmra.mxu1 %vm862_vm11, %v921_v19  ;;  %1408 = vmatpush.bf16.msrb.mxu2 %v2735_v17  ;;  %v2826_v17 = vld [vmem:[%s3711_s16] ss:$0 sm:$0xff] }
 0x456   : > { %v1031_v20 = vpop.xlane.xlu0 %1030 }
 0x457   : > { %2853 = vrcp.f32 %v1031_v20 }
 0x45d   : > { %v2854_v21 = vpop.eup %2853 }
 0x45e   : > { %v1033_v23 = vmul.f32 %v2854_v21, %v2846_v0  ;;  %v2716_v0 = vld [vmem:[%s3708_s13 + $0x24] sm:$0xf]  ;;  %v2734_v21 = vld [vmem:[%s3710_s15 + $0x70] sm:$0xff] }
 0x45f   : > { %v2396_v3 = vor.u32 %v2716_v0, %v2393_v2  ;;  %1409 = vmatpush.bf16.msrb.mxu2 %v2734_v21 }
 0x460   : > { %v1034_v26 = vpack.c.bf16 %v1033_v23, %v1033_v23 }
 0x461   : > { %1235 = vmatpush.bf16.msra.mxu0 %v2396_v3 }
 0x463   : > { %1410 = vmatpush.bf16.msrb.mxu2 %v2733_v38  ;;  %v2500_v38 = vld [vmem:[%s3702_s7 + $0x60] sm:$0xf] }
 0x465   : > { %1236 = vmatpush.bf16.msra.mxu0 %v2388_v9 }
 0x469   : > { %v1036_v24 = vpop.permute.xlu0 %1035  ;;  %1237 = vmatpush.bf16.msra.mxu0 %v2380_v16 }
 0x46a   : > { %v1041_v25 = vand.u32 %v1036_v24, %v3216_v18 }
 0x46c   : > { %1050 = vmatpush.bf16.msra.mxu1 %v1041_v25 }
 0x46f   : > { %2355 = vmatmul.msk.bf16.vlgmr.msra.gmra.mxu1 %vm862_vm11, %v1034_v26 }
 0x470   : > { %1395 = vmatpush.bf16.msrb.mxu1 %v2727_v37 }
 0x4c6   : > { %v882_v27 = vpop.f32.mrf.mxu3 }
 0x4ce   : > { %v884_v28 = vpop.f32.mrf.mxu3 }
 0x4d2   : > { %v940_v29 = vpop.f32.mrf.mxu1 }
 0x4d3   : > { %1057 = vrot.lane.b32.xlu1 %v940_v29, %s3730_s3 }
 0x4d7   : > { %v996_v30 = vpop.f32.mrf.mxu3 }
 0x4d8   : > { %1061 = vrot.lane.b32.xlu2 %v996_v30, %s3728_s30  ;;  %v2824_v30 = vld [vmem:[%s3706_s11] ss:$0 sm:$0xff]  ;;  %s3754_s30 = smov 112  }
 0x4da   : > { %v942_v31 = vpop.f32.mrf.mxu1 }
 0x4df   : > { %v998_v32 = vpop.f32.mrf.mxu3 }
 0x4ec   : > { %v1052_v33 = vpop.f32.mrf.mxu1 }
 0x4ed   : > { %1065 = vrot.lane.b32.xlu1 %v1052_v33, %s2956_s26  ;;  %v2825_v33 = vld [vmem:[%s3707_s12] ss:$0 sm:$0xff] }
 0x4f4   : > { %v1054_v34 = vpop.f32.mrf.mxu1 }
 0x532   : > { %v1062_v41 = vpop.permute.xlu2 %1061 }
 0x545   : > { %v1058_v39 = vpop.permute.xlu1 %1057 }
 0x546   : > { %v1068_v40 = vsel %vm828_vm9, %v882_v27, %v1058_v39  ;;  %v2726_v39 = vld [vmem:[%s3710_s15 + $0x30] sm:$0xff] }
 0x547   : > { %v1070_v43 = vsel %vm1069_vm12, %v1068_v40, %v1062_v41  ;;  %1396 = vmatpush.bf16.msrb.mxu1 %v2726_v39  ;;  %v2732_v40 = vld [vmem:[%s3710_s15 + $0x60] sm:$0xff]  ;;  %v2725_v41 = vld [vmem:[%s3710_s15 + $0x28] sm:$0xff] }
 0x548   : > { %1411 = vmatpush.bf16.msrb.mxu2 %v2732_v40  ;;  %v2741_v39 = vld [vmem:[%s3702_s7 + $0x64] sm:$0xf0]  ;;  %v2740_v40 = vld [vmem:[%s3702_s7 + $0x64] sm:$0xf] }
 0x54b   : > { %1397 = vmatpush.bf16.msrb.mxu1 %v2725_v41  ;;  %v2501_v41 = vor.u32 %v2741_v39, %v2500_v38 }
 0x55f   : > { %v1066_v42 = vpop.permute.xlu1 %1065 }
 0x560   : > { %v1072_v44 = vsel %vm1071_vm13, %v1070_v43, %v1066_v42  ;;  %v2731_v42 = vld [vmem:[%s3710_s15 + $0x58] sm:$0xff]  ;;  %v2724_v43 = vld [vmem:[%s3710_s15 + $0x20] sm:$0xff] }
 0x561   : > { %v1073_v45 = vpack.c.bf16 %v1072_v44, %v1072_v44  ;;  %1412 = vmatpush.bf16.msrb.mxu2 %v2731_v42  ;;  %1398 = vmatpush.bf16.msrb.mxu1 %v2724_v43  ;;  %v2730_v44 = vld [vmem:[%s3710_s15 + $0x50] sm:$0xff]  ;;  %v2502_v42 = vld [vmem:[%s3702_s7 + $0x68] sm:$0xf0] }
 0x562   : > { %v2505_v43 = vor.u32 %v2740_v40, %v2502_v42 }
 0x563   : > { %2372 = vmatmul.msk.bf16.vlgmr.msra.gmra.mxu2 %vm673_vm0, %v1073_v45  ;;  %v2723_v45 = vld [vmem:[%s3710_s15 + $0x18] sm:$0xff] }
 0x565   : > { %1413 = vmatpush.bf16.msrb.mxu2 %v2730_v44  ;;  %1399 = vmatpush.bf16.msrb.mxu1 %v2723_v45  ;;  %v2492_v44 = vld [vmem:[%s3702_s7 + $0x50] sm:$0xf]  ;;  %v2739_v45 = vld [vmem:[%s3702_s7 + $0x54] sm:$0xf0] }
 0x5e6   : > { %v1122_v47 = vpop.f32.mrf.mxu2 }
 0x5e7   : > { %v1123_v48 = vadd.f32 %v2823_v46, %v1122_v47  ;;  %v2729_v46 = vld [vmem:[%s3710_s15 + $0x48] sm:$0xff]  ;;  %v2722_v47 = vld [vmem:[%s3710_s15 + $0x10] sm:$0xff] }
 0x5e8   : > { %1414 = vmatpush.bf16.msrb.mxu2 %v2729_v46  ;;  %1400 = vmatpush.bf16.msrb.mxu1 %v2722_v47  ;;  %v2738_v46 = vld [vmem:[%s3702_s7 + $0x54] sm:$0xf]  ;;  %v2493_v47 = vor.u32 %v2739_v45, %v2492_v44 }
 0x5e9   : > { %v3278_v49 = vadd.f32 %v1123_v48, %v3143_v13  ;;  %v2719_v13 = vld [vmem:[%s3708_s13 + $0x34] sm:$0xf0]  ;;  %v2728_v48 = vld [vmem:[%s3710_s15 + $0x40] sm:$0xff] }
 0x5ea   : > { %v2400_v59 = vor.u32 %v2719_v13, %v2399_v57 }
 0x5eb   : > { %v1129_v50 = vsel %vm700_vm2, %v3278_v49, 0.0 }
 0x5ec   : > { %1130 = vadd.xlane.f32.xlu2 %v1129_v50  ;;  %1221 = vmatpush.bf16.msra.mxu3 %v2400_v59  ;;  %v2721_v50 = vld [vmem:[%s3710_s15 + $0x8] sm:$0xff] }
 0x5ed   : > { %1415 = vmatpush.bf16.msrb.mxu2 %v2728_v48  ;;  %1401 = vmatpush.bf16.msrb.mxu1 %v2721_v50  ;;  %v2494_v48 = vld [vmem:[%s3702_s7 + $0x58] sm:$0xf0] }
 0x5ee   : > { %v1124_v51 = vpop.f32.mrf.mxu2  ;;  %v2497_v50 = vor.u32 %v2738_v46, %v2494_v48 }
 0x5ef   : > { %v1168_v51 = vld [vmem:[%s3709_s14] sm:$0x3] }
 0x5f0   : > { %1222 = vmatpush.bf16.msra.mxu3 %v2392_v1  ;;  %v1170_v57 = vperm.slane %v1168_v51, 0 }
 0x5f4   : > { %1223 = vmatpush.bf16.msra.mxu3 %v2384_v7 }
 0x5f8   : > { %1224 = vmatpush.bf16.msra.mxu3 %v2376_v14 }
 0x65f   : > { %v1131_v52 = vpop.xlane.xlu2 %1130 }
 0x660   : > { %v1132_v53 = vmul.f32 %v1131_v52, %v3147_v22  ;;  %v2720_v52 = vld [vmem:[%s3710_s15] sm:$0xff] }
 0x661   : > { %1402 = vmatpush.bf16.msrb.mxu1 %v2720_v52  ;;  %v2737_v52 = vld [vmem:[%s3702_s7 + $0x44] sm:$0xf0] }
 0x662   : > { %v1133_v54 = vsub.f32 %v3278_v49, %v1132_v53  ;;  %v1171_v53 = vperm.slane %v1168_v51, 1  ;;  %v2484_v51 = vld [vmem:[%s3702_s7 + $0x40] sm:$0xf] }
 0x664   : > { %v1134_v55 = vmul.f32 %v1133_v54, %v1133_v54 }
 0x666   : > { %v1135_v56 = vsel %vm700_vm2, %v1134_v55, 0.0 }
 0x667   : > { %1136 = vadd.xlane.f32.xlu0 %v1135_v56 }
 0x6da   : > { %v1137_v19 = vpop.xlane.xlu0 %1136 }
 0x6db   : > { %v1138_v20 = vmul.f32 %v1137_v19, %v3147_v22 }
 0x6dd   : > { %v1139_v23 = vadd.f32 1e-06, %v1138_v20 }
 0x6df   : > { %2855 = vrsqrt.f32 %v1139_v23  ;;  %vm1146_vm15 = vweird.f32 %v1139_v23 }
 0x6e5   : > { %v2856_v24 = vpop.eup %2855 }
 0x6e6   : > { %v1141_v25 = vmul.f32 %v2856_v24, %v1139_v23  ;;  %vm1147_vm14 = vweird.f32 %v2856_v24 }
 0x6e7   : > { %vm1148_vm1 = vmor %vm1146_vm15, %vm1147_vm14 }
 0x6e8   : > { %v1142_v26 = vmul.f32 %v2856_v24, %v1141_v25 }
 0x6ea   : > { %v1143_v27 = vmul.f32 0.5, %v1142_v26 }
 0x6ec   : > { %v1144_v28 = vsub.f32 1.5, %v1143_v27 }
 0x6ee   : > { %v1145_v29 = vmul.f32 %v2856_v24, %v1144_v28 }
 0x6f0   : > { %v1149_v31 = vsel %vm1148_vm1, %v2856_v24, %v1145_v29 }
 0x6f1   : > { %v1150_v32 = vmul.f32 %v1149_v31, %v1133_v54 }
 0x6f3   : > { %v1154_v34 = vmul.f32 %v2824_v30, %v1150_v32 }
 0x6f5   : > { %v1158_v35 = vadd.f32 %v2825_v33, %v1154_v34  ;;  %v2743_v33 = vld [vmem:[%s3702_s7 + $0x74] sm:$0xf0]  ;;  %v2742_v34 = vld [vmem:[%s3702_s7 + $0x74] sm:$0xf] }
 0x6f7   : > { %v1159_v36 = vpack.c.bf16 %v1158_v35, %v1158_v35 }
 0x6f9   : > { %2405 = vmatmul.msk.bf16.vlgmr.msra.gmra.mxu3 %vm673_vm0, %v1159_v36  ;;  %2406 = vmatmul.msk.bf16.vlgmr.msra.gmra.mxu0 %vm673_vm0, %v1159_v36  ;;  %v2510_v36 = vld [vmem:[%s3702_s7 + $0x78] sm:$0xf0] }
 0x6fa   : > { %v2513_v37 = vor.u32 %v2742_v34, %v2510_v36 }
 0x6fc   : > { %1533 = vmatpush.bf16.msrb.mxu0 %v2513_v37 }
 0x700   : > { %1534 = vmatpush.bf16.msrb.mxu0 %v2505_v43 }
 0x704   : > { %1535 = vmatpush.bf16.msrb.mxu0 %v2497_v50 }
 0x776   : > { %v1239_v54 = vpop.f32.mrf.mxu0 }
 0x777   : > { %v1240_v55 = vadd.f32 %v1239_v54, %v1171_v53  ;;  %v2736_v53 = vld [vmem:[%s3702_s7 + $0x44] sm:$0xf]  ;;  %v2485_v54 = vor.u32 %v2737_v52, %v2484_v51 }
 0x779   : > { %v1246_v56 = vmul.f32 0.044715, %v1240_v55  ;;  %v1244_v7 = vmul.f32 0.5, %v1240_v55 }
 0x77b   : > { %v1248_v13 = vmul.f32 %v1246_v56, %v1240_v55 }
 0x77c   : > { %v1226_v58 = vpop.f32.mrf.mxu3 }
 0x77d   : > { %v1250_v59 = vmul.f32 %v1248_v13, %v1240_v55  ;;  %v1227_v60 = vadd.f32 %v1226_v58, %v1170_v57 }
 0x77e   : > { %v1241_v61 = vpop.f32.mrf.mxu0 }
 0x77f   : > { %v1245_v62 = vmul.f32 0.044715, %v1227_v60  ;;  %v1252_v63 = vadd.f32 %v1250_v59, %v1240_v55  ;;  %v1243_v12 = vmul.f32 0.5, %v1227_v60  ;;  %v2486_v55 = vld [vmem:[%s3702_s7 + $0x48] sm:$0xf0] }
 0x780   : > { %v2489_v56 = vor.u32 %v2736_v53, %v2486_v55 }
 0x781   : > { %v1247_v0 = vmul.f32 %v1245_v62, %v1227_v60  ;;  %v1254_v1 = vmul.f32 0.7978846, %v1252_v63 }
 0x782   : > { %1536 = vmatpush.bf16.msrb.mxu0 %v2489_v56 }
 0x783   : > { %v1249_v2 = vmul.f32 %v1247_v0, %v1227_v60  ;;  %2857 = vtanh.f32 %v1254_v1  ;;  %v2827_v1 = vld [vmem:[%s3700_s5 + $0x1] ss:$0 sm:$0xff] }
 0x784   : > { %v1228_v3 = vpop.f32.mrf.mxu3 }
 0x785   : > { %v1251_v4 = vadd.f32 %v1249_v2, %v1227_v60 }
 0x787   : > { %v1253_v5 = vmul.f32 0.7978846, %v1251_v4  ;;  %v2828_v4 = vld [vmem:[%s3701_s6 + $0x1] ss:$0 sm:$0xff] }
 0x789   : > { %v2858_v6 = vpop.eup %2857  ;;  %2859 = vtanh.f32 %v1253_v5 }
 0x78a   : > { %v1258_v8 = vadd.f32 1.0, %v2858_v6 }
 0x78c   : > { %v1260_v9 = vmul.f32 %v1258_v8, %v1244_v7  ;;  %v2481_v8 = vld [vmem:[%s3703_s8 + $0x2] sm:$0x3] }
 0x78e   : > { %v1262_v10 = vpack.c.bf16 %v1260_v9, %v1260_v9  ;;  %v1470_v9 = vperm.slane %v2481_v8, 1 }
 0x78f   : > { %v2860_v11 = vpop.eup %2859 }
 0x790   : > { %1416 = vmatmul.bf16.vlgmr.msrb.gmra.mxu2 %v1262_v10  ;;  %v1257_v14 = vadd.f32 1.0, %v2860_v11 }
 0x792   : > { %v1259_v15 = vmul.f32 %v1257_v14, %v1243_v12  ;;  %v1469_v14 = vperm.slane %v2481_v8, 0 }
 0x794   : > { %v1261_v16 = vpack.c.bf16 %v1259_v15, %v1259_v15 }
 0x796   : > { %1403 = vmatmul.bf16.vlgmr.msrb.gmra.mxu1 %v1261_v16 }
 0x813   : > { %v1404_v19 = vpop.f32.mrf.mxu1  ;;  %v1417_v20 = vpop.f32.mrf.mxu2 }
 0x814   : > { %v1405_v21 = vadd.f32 %v2826_v17, %v1404_v19 }
 0x816   : > { %v1418_v23 = vadd.f32 %v1417_v20, %v1405_v21 }
 0x818   : > { %v3397_v24 = vadd.f32 %v1418_v23, %v3278_v49  ;;  %v2508_v49 = vld [vmem:[%s3702_s7 + $0x70] sm:$0xf] }
 0x819   : > { %v2509_v35 = vor.u32 %v2743_v33, %v2508_v49 }
 0x81a   : > { %v1426_v25 = vsel %vm700_vm2, %v3397_v24, 0.0 }
 0x81b   : > { %v1406_v26 = vpop.f32.mrf.mxu1  ;;  %v1419_v27 = vpop.f32.mrf.mxu2  ;;  %1427 = vadd.xlane.f32.xlu1 %v1426_v25  ;;  %1520 = vmatpush.bf16.msrb.mxu3 %v2509_v35 }
 0x81f   : > { %1521 = vmatpush.bf16.msrb.mxu3 %v2501_v41 }
 0x823   : > { %1522 = vmatpush.bf16.msrb.mxu3 %v2493_v47 }
 0x827   : > { %1523 = vmatpush.bf16.msrb.mxu3 %v2485_v54 }
 0x88e   : > { %v1428_v28 = vpop.xlane.xlu1 %1427 }
 0x88f   : > { %v1429_v29 = vmul.f32 %v1428_v28, %v3147_v22 }
 0x891   : > { %v1430_v30 = vsub.f32 %v3397_v24, %v1429_v29 }
 0x893   : > { %v1431_v31 = vmul.f32 %v1430_v30, %v1430_v30 }
 0x895   : > { %v1432_v32 = vsel %vm700_vm2, %v1431_v31, 0.0 }
 0x896   : > { %1433 = vadd.xlane.f32.xlu2 %v1432_v32 }
 0x909   : > { %v1434_v57 = vpop.xlane.xlu2 %1433 }
 0x90a   : > { %v1435_v13 = vmul.f32 %v1434_v57, %v3147_v22 }
 0x90c   : > { %v1436_v58 = vadd.f32 1e-06, %v1435_v13 }
 0x90e   : > { %2861 = vrsqrt.f32 %v1436_v58  ;;  %vm1443_vm4 = vweird.f32 %v1436_v58 }
 0x914   : > { %v2862_v59 = vpop.eup %2861 }
 0x915   : > { %v1438_v60 = vmul.f32 %v2862_v59, %v1436_v58  ;;  %vm1444_vm3 = vweird.f32 %v2862_v59 }
 0x916   : > { %vm1445_vm5 = vmor %vm1443_vm4, %vm1444_vm3 }
 0x917   : > { %v1439_v61 = vmul.f32 %v2862_v59, %v1438_v60 }
 0x919   : > { %v1440_v62 = vmul.f32 0.5, %v1439_v61 }
 0x91b   : > { %v1441_v63 = vsub.f32 1.5, %v1440_v62 }
 0x91d   : > { %v1442_v0 = vmul.f32 %v2862_v59, %v1441_v63 }
 0x91f   : > { %v1446_v2 = vsel %vm1445_vm5, %v2862_v59, %v1442_v0 }
 0x920   : > { %v1447_v3 = vmul.f32 %v1446_v2, %v1430_v30 }
 0x922   : > { %v1451_v5 = vmul.f32 %v2827_v1, %v1447_v3 }
 0x924   : > { %v1455_v6 = vadd.f32 %v2828_v4, %v1451_v5 }
 0x926   : > { %v1456_v7 = vpack.c.bf16 %v1455_v6, %v1455_v6 }
 0x928   : > { %2514 = vmatmul.msk.bf16.vlgmr.msrb.gmra.mxu3 %vm673_vm0, %v1456_v7  ;;  %2515 = vmatmul.msk.bf16.vlgmr.msrb.gmra.mxu0 %vm673_vm0, %v1456_v7 }
 0x9a5   : > { %v1538_v10 = vpop.f32.mrf.mxu0 }
 0x9a6   : > { %v1539_v11 = vadd.f32 %v1538_v10, %v1470_v9 }
 0x9a8   : > { %v3464_v12 = vpack.c.bf16 %v1539_v11, %v1539_v11 }
 0x9aa   : > { %v1584_v15 = vand.u32 %v3464_v12, %v3216_v18 }
 0x9ab   : > { %v1525_v16 = vpop.f32.mrf.mxu3 }
 0x9ac   : > { %v1526_v17 = vadd.f32 %v1525_v16, %v1469_v14  ;;  %1593 = vmatpush.bf16.msra.mxu0 %v1584_v15 }
 0x9ad   : > { %v1540_v19 = vpop.f32.mrf.mxu0 }
 0x9ae   : > { %v1542_v20 = vmul.f32 0.25, %v1526_v17  ;;  %v1544_v21 = vpack.c.bf16 %v1526_v17, %v1526_v17 }
 0x9b0   : > { %v1543_v23 = vpack.c.bf16 %v1542_v20, %v1542_v20  ;;  %1602 = vrot.lane.b32.xlu1 %v1544_v21, %s2956_s26  ;;  %1546 = vrot.lane.b32.xlu0 %v1544_v21, %s2953_s0 }
 0x9b2   : > { %1600 = vrot.lane.b32.xlu2 %v1543_v23, %s3754_s30 }
 0x9b3   : > { %v1527_v25 = vpop.f32.mrf.mxu3 }
 0x9b8   : > { %1715 = vrot.lane.b32.xlu1 %v1544_v21, %s3755_s29  ;;  %1659 = vrot.lane.b32.xlu0 %v1544_v21, %s3756_s20 }
 0x9ba   : > { %1713 = vrot.lane.b32.xlu2 %v1543_v23, %s3757_s24 }
 0x9c0   : > { %1657 = vrot.lane.b32.xlu0 %v1543_v23, %s3758_s1 }
 0xa0c   : > { %v1601_v30 = vpop.permute.xlu2 %1600 }
 0xa14   : > { %v1714_v34 = vpop.permute.xlu2 %1713 }
 0xa22   : > { %v1603_v26 = vpop.permute.xlu1 %1602  ;;  %v1547_v27 = vpop.permute.xlu0 %1546 }
 0xa23   : > { %v1608_v28 = vsel %vm828_vm9, %v1603_v26, 0  ;;  %v1552_v29 = vsel %vm828_vm9, %v1547_v27, 0 }
 0xa24   : > { %1561 = vmatpush.bf16.xpose.msra.mxu3 %v1552_v29  ;;  %1617 = vmatpush.bf16.xpose.msra.mxu1 %v1608_v28 }
 0xa2a   : > { %v1716_v31 = vpop.permute.xlu1 %1715  ;;  %v1660_v32 = vpop.permute.xlu0 %1659 }
 0xa2b   : > { %v1721_v49 = vsel %vm828_vm9, %v1716_v31, 0  ;;  %v1665_v33 = vsel %vm828_vm9, %v1660_v32, 0  ;;  %2516 = vmatmul.msk.bf16.vlgmr.msra.gmra.mxu3 %vm828_vm9, %v1543_v23  ;;  %2518 = vmatmul.msk.bf16.vlgmr.msra.gmra.mxu1 %vm828_vm9, %v1601_v30 }
 0xa2c   : > { %1674 = vmatpush.bf16.xpose.msrb.mxu3 %v1665_v33  ;;  %1730 = vmatpush.bf16.xpose.msrb.mxu1 %v1721_v49 }
 0xa32   : > { %v1658_v35 = vpop.permute.xlu0 %1657 }
 0xa3b   : > { %2520 = vmatmul.msk.bf16.vlgmr.msrb.gmra.mxu3 %vm828_vm9, %v1658_v35  ;;  %2522 = vmatmul.msk.bf16.vlgmr.msrb.gmra.mxu1 %vm828_vm9, %v1714_v34 }
 0xaa8   : > { %v1619_v36 = vpop.f32.mrf.mxu1 }
 0xaa9   : > { %v1623_v37 = vsel %vm848_vm10, %v1619_v36, -inf }
 0xaaa   : > { %1624 = vmax.xlane.f32.xlu1 %v1623_v37  ;;  %v2746_v37 = vld [vmem:[%s3704_s9 + $0x30] sm:$0xff] }
 0xaae   : > { %v1563_v38 = vpop.f32.mrf.mxu3 }
 0xaaf   : > { %v1567_v39 = vsel %vm848_vm10, %v1563_v38, -inf }
 0xab0   : > { %v1621_v40 = vpop.f32.mrf.mxu1  ;;  %1568 = vmax.xlane.f32.xlu0 %v1567_v39  ;;  %v2744_v39 = vld [vmem:[%s3704_s9 + $0x20] sm:$0xff] }
 0xab6   : > { %v1565_v41 = vpop.f32.mrf.mxu3 }
 0xab8   : > { %v1732_v42 = vpop.f32.mrf.mxu1 }
 0xab9   : > { %v1736_v43 = vsel %vm848_vm10, %v1732_v42, -inf }
 0xaba   : > { %1737 = vmax.xlane.f32.xlu2 %v1736_v43 }
 0xabe   : > { %v1676_v44 = vpop.f32.mrf.mxu3 }
 0xabf   : > { %v1680_v45 = vsel %vm848_vm10, %v1676_v44, -inf }
 0xac0   : > { %v1734_v46 = vpop.f32.mrf.mxu1  ;;  %1681 = vmax.xlane.f32.xlu1 %v1680_v45 }
 0xac6   : > { %v1678_v47 = vpop.f32.mrf.mxu3 }
 0xac7   : > { %v2829_v47 = vld [vmem:[%s3705_s10 + $0x1] ss:$0 sm:$0xff] }
 0xad9   : > { %1636 = vrot.lane.b32.xlu1 %v3464_v12, %s3754_s30 }
 0xb1d   : > { %v1625_v48 = vpop.xlane.xlu1 %1624 }
 0xb1e   : > { %v1626_v50 = vsub.f32 %v1619_v36, %v1625_v48  ;;  %v2747_v36 = vld [vmem:[%s3704_s9 + $0x38] sm:$0xff] }
 0xb1f   : > { %1830 = vmatpush.bf16.msra.mxu3 %v2747_v36 }
 0xb20   : > { %v1627_v51 = vmul.f32 1.442695, %v1626_v50 }
 0xb22   : > { %2863 = vpow2.f32 %v1627_v51 }
 0xb23   : > { %v1569_v52 = vpop.xlane.xlu0 %1568  ;;  %1831 = vmatpush.bf16.msra.mxu3 %v2746_v37 }
 0xb24   : > { %v1570_v53 = vsub.f32 %v1563_v38, %v1569_v52  ;;  %v2745_v38 = vld [vmem:[%s3704_s9 + $0x28] sm:$0xff] }
 0xb26   : > { %v1571_v54 = vmul.f32 1.442695, %v1570_v53 }
 0xb27   : > { %1832 = vmatpush.bf16.msra.mxu3 %v2745_v38 }
 0xb28   : > { %v2864_v55 = vpop.eup %2863  ;;  %2865 = vpow2.f32 %v1571_v54 }
 0xb29   : > { %v1629_v56 = vsel %vm848_vm10, %v2864_v55, 0.0 }
 0xb2a   : > { %1630 = vadd.xlane.f32.xlu0 %v1629_v56 }
 0xb2b   : > { %1833 = vmatpush.bf16.msra.mxu3 %v2744_v39  ;;  %v2761_v39 = vld [vmem:[%s3710_s15 + $0xa8] sm:$0xff] }
 0xb2d   : > { %v1738_v57 = vpop.xlane.xlu2 %1737 }
 0xb2e   : > { %v2866_v13 = vpop.eup %2865  ;;  %v1739_v58 = vsub.f32 %v1732_v42, %v1738_v57 }
 0xb2f   : > { %v1573_v59 = vsel %vm848_vm10, %v2866_v13, 0.0 }
 0xb30   : > { %v1740_v60 = vmul.f32 1.442695, %v1739_v58  ;;  %1574 = vadd.xlane.f32.xlu2 %v1573_v59  ;;  %v2587_v58 = vld [vmem:[%s3708_s13 + $0x70] sm:$0xf]  ;;  %v2754_v59 = vld [vmem:[%s3708_s13 + $0x74] sm:$0xf] }
 0xb32   : > { %2867 = vpow2.f32 %v1740_v60 }
 0xb33   : > { %v1682_v61 = vpop.xlane.xlu1 %1681 }
 0xb34   : > { %v1683_v62 = vsub.f32 %v1676_v44, %v1682_v61  ;;  %v2589_v61 = vld [vmem:[%s3708_s13 + $0x78] sm:$0xf0] }
 0xb36   : > { %v1684_v63 = vmul.f32 1.442695, %v1683_v62  ;;  %v2592_v62 = vor.u32 %v2754_v59, %v2589_v61 }
 0xb38   : > { %v2868_v0 = vpop.eup %2867  ;;  %2869 = vpow2.f32 %v1684_v63  ;;  %1951 = vmatpush.bf16.msra.mxu1 %v2592_v62  ;;  %v2579_v63 = vld [vmem:[%s3708_s13 + $0x60] sm:$0xf] }
 0xb39   : > { %v1742_v1 = vsel %vm848_vm10, %v2868_v0, 0.0 }
 0xb3a   : > { %1743 = vadd.xlane.f32.xlu0 %v1742_v1  ;;  %v2752_v1 = vld [vmem:[%s3708_s13 + $0x64] sm:$0xf] }
 0xb3e   : > { %v2870_v2 = vpop.eup %2869 }
 0xb3f   : > { %v1686_v3 = vsel %vm848_vm10, %v2870_v2, 0.0 }
 0xb40   : > { %1687 = vadd.xlane.f32.xlu2 %v1686_v3  ;;  %v2581_v3 = vld [vmem:[%s3708_s13 + $0x68] sm:$0xf0] }
 0xb4b   : > { %v1637_v4 = vpop.permute.xlu1 %1636 }
 0xb4c   : > { %v1642_v5 = vand.u32 %v1637_v4, %v3216_v18  ;;  %v2584_v4 = vor.u32 %v2752_v1, %v2581_v3 }
 0xb4e   : > { %1748 = vrot.lane.b32.xlu0 %v3464_v12, %s3757_s24  ;;  %1651 = vmatpush.bf16.msra.mxu2 %v1642_v5  ;;  %v2571_v5 = vld [vmem:[%s3708_s13 + $0x50] sm:$0xf]  ;;  %s619_s24 = sand.u32 1, %s2941_s22  }
 0xb4f   : > { %1952 = vmatpush.bf16.msra.mxu1 %v2584_v4  ;;  %s2295_s27 = sshll.u32 %s619_s24, 1 }
 0xb50   : > { %s621_s3 = scalar_lea.vmem [#allocation2], %s2295_s27  ;;  %s2907_s27 = scalar_lea.hbm %s3714_s19, 4 }
 0xb51   : > { %s2207_s30 = sshll.u32 %s621_s3, 4  ;;  %s2208_s30 = int_to_ptr.vmem [resolvable:$true] %s2207_s30 }
 0xb58   : > { %1692 = vrot.lane.b32.xlu2 %v3464_v12, %s3758_s1  ;;  %s2693_s1 = sshll.u32 %s3086_s2, 1 }
 0xb59   : > { %s2205_s23 = scalar_lea.hbm %s3714_s19, %s2693_s1 }
 0xb9d   : > { %v1631_v6 = vpop.xlane.xlu0 %1630 }
 0xb9e   : > { %2871 = vrcp.f32 %v1631_v6  ;;  %v2751_v6 = vld [vmem:[%s3708_s13 + $0x54] sm:$0xf0] }
 0xba3   : > { %v1575_v7 = vpop.xlane.xlu2 %1574 }
 0xba4   : > { %v2872_v8 = vpop.eup %2871  ;;  %2873 = vrcp.f32 %v1575_v7  ;;  %v2750_v7 = vld [vmem:[%s3708_s13 + $0x54] sm:$0xf] }
 0xba5   : > { %v1633_v9 = vmul.f32 %v2872_v8, %v2864_v55  ;;  %v2572_v8 = vor.u32 %v2751_v6, %v2571_v5 }
 0xba7   : > { %v1634_v10 = vpack.c.bf16 %v1633_v9, %v1633_v9  ;;  %v2573_v9 = vld [vmem:[%s3708_s13 + $0x58] sm:$0xf0] }
 0xba9   : > { %2519 = vmatmul.msk.bf16.vlgmr.msra.gmra.mxu2 %vm862_vm11, %v1634_v10  ;;  %v2576_v10 = vor.u32 %v2750_v7, %v2573_v9 }
 0xbaa   : > { %v2874_v11 = vpop.eup %2873 }
 0xbab   : > { %v1577_v14 = vmul.f32 %v2874_v11, %v2866_v13  ;;  %v2563_v11 = vld [vmem:[%s3708_s13 + $0x40] sm:$0xf]  ;;  %1953 = vmatpush.bf16.msra.mxu1 %v2576_v10 }
 0xbad   : > { %v1578_v15 = vpack.c.bf16 %v1577_v14, %v1577_v14  ;;  %v1744_v17 = vpop.xlane.xlu0 %1743  ;;  %v2749_v14 = vld [vmem:[%s3708_s13 + $0x44] sm:$0xf0] }
 0xbaf   : > { %2517 = vmatmul.msk.bf16.vlgmr.msra.gmra.mxu0 %vm862_vm11, %v1578_v15  ;;  %v2748_v15 = vld [vmem:[%s3708_s13 + $0x44] sm:$0xf] }
 0xbb3   : > { %v1688_v16 = vpop.xlane.xlu2 %1687 }
 0xbb4   : > { %2875 = vrcp.f32 %v1688_v16  ;;  %v2564_v16 = vor.u32 %v2749_v14, %v2563_v11 }
 0xbb5   : > { %2877 = vrcp.f32 %v1744_v17  ;;  %v2565_v17 = vld [vmem:[%s3708_s13 + $0x48] sm:$0xf0] }
 0xbba   : > { %v2876_v19 = vpop.eup %2875 }
 0xbbb   : > { %v1690_v12 = vmul.f32 %v2876_v19, %v2870_v2  ;;  %v1693_v20 = vpop.permute.xlu2 %1692  ;;  %v2878_v23 = vpop.eup %2877  ;;  %v2568_v19 = vor.u32 %v2748_v15, %v2565_v17 }
 0xbbc   : > { %v1698_v21 = vand.u32 %v1693_v20, %v3216_v18  ;;  %v1746_v26 = vmul.f32 %v2878_v23, %v2868_v0  ;;  %v2753_v0 = vld [vmem:[%s3708_s13 + $0x64] sm:$0xf0]  ;;  %v2771_v20 = vld [vmem:[%s3710_s15 + $0xf8] sm:$0xff] }
 0xbbd   : > { %v1691_v25 = vpack.c.bf16 %v1690_v12, %v1690_v12  ;;  %v2580_v2 = vor.u32 %v2753_v0, %v2579_v63  ;;  %1954 = vmatpush.bf16.msra.mxu1 %v2568_v19  ;;  %v2763_v12 = vld [vmem:[%s3710_s15 + $0xb8] sm:$0xff]  ;;  %2127 = vmatpush.bf16.msrb.mxu3 %v2771_v20  ;;  %v2832_v19 = vld [vmem:[%s3711_s16 + $0x1] ss:$0 sm:$0xff] }
 0xbbe   : > { %1707 = vmatpush.bf16.msrb.mxu0 %v1698_v21  ;;  %v1747_v29 = vpack.c.bf16 %v1746_v26, %v1746_v26  ;;  %v2770_v26 = vld [vmem:[%s3710_s15 + $0xf0] sm:$0xff] }
 0xbc0   : > { %v1749_v27 = vpop.permute.xlu0 %1748 }
 0xbc1   : > { %v1754_v28 = vand.u32 %v1749_v27, %v3216_v18  ;;  %2521 = vmatmul.msk.bf16.vlgmr.msrb.gmra.mxu0 %vm862_vm11, %v1691_v25  ;;  %v2762_v25 = vld [vmem:[%s3710_s15 + $0xb0] sm:$0xff]  ;;  %2128 = vmatpush.bf16.msrb.mxu3 %v2770_v26 }
 0xbc3   : > { %1763 = vmatpush.bf16.msrb.mxu2 %v1754_v28 }
 0xbc6   : > { %2523 = vmatmul.msk.bf16.vlgmr.msrb.gmra.mxu2 %vm862_vm11, %v1747_v29 }
 0xbc7   : > { %2114 = vmatpush.bf16.msra.mxu2 %v2763_v12 }
 0xbcb   : > { %2115 = vmatpush.bf16.msra.mxu2 %v2762_v25 }
 0xbcf   : > { %2116 = vmatpush.bf16.msra.mxu2 %v2761_v39 }
 0xc2c   : > { %v1595_v30 = vpop.f32.mrf.mxu0  ;;  %v1653_v31 = vpop.f32.mrf.mxu2 }
 0xc2d   : > { %1770 = vrot.lane.b32.xlu1 %v1653_v31, %s3755_s29  ;;  %s2209_s29 = sshll.u32 %s2205_s23, 4  ;;  %s2210_s29 = int_to_ptr.hbm [resolvable:$true] %s2209_s29 }
 0xc34   : > { %v1597_v32 = vpop.f32.mrf.mxu0  ;;  %v1655_v49 = vpop.f32.mrf.mxu2 }
 0xc3e   : > { %v1709_v33 = vpop.f32.mrf.mxu0 }
 0xc3f   : > { %1774 = vrot.lane.b32.xlu0 %v1709_v33, %s3756_s20  ;;  %v2830_v33 = vld [vmem:[%s3706_s11 + $0x1] ss:$0 sm:$0xff]  ;;  %s2192_s20 = scalar_lea.sflag [#allocation3], %s619_s24 }
 0xc46   : > { %v1711_v34 = vpop.f32.mrf.mxu0 }
 0xc49   : > { %v1765_v35 = vpop.f32.mrf.mxu2 }
 0xc4a   : > { %1778 = vrot.lane.b32.xlu1 %v1765_v35, %s2956_s26 }
 0xc51   : > { %v1767_v18 = vpop.f32.mrf.mxu2 }
 0xc52   : > { %v2831_v18 = vld [vmem:[%s3707_s12 + $0x1] ss:$0 sm:$0xff] }
 0xc9f   : > { %v1771_v40 = vpop.permute.xlu1 %1770 }
 0xca0   : > { %v1781_v42 = vsel %vm828_vm9, %v1595_v30, %v1771_v40  ;;  %v2769_v40 = vld [vmem:[%s3710_s15 + $0xe8] sm:$0xff] }
 0xca1   : > { %2129 = vmatpush.bf16.msrb.mxu3 %v2769_v40  ;;  %v2833_v40 = vld [vmem:[%s3712_s17] ss:$0 sm:$0xff] }
 0xcb1   : > { %v1775_v41 = vpop.permute.xlu0 %1774 }
 0xcb2   : > { %v1782_v43 = vsel %vm1069_vm12, %v1781_v42, %v1775_v41  ;;  %v2760_v41 = vld [vmem:[%s3710_s15 + $0xa0] sm:$0xff] }
 0xcb3   : > { %v2768_v42 = vld [vmem:[%s3710_s15 + $0xe0] sm:$0xff]  ;;  %2117 = vmatpush.bf16.msra.mxu2 %v2760_v41 }
 0xcb4   : > { %2130 = vmatpush.bf16.msrb.mxu3 %v2768_v42 }
 0xcbc   : > { %v1779_v44 = vpop.permute.xlu1 %1778 }
 0xcbd   : > { %v1783_v45 = vsel %vm1071_vm13, %v1782_v43, %v1779_v44  ;;  %v2759_v43 = vld [vmem:[%s3710_s15 + $0x98] sm:$0xff] }
 0xcbe   : > { %v1784_v46 = vpack.c.bf16 %v1783_v45, %v1783_v45  ;;  %v2767_v44 = vld [vmem:[%s3710_s15 + $0xd8] sm:$0xff]  ;;  %2118 = vmatpush.bf16.msra.mxu2 %v2759_v43  ;;  %v2758_v45 = vld [vmem:[%s3710_s15 + $0x90] sm:$0xff] }
 0xcbf   : > { %2131 = vmatpush.bf16.msrb.mxu3 %v2767_v44 }
 0xcc0   : > { %2549 = vmatmul.msk.bf16.vlgmr.msra.gmra.mxu3 %vm673_vm0, %v1784_v46  ;;  %v2766_v46 = vld [vmem:[%s3710_s15 + $0xd0] sm:$0xff] }
 0xcc2   : > { %2119 = vmatpush.bf16.msra.mxu2 %v2758_v45 }
 0xcc3   : > { %2132 = vmatpush.bf16.msrb.mxu3 %v2766_v46 }
 0xd43   : > { %v1835_v48 = vpop.f32.mrf.mxu3 }
 0xd44   : > { %v1836_v50 = vadd.f32 %v2829_v47, %v1835_v48  ;;  %v2757_v47 = vld [vmem:[%s3710_s15 + $0x88] sm:$0xff] }
 0xd45   : > { %v2765_v48 = vld [vmem:[%s3710_s15 + $0xc8] sm:$0xff]  ;;  %2120 = vmatpush.bf16.msra.mxu2 %v2757_v47 }
 0xd46   : > { %v3527_v51 = vadd.f32 %v1836_v50, %v3397_v24  ;;  %v2755_v24 = vld [vmem:[%s3708_s13 + $0x74] sm:$0xf0]  ;;  %2133 = vmatpush.bf16.msrb.mxu3 %v2765_v48  ;;  %v2756_v50 = vld [vmem:[%s3710_s15 + $0x80] sm:$0xff] }
 0xd47   : > { %v2588_v60 = vor.u32 %v2755_v24, %v2587_v58 }
 0xd48   : > { %v1844_v52 = vsel %vm700_vm2, %v3527_v51, 0.0 }
 0xd49   : > { %1845 = vadd.xlane.f32.xlu2 %v1844_v52  ;;  %1938 = vmatpush.bf16.msra.mxu0 %v2588_v60  ;;  %v2764_v52 = vld [vmem:[%s3710_s15 + $0xc0] sm:$0xff] }
 0xd4a   : > { %2121 = vmatpush.bf16.msra.mxu2 %v2756_v50  ;;  %2134 = vmatpush.bf16.msrb.mxu3 %v2764_v52 }
 0xd4b   : > { %v1837_v53 = vpop.f32.mrf.mxu3 }
 0xd4c   : > { %v2560_v53 = vld [vmem:[%s3709_s14 + $0x2] sm:$0x3] }
 0xd4d   : > { %1939 = vmatpush.bf16.msra.mxu0 %v2580_v2 }
 0xd51   : > { %1940 = vmatpush.bf16.msra.mxu0 %v2572_v8 }
 0xd55   : > { %1941 = vmatpush.bf16.msra.mxu0 %v2564_v16 }
 0xdbc   : > { %v1846_v54 = vpop.xlane.xlu2 %1845 }
 0xdbd   : > { %v1847_v55 = vmul.f32 %v1846_v54, %v3147_v22  ;;  %v1887_v54 = vperm.slane %v2560_v53, 0 }
 0xdbf   : > { %v1848_v56 = vsub.f32 %v3527_v51, %v1847_v55  ;;  %v1888_v55 = vperm.slane %v2560_v53, 1 }
 0xdc1   : > { %v1849_v57 = vmul.f32 %v1848_v56, %v1848_v56 }
 0xdc3   : > { %v1850_v13 = vsel %vm700_vm2, %v1849_v57, 0.0 }
 0xdc4   : > { %1851 = vadd.xlane.f32.xlu0 %v1850_v13 }
 0xe37   : > { %v1852_v21 = vpop.xlane.xlu0 %1851 }
 0xe38   : > { %v1853_v23 = vmul.f32 %v1852_v21, %v3147_v22 }
 0xe3a   : > { %v1854_v27 = vadd.f32 1e-06, %v1853_v23 }
 0xe3c   : > { %2879 = vrsqrt.f32 %v1854_v27  ;;  %vm1861_vm8 = vweird.f32 %v1854_v27 }
 0xe42   : > { %v2880_v28 = vpop.eup %2879 }
 0xe43   : > { %v1856_v29 = vmul.f32 %v2880_v28, %v1854_v27  ;;  %vm1862_vm6 = vweird.f32 %v2880_v28 }
 0xe44   : > { %vm1863_vm9 = vmor %vm1861_vm8, %vm1862_vm6 }
 0xe45   : > { %v1857_v30 = vmul.f32 %v2880_v28, %v1856_v29 }
 0xe47   : > { %v1858_v31 = vmul.f32 0.5, %v1857_v30 }
 0xe49   : > { %v1859_v32 = vsub.f32 1.5, %v1858_v31 }
 0xe4b   : > { %v1860_v49 = vmul.f32 %v2880_v28, %v1859_v32 }
 0xe4d   : > { %v1864_v34 = vsel %vm1863_vm9, %v2880_v28, %v1860_v49 }
 0xe4e   : > { %v1865_v35 = vmul.f32 %v1864_v34, %v1848_v56 }
 0xe50   : > { %v1869_v36 = vmul.f32 %v2830_v33, %v1865_v35 }
 0xe52   : > { %v1873_v37 = vadd.f32 %v2831_v18, %v1869_v36 }
 0xe54   : > { %v1874_v38 = vpack.c.bf16 %v1873_v37, %v1873_v37 }
 0xe56   : > { %2593 = vmatmul.msk.bf16.vlgmr.msra.gmra.mxu0 %vm673_vm0, %v1874_v38  ;;  %2594 = vmatmul.msk.bf16.vlgmr.msra.gmra.mxu1 %vm673_vm0, %v1874_v38 }
 0xed3   : > { %v1943_v56 = vpop.f32.mrf.mxu0  ;;  %v1956_v57 = vpop.f32.mrf.mxu1 }
 0xed4   : > { %v1944_v13 = vadd.f32 %v1943_v56, %v1887_v54  ;;  %v1957_v58 = vadd.f32 %v1956_v57, %v1888_v55 }
 0xed6   : > { %v1962_v24 = vmul.f32 0.044715, %v1944_v13  ;;  %v1963_v59 = vmul.f32 0.044715, %v1957_v58  ;;  %v1960_v8 = vmul.f32 0.5, %v1944_v13  ;;  %v1961_v10 = vmul.f32 0.5, %v1957_v58 }
 0xed8   : > { %v1964_v60 = vmul.f32 %v1962_v24, %v1944_v13  ;;  %v1965_v61 = vmul.f32 %v1963_v59, %v1957_v58 }
 0xeda   : > { %v1966_v62 = vmul.f32 %v1964_v60, %v1944_v13  ;;  %v1967_v63 = vmul.f32 %v1965_v61, %v1957_v58 }
 0xedb   : > { %v1945_v0 = vpop.f32.mrf.mxu0  ;;  %v1958_v1 = vpop.f32.mrf.mxu1 }
 0xedc   : > { %v1968_v2 = vadd.f32 %v1966_v62, %v1944_v13  ;;  %v1969_v3 = vadd.f32 %v1967_v63, %v1957_v58 }
 0xede   : > { %v1970_v4 = vmul.f32 0.7978846, %v1968_v2  ;;  %v1971_v5 = vmul.f32 0.7978846, %v1969_v3 }
 0xee0   : > { %2881 = vtanh.f32 %v1970_v4 }
 0xee1   : > { %2883 = vtanh.f32 %v1971_v5 }
 0xee6   : > { %v2882_v6 = vpop.eup %2881 }
 0xee7   : > { %v2884_v7 = vpop.eup %2883  ;;  %v1974_v9 = vadd.f32 1.0, %v2882_v6 }
 0xee8   : > { %v1975_v11 = vadd.f32 1.0, %v2884_v7 }
 0xee9   : > { %v1976_v14 = vmul.f32 %v1974_v9, %v1960_v8 }
 0xeea   : > { %v1977_v15 = vmul.f32 %v1975_v11, %v1961_v10 }
 0xeeb   : > { %v1978_v16 = vpack.c.bf16 %v1976_v14, %v1976_v14 }
 0xeec   : > { %v1979_v17 = vpack.c.bf16 %v1977_v15, %v1977_v15 }
 0xeed   : > { %2122 = vmatmul.bf16.vlgmr.msra.gmra.mxu2 %v1978_v16 }
 0xeee   : > { %2135 = vmatmul.bf16.vlgmr.msrb.gmra.mxu3 %v1979_v17 }
 0xf70   : > { %v2123_v12 = vpop.f32.mrf.mxu2 }
 0xf71   : > { %v2124_v20 = vadd.f32 %v2832_v19, %v2123_v12  ;;  %v2136_v21 = vpop.f32.mrf.mxu3 }
 0xf73   : > { %v2137_v23 = vadd.f32 %v2136_v21, %v2124_v20 }
 0xf75   : > { %v2140_v25 = vadd.f32 %v2137_v23, %v3527_v51 }
 0xf77   : > { %v2143_v26 = vsel %vm700_vm2, %v2140_v25, 0.0 }
 0xf78   : > { %v2125_v27 = vpop.f32.mrf.mxu2  ;;  %2144 = vadd.xlane.f32.xlu1 %v2143_v26 }
 0xf79   : > { %v2138_v28 = vpop.f32.mrf.mxu3 }
 0xfeb   : > { %v2145_v29 = vpop.xlane.xlu1 %2144 }
 0xfec   : > { %v2146_v30 = vmul.f32 %v2145_v29, %v3147_v22 }
 0xfee   : > { %v2147_v31 = vsub.f32 %v2140_v25, %v2146_v30 }
 0xff0   : > { %v2148_v32 = vmul.f32 %v2147_v31, %v2147_v31 }
 0xff2   : > { %v2149_v49 = vsel %vm700_vm2, %v2148_v32, 0.0 }
 0xff3   : > { %2150 = vadd.xlane.f32.xlu2 %v2149_v49 }
0x1066   : > { %v2151_v33 = vpop.xlane.xlu2 %2150 }
0x1067   : > { %v2152_v34 = vmul.f32 %v2151_v33, %v3147_v22  ;;  %v2834_v22 = vld [vmem:[%s3713_s18] ss:$0 sm:$0xff] }
0x1069   : > { %v2153_v35 = vadd.f32 1e-06, %v2152_v34 }
0x106b   : > { %2885 = vrsqrt.f32 %v2153_v35  ;;  %vm2160_vm11 = vweird.f32 %v2153_v35 }
0x1071   : > { %v2886_v18 = vpop.eup %2885 }
0x1072   : > { %v2155_v51 = vmul.f32 %v2886_v18, %v2153_v35  ;;  %vm2161_vm10 = vweird.f32 %v2886_v18 }
0x1073   : > { %vm2162_vm12 = vmor %vm2160_vm11, %vm2161_vm10 }
0x1074   : > { %v2156_v36 = vmul.f32 %v2886_v18, %v2155_v51 }
0x1076   : > { %v2157_v37 = vmul.f32 0.5, %v2156_v36 }
0x1078   : > { %v2158_v38 = vsub.f32 1.5, %v2157_v37 }
0x107a   : > { %v2159_v39 = vmul.f32 %v2886_v18, %v2158_v38 }
0x107c   : > { %v2163_v41 = vsel %vm2162_vm12, %v2886_v18, %v2159_v39 }
0x107d   : > { %v2164_v42 = vmul.f32 %v2163_v41, %v2147_v31 }
0x107f   : > { %v2168_v43 = vmul.f32 %v2833_v40, %v2164_v42 }
0x1081   : > { %v2172_v44 = vadd.f32 %v2834_v22, %v2168_v43 }
0x1083   : > { %v2174_v45 = vrot.slane %v2172_v44, 2 }
0x1085   : > { %2175 = vrot.lane.b32.xlu0 %v2174_v45, %s2953_s0  ;;  %s2901_s0 = sshra.s32 %s2210_s29, 4  ;;  %s2902_s0 = int_to_ptr.hbm [resolvable:$true] %s2901_s0 }
0x1086   : > { %s2903_s2 = scalar_lea.hbm %s2902_s0, 2  ;;  %p2908_p0 = scmp.lt.s32.totalorder %s2902_s0, %s3714_s19 }
0x1087   : > { %p2904_p11 = scmp.ne.s32.totalorder %s2902_s0, %s2903_s2  ;;  %p2909_p1 = scmp.lt.s32.totalorder %s2907_s27, %s2903_s2 }
0x1089   : > { %p2905_p12 = pnand %p2904_p11, %p3103_p5  ;;  %p2910_p2 = por %p2909_p1, %p2908_p0 }
0x108b   : > { %p2906_p13 = pneg %p2905_p12 }
0x108d   : > { %p2911_p3 = pnand %p2910_p2, %p2906_p13 }
0x10f7   : > { %v2176_v46 = vpop.permute.xlu0 %2175 }
0x10f8   : > { %v2178_v47 = vsel %vm673_vm0, %v2172_v44, %v2176_v46 }
0x10f9   : > { %2179 = vst [vmem:[%s621_s3 - $0x1] sm:$0x6] %v2178_v47  ;;  %v2181_v48 = vrot.slane %v2178_v47, 1 }
0x10fa   : > { %2914 = shalt.err (!%p2911_p3)
}
0x10fb   : > { %s3759_s24 = sld [smem:[#allocation11_spill]]  ;;  %v2183_v50 = vsel %vm866_vm7, %v2181_v48, 0.0 }
0x10fc   : > { %2772 = dma.vmem_to_hbm [thread:$0]  (%p3103_p5), %s2208_s30, 32, %s2210_s29, %s2192_s20   ;;  %v2184_v52 = vrot.slane %v2183_v50, 4 }
0x10fd   : > { %s3760_s26 = sld [smem:[#allocation17_spill]] }
0x10fe   : > { %v2185_v53 = vadd.f32 %v2184_v52, %v2183_v50 }
0x1100   : > { %v2186_v54 = vrot.slane %v2185_v53, 2 }
0x1102   : > { %v2187_v55 = vadd.f32 %v2186_v54, %v2185_v53 }
0x1103   : > { %s633_s1 = scalar_lea.vmem %s3760_s26, %s3759_s24 }
0x1104   : > { %v2188_v56 = vrot.slane %v2187_v55, 1 }
0x1106   : > { %v2189_v57 = vadd.f32 %v2188_v56, %v2187_v55 }
0x1108   : > { %2190 = vst [vmem:[%s633_s1] sm:$0x1] %v2189_v57 }
0x1109 PF: > { %s3761_s0 = sld [smem:[#allocation7_spill]] }
0x110a   : > { %s3762_s2 = sld [smem:[#allocation5_spill]] }
0x110f   : > { %p2778_p4 = scmp.ge.s32.totalorder %s3761_s0, 2 }
0x1110   : > { %s2224_s4 = sand.u32 1, %s3762_s2  }
0x1111   : > { %p2775_p5 = pnand %p2778_p4, %p3107_p6  ;;  %s2225_s30 = scalar_lea.sflag [#allocation3], %s2224_s4 }
0x1113   : > { %p2776_p7 = pneg %p2775_p5 }
0x1115   : > { %2932 = dma.done.wait (%p2776_p7), %s2225_s30, 32  }
0x1116   : > { %2934 = vsyncadd (%p2776_p7), %s2225_s30, 4294967264  ;;  %s3764_s24 = sld [smem:[#allocation8_spill]]  ;;  %s3767_s1 = smov %s2941_s22 }
0x1117   : > { %s3765_s29 = sld [smem:[#allocation6_spill]] }
0x1118   : > { %s3766_s23 = sld [smem:[#allocation9_spill]] }
0x111c   : > { %p31_p8 = scmp.ge.s32.totalorder %s3764_s24, 4  }
0x111d   : > { %s3768_s22 = smov %s3765_s29 }
0x111e   :  { %33 = sbr.rel (!%p31_p8) target bundleno = 10 (0xa), region = 155 }
0x1123   :  { %2237 = vsyncpa [#allocation3], 1 }
0x1124   :  { %2239 = vsyncpa [#allocation3 + $0x1], 1 }

</bundles_post_ra>
